<compile_context>
chip_gen: v5e
topology: v5e:2x2
jax: 0.10.0
libtpu: 0.0.40
codegen_flags: <defaults>
</compile_context>

<pallas_src>
import jax
import jax.numpy as jnp
from jax.experimental import pallas as pl
from jax.experimental.pallas import tpu as pltpu


# --------------------------------------------------------------------------- kernel
def _critic_kernel(x_ref,
                   w1_ref, b1_ref,
                   w2_ref, b2_ref,
                   w3_ref, b3_ref,
                   w4_ref, b4_ref,
                   o_ref):
    f32 = jnp.float32
    bf16 = jnp.bfloat16

    # fc1 + relu (single fused dot over the concatenated [state, action] tile)
    x = x_ref[...].astype(bf16)
    h = jnp.dot(x, w1_ref[...], preferred_element_type=f32) + b1_ref[...]
    h = jnp.maximum(h, 0.0).astype(bf16)

    # fc2 + relu
    h = jnp.dot(h, w2_ref[...], preferred_element_type=f32) + b2_ref[...]
    h = jnp.maximum(h, 0.0).astype(bf16)

    # fc3 + relu (keep f32 for the final reduction)
    h = jnp.dot(h, w3_ref[...], preferred_element_type=f32) + b3_ref[...]
    h = jnp.maximum(h, 0.0)

    # fc_out: N=1, so do it on the VPU/XLU (elementwise mul + lane reduce) instead of a
    # 400x1 MXU matmul.  w4_ref is the (1, 400) f32 weight row, b4_ref is (1, 1).
    q = jnp.sum(h * w4_ref[...], axis=-1, keepdims=True) + b4_ref[...]
    o_ref[...] = q.astype(o_ref.dtype)


# --------------------------------------------------------------------------- wrapper
def _round_up(x, m):
    return ((x + m - 1) // m) * m


def prepare_critic_params(params):
    """One-time weight prep (call OUTSIDE the per-step jit): cast the big matrices to
    bf16, keep biases f32, and pre-transpose the final 400x1 column into a lane-resident
    (1, 400) row for the VPU reduction."""
    bf16 = jnp.bfloat16
    f32 = jnp.float32
    return {
        "w1": params["w1"].astype(bf16),        # (state_dim+action_dim, 800)
        "b1": params["b1"].astype(f32),         # (1, 800)
        "w2": params["w2"].astype(bf16),        # (800, 600)
        "b2": params["b2"].astype(f32),         # (1, 600)
        "w3": params["w3"].astype(bf16),        # (600, 400)
        "b3": params["b3"].astype(f32),         # (1, 400)
        "w4_row": params["w4"].T.astype(f32),   # (1, 400)
        "b4": params["b4"].astype(f32),         # (1, 1)
    }


def critic_forward(state, action, prep, *, batch_tile=1024):
    """Pallas forward pass of the Critic module.

    state:  (B, state_dim) float32
    action: (B, action_dim) float32
    prep:   output of prepare_critic_params()
    returns (B, 1) float32
    """
    B = state.shape[0]
    # Single streamed input: concat once in the wrapper (one cheap XLA op) so fc1 is a
    # single MXU dot with no in-kernel lane concatenate.
    x = jnp.concatenate([state, action], axis=1).astype(jnp.float32)
    K = x.shape[1]

    # Batch tile: big enough to amortize the ~0.35us/step pipeline overhead, capped so
    # that n_tiles >= 2 whenever B permits (lets the v7x dual TensorCores both run via
    # the "parallel" batch axis), rounded to 16 sublanes for bf16 packing.
    TB = min(batch_tile, _round_up(B, 8))
    if B > 8:
        TB = min(TB, max(8, _round_up(-(-B // 2), 8)))
    if TB >= 16:
        TB = _round_up(TB, 16)
    TB = max(8, _round_up(TB, 8))

    n_tiles = pl.cdiv(B, TB)
    B_pad = n_tiles * TB
    if B_pad != B:
        # Padded rows produce bias-driven garbage that is sliced off below.
        x = jnp.pad(x, ((0, B_pad - B), (0, 0)))

    def resident(arr):
        # Full-array block, constant index_map -> fetched once and kept in VMEM across
        # all batch tiles; single-buffered since it is never re-fetched.
        return pl.BlockSpec(arr.shape, lambda i: (0,) * arr.ndim,
                            pipeline_mode=pl.Buffered(1))

    in_specs = [
        pl.BlockSpec((TB, K), lambda i: (i, 0)),   # streamed [state|action] tile
        resident(prep["w1"]), resident(prep["b1"]),
        resident(prep["w2"]), resident(prep["b2"]),
        resident(prep["w3"]), resident(prep["b3"]),
        resident(prep["w4_row"]), resident(prep["b4"]),
    ]
    out_spec = pl.BlockSpec((TB, 1), lambda i: (i, 0))

    out = pl.pallas_call(
        _critic_kernel,
        out_shape=jax.ShapeDtypeStruct((B_pad, 1), jnp.float32),
        grid=(n_tiles,),
        in_specs=in_specs,
        out_specs=out_spec,
        compiler_params=pltpu.CompilerParams(
            dimension_semantics=("parallel",),
            vmem_limit_bytes=32 * 1024 * 1024,   # ~8-10 MB peak at TB=1024; fits v7x too
        ),
    )(x, prep["w1"], prep["b1"], prep["w2"], prep["b2"],
      prep["w3"], prep["b3"], prep["w4_row"], prep["b4"])

    return out[:B]


# --------------------------------------------------------------------------- helpers
def init_params(key, state_dim, action_dim):
    """Deterministic PyTorch-style init: U(-1/sqrt(fan_in), 1/sqrt(fan_in))."""
    dims = [(state_dim + action_dim, 800), (800, 600), (600, 400), (400, 1)]
    params = {}
    for i, (fan_in, fan_out) in enumerate(dims, start=1):
        key, kw, kb = jax.random.split(key, 3)
        bound = 1.0 / (fan_in ** 0.5)
        params[f"w{i}"] = jax.random.uniform(
            kw, (fan_in, fan_out), jnp.float32, minval=-bound, maxval=bound)
        params[f"b{i}"] = jax.random.uniform(
            kb, (1, fan_out), jnp.float32, minval=-bound, maxval=bound)
    return params


def critic_reference(state, action, params):
    """Pure-JAX reference mirroring the kernel's dtype path (bf16 weights/activations,
    f32 accumulation) for a tight numerical comparison."""
    bf16 = jnp.bfloat16
    x = jnp.concatenate([state, action], axis=1).astype(bf16)
    h = jnp.dot(x, params["w1"].astype(bf16),
                preferred_element_type=jnp.float32) + params["b1"]
    h = jnp.maximum(h, 0.0).astype(bf16)
    h = jnp.dot(h, params["w2"].astype(bf16),
                preferred_element_type=jnp.float32) + params["b2"]
    h = jnp.maximum(h, 0.0).astype(bf16)
    h = jnp.dot(h, params["w3"].astype(bf16),
                preferred_element_type=jnp.float32) + params["b3"]
    h = jnp.maximum(h, 0.0)
    return jnp.dot(h, params["w4"]) + params["b4"]


# --------------------------------------------------------------------------- test
if __name__ == "__main__":
    key = jax.random.PRNGKey(0)
    batch, state_dim, action_dim = 2, 16, 8

    key, ks, ka, kp = jax.random.split(key, 4)
    state = jax.random.normal(ks, (batch, state_dim), jnp.float32)
    action = jax.random.normal(ka, (batch, action_dim), jnp.float32)
    params = init_params(kp, state_dim, action_dim)

    prep = prepare_critic_params(params)           # one-time weight formatting
    out = critic_forward(state, action, prep)
    out = jax.block_until_ready(out)

    ref = critic_reference(state, action, params)
    assert out.shape == (batch, 1), out.shape
    assert jnp.allclose(out, ref, atol=1e-2, rtol=1e-2), (out, ref)
    print("KERNEL_OK")
</pallas_src>

<mosaic_0001>
module attributes {stable_mosaic.version = 11 : i64} {
  func.func @_critic_kernel(%arg0: i32, %arg1: memref<8x24xf32, #tpu.memory_space<vmem>>, %arg2: memref<24x800xbf16, #tpu.memory_space<vmem>>, %arg3: memref<1x800xf32, #tpu.memory_space<vmem>>, %arg4: memref<800x600xbf16, #tpu.memory_space<vmem>>, %arg5: memref<1x600xf32, #tpu.memory_space<vmem>>, %arg6: memref<600x400xbf16, #tpu.memory_space<vmem>>, %arg7: memref<1x400xf32, #tpu.memory_space<vmem>>, %arg8: memref<1x400xf32, #tpu.memory_space<vmem>>, %arg9: memref<1x1xf32, #tpu.memory_space<vmem>>, %arg10: memref<8x1xf32, #tpu.memory_space<vmem>>) attributes {dimension_semantics = [#tpu.dimension_semantics<parallel>], iteration_bounds = array<i64: 1>, scalar_prefetch = 0 : i64, scratch_operands = 0 : i64, tpu.core_type = #tpu.core_type<tc>, window_params = [{transform_indices = @transform_0, window_bounds = array<i64: 8, 24>}, {pipeline_mode = #tpu.pipeline_mode<synchronous>, transform_indices = @transform_1, window_bounds = array<i64: 24, 800>}, {pipeline_mode = #tpu.pipeline_mode<synchronous>, transform_indices = @transform_2, window_bounds = array<i64: 1, 800>}, {pipeline_mode = #tpu.pipeline_mode<synchronous>, transform_indices = @transform_3, window_bounds = array<i64: 800, 600>}, {pipeline_mode = #tpu.pipeline_mode<synchronous>, transform_indices = @transform_4, window_bounds = array<i64: 1, 600>}, {pipeline_mode = #tpu.pipeline_mode<synchronous>, transform_indices = @transform_5, window_bounds = array<i64: 600, 400>}, {pipeline_mode = #tpu.pipeline_mode<synchronous>, transform_indices = @transform_6, window_bounds = array<i64: 1, 400>}, {pipeline_mode = #tpu.pipeline_mode<synchronous>, transform_indices = @transform_7, window_bounds = array<i64: 1, 400>}, {pipeline_mode = #tpu.pipeline_mode<synchronous>, transform_indices = @transform_8, window_bounds = array<i64: 1, 1>}, {transform_indices = @transform_9, window_bounds = array<i64: 8, 1>}]} {
    %c0 = arith.constant 0 : index
    %c0_0 = arith.constant 0 : index
    %0 = vector.load %arg1[%c0, %c0_0] : memref<8x24xf32, #tpu.memory_space<vmem>>, vector<8x24xf32>
    %1 = arith.truncf %0 : vector<8x24xf32> to vector<8x24xbf16>
    %c0_1 = arith.constant 0 : index
    %c0_2 = arith.constant 0 : index
    %2 = vector.load %arg2[%c0_1, %c0_2] : memref<24x800xbf16, #tpu.memory_space<vmem>>, vector<24x800xbf16>
    %cst = arith.constant dense<0.000000e+00> : vector<8x800xf32>
    %3 = tpu.matmul %1, %2, %cst {dimension_numbers = #tpu.dot_dimension_numbers<[1], [0], [0], [1], [0, 0, 1, 1], [], []>} : vector<8x24xbf16>, vector<24x800xbf16>, vector<8x800xf32> -> vector<8x800xf32>
    %c0_3 = arith.constant 0 : index
    %c0_4 = arith.constant 0 : index
    %4 = vector.load %arg3[%c0_3, %c0_4] : memref<1x800xf32, #tpu.memory_space<vmem>>, vector<1x800xf32>
    %5 = vector.broadcast %4 : vector<1x800xf32> to vector<8x800xf32>
    %6 = arith.addf %3, %5 : vector<8x800xf32>
    %cst_5 = arith.constant 0.000000e+00 : f32
    %7 = vector.broadcast %cst_5 : f32 to vector<8x800xf32>
    %8 = arith.maximumf %6, %7 : vector<8x800xf32>
    %9 = arith.truncf %8 : vector<8x800xf32> to vector<8x800xbf16>
    %c0_6 = arith.constant 0 : index
    %c0_7 = arith.constant 0 : index
    %10 = vector.load %arg4[%c0_6, %c0_7] : memref<800x600xbf16, #tpu.memory_space<vmem>>, vector<800x600xbf16>
    %cst_8 = arith.constant dense<0.000000e+00> : vector<8x600xf32>
    %11 = tpu.matmul %9, %10, %cst_8 {dimension_numbers = #tpu.dot_dimension_numbers<[1], [0], [0], [1], [0, 0, 1, 1], [], []>} : vector<8x800xbf16>, vector<800x600xbf16>, vector<8x600xf32> -> vector<8x600xf32>
    %c0_9 = arith.constant 0 : index
    %c0_10 = arith.constant 0 : index
    %12 = vector.load %arg5[%c0_9, %c0_10] : memref<1x600xf32, #tpu.memory_space<vmem>>, vector<1x600xf32>
    %13 = vector.broadcast %12 : vector<1x600xf32> to vector<8x600xf32>
    %14 = arith.addf %11, %13 : vector<8x600xf32>
    %cst_11 = arith.constant 0.000000e+00 : f32
    %15 = vector.broadcast %cst_11 : f32 to vector<8x600xf32>
    %16 = arith.maximumf %14, %15 : vector<8x600xf32>
    %17 = arith.truncf %16 : vector<8x600xf32> to vector<8x600xbf16>
    %c0_12 = arith.constant 0 : index
    %c0_13 = arith.constant 0 : index
    %18 = vector.load %arg6[%c0_12, %c0_13] : memref<600x400xbf16, #tpu.memory_space<vmem>>, vector<600x400xbf16>
    %cst_14 = arith.constant dense<0.000000e+00> : vector<8x400xf32>
    %19 = tpu.matmul %17, %18, %cst_14 {dimension_numbers = #tpu.dot_dimension_numbers<[1], [0], [0], [1], [0, 0, 1, 1], [], []>} : vector<8x600xbf16>, vector<600x400xbf16>, vector<8x400xf32> -> vector<8x400xf32>
    %c0_15 = arith.constant 0 : index
    %c0_16 = arith.constant 0 : index
    %20 = vector.load %arg7[%c0_15, %c0_16] : memref<1x400xf32, #tpu.memory_space<vmem>>, vector<1x400xf32>
    %21 = vector.broadcast %20 : vector<1x400xf32> to vector<8x400xf32>
    %22 = arith.addf %19, %21 : vector<8x400xf32>
    %cst_17 = arith.constant 0.000000e+00 : f32
    %23 = vector.broadcast %cst_17 : f32 to vector<8x400xf32>
    %24 = arith.maximumf %22, %23 : vector<8x400xf32>
    %c0_18 = arith.constant 0 : index
    %c0_19 = arith.constant 0 : index
    %25 = vector.load %arg8[%c0_18, %c0_19] : memref<1x400xf32, #tpu.memory_space<vmem>>, vector<1x400xf32>
    %26 = vector.broadcast %25 : vector<1x400xf32> to vector<8x400xf32>
    %27 = arith.mulf %24, %26 : vector<8x400xf32>
    %cst_20 = arith.constant dense<0.000000e+00> : vector<8xf32>
    %28 = vector.multi_reduction <add>, %27, %cst_20 [1] : vector<8x400xf32> to vector<8xf32>
    %29 = vector.shape_cast %28 : vector<8xf32> to vector<8x1xf32>
    %c0_21 = arith.constant 0 : index
    %c0_22 = arith.constant 0 : index
    %30 = vector.load %arg9[%c0_21, %c0_22] : memref<1x1xf32, #tpu.memory_space<vmem>>, vector<1x1xf32>
    %31 = vector.broadcast %30 : vector<1x1xf32> to vector<8x1xf32>
    %32 = arith.addf %29, %31 : vector<8x1xf32>
    %c0_23 = arith.constant 0 : index
    %c0_24 = arith.constant 0 : index
    %33 = vector.load %arg10[%c0_23, %c0_24] : memref<8x1xf32, #tpu.memory_space<vmem>>, vector<8x1xf32>
    tpu.vector_store %arg10[%c0_23, %c0_24], %32 {strides = array<i32>} : memref<8x1xf32, #tpu.memory_space<vmem>>, vector<8x1xf32>,
    return
  }
  func.func @transform_0(%arg0: i32) -> (i32, i32) {
    %c0_i32 = arith.constant 0 : i32
    %c0_i32_0 = arith.constant 0 : i32
    return %arg0, %c0_i32 : i32, i32
  }
  func.func @transform_1(%arg0: i32) -> (i32, i32) {
    %c0_i32 = arith.constant 0 : i32
    %c0_i32_0 = arith.constant 0 : i32
    %c0_i32_1 = arith.constant 0 : i32
    return %c0_i32, %c0_i32_0 : i32, i32
  }
  func.func @transform_2(%arg0: i32) -> (i32, i32) {
    %c0_i32 = arith.constant 0 : i32
    %c0_i32_0 = arith.constant 0 : i32
    %c0_i32_1 = arith.constant 0 : i32
    return %c0_i32, %c0_i32_0 : i32, i32
  }
  func.func @transform_3(%arg0: i32) -> (i32, i32) {
    %c0_i32 = arith.constant 0 : i32
    %c0_i32_0 = arith.constant 0 : i32
    %c0_i32_1 = arith.constant 0 : i32
    return %c0_i32, %c0_i32_0 : i32, i32
  }
  func.func @transform_4(%arg0: i32) -> (i32, i32) {
    %c0_i32 = arith.constant 0 : i32
    %c0_i32_0 = arith.constant 0 : i32
    %c0_i32_1 = arith.constant 0 : i32
    return %c0_i32, %c0_i32_0 : i32, i32
  }
  func.func @transform_5(%arg0: i32) -> (i32, i32) {
    %c0_i32 = arith.constant 0 : i32
    %c0_i32_0 = arith.constant 0 : i32
    %c0_i32_1 = arith.constant 0 : i32
    return %c0_i32, %c0_i32_0 : i32, i32
  }
  func.func @transform_6(%arg0: i32) -> (i32, i32) {
    %c0_i32 = arith.constant 0 : i32
    %c0_i32_0 = arith.constant 0 : i32
    %c0_i32_1 = arith.constant 0 : i32
    return %c0_i32, %c0_i32_0 : i32, i32
  }
  func.func @transform_7(%arg0: i32) -> (i32, i32) {
    %c0_i32 = arith.constant 0 : i32
    %c0_i32_0 = arith.constant 0 : i32
    %c0_i32_1 = arith.constant 0 : i32
    return %c0_i32, %c0_i32_0 : i32, i32
  }
  func.func @transform_8(%arg0: i32) -> (i32, i32) {
    %c0_i32 = arith.constant 0 : i32
    %c0_i32_0 = arith.constant 0 : i32
    %c0_i32_1 = arith.constant 0 : i32
    return %c0_i32, %c0_i32_0 : i32, i32
  }
  func.func @transform_9(%arg0: i32) -> (i32, i32) {
    %c0_i32 = arith.constant 0 : i32
    %c0_i32_0 = arith.constant 0 : i32
    return %arg0, %c0_i32 : i32, i32
  }
}

</mosaic_0001>

<bundles_post_ra>
// kernel: tpu_custom_call.1
= control target key start
LH: loop header
LB: loop body
LE: loop exit
PB: predicated region body
PF: predicated region fallthrough
CT: control target
= control target key end

     0   :  { %vm123_vm0 = vcmask 1043456   ;;  %vm119_vm1 = vcmask 195584   ;;  %vm1862_vm2 = vcmask 261120   ;;  %vm3241_vm3 = vcmask 719872   ;;  %s8339_s1 = inlined_call_operand.vmem [shape: bf16[24,800], index: 1, kind: input, shape index: {}]   ;;  %s8340_s0 = inlined_call_operand.vmem [shape: f32[8,24], index: 0, kind: input, shape index: {}]   ;;  %s8341_s3 = inlined_call_operand.vmem [shape: bf16[800,600], index: 3, kind: input, shape index: {}]   ;;  %s8342_s2 = inlined_call_operand.vmem [shape: f32[1,800], index: 2, kind: input, shape index: {}]   ;;  %s8343_s4 = inlined_call_operand.vmem [shape: f32[1,600], index: 4, kind: input, shape index: {}]   ;;  %s8344_s5 = inlined_call_operand.vmem [shape: bf16[600,400], index: 5, kind: input, shape index: {}]   ;;  %s8345_s6 = inlined_call_operand.vmem [shape: f32[1,400], index: 6, kind: input, shape index: {}]   ;;  %s8346_s7 = inlined_call_operand.vmem [shape: f32[1,400], index: 7, kind: input, shape index: {}]   ;;  %s8347_s8 = inlined_call_operand.<no memory space> [shape: f32[1,1], index: 8, kind: input, shape index: {}]   ;;  %s8348_s9 = inlined_call_operand.vmem [shape: f32[8,1], index: 9, kind: output, shape index: {}]  }
   0x1   :  { %v45_v0 = vld [vmem:[%s8339_s1 + $0x38] sm:$0xff]  ;;  %v46_v1 = vld [vmem:[%s8339_s1 + $0x40] sm:$0xff]  ;;  %v3563_v14 = vld [vmem:[%s8339_s1 + $0x8] sm:$0xf]  ;;  %vm3537_vm4 = vcmask 130048   ;;  %vm3547_vm5 = vcmask 7168  }
   0x2   :  { %v91_v2 = vunpack.c.l.b16 %v45_v0  ;;  %v92_v3 = vunpack.c.h.b16 %v45_v0  ;;  %v93_v4 = vunpack.c.l.b16 %v46_v1  ;;  %v94_v5 = vunpack.c.h.b16 %v46_v1  ;;  %v3555_v6 = vld [vmem:[%s8339_s1] sm:$0xf]  ;;  %v5192_v7 = vld [vmem:[%s8339_s1 + $0x18] sm:$0xf0]  ;;  %v5189_v8 = vld [vmem:[%s8339_s1 + $0x4] sm:$0xf] }
   0x3   :  { %v3557_v9 = vld [vmem:[%s8339_s1 + $0x1c] sm:$0xf0]  ;;  %v5193_v15 = vld [vmem:[%s8339_s1 + $0x20] sm:$0xf0]  ;;  %v47_v16 = vld [vmem:[%s8339_s1 + $0x48] sm:$0xff]  ;;  %v3556_v17 = vor.u32 %v5192_v7, %v3555_v6 }
   0x4   :  { %v105_v10 = vpack.c.b16 %v91_v2, %v91_v2  ;;  %v106_v11 = vpack.c.b16 %v92_v3, %v92_v3  ;;  %v107_v12 = vpack.c.b16 %v93_v4, %v93_v4  ;;  %v108_v13 = vpack.c.b16 %v94_v5, %v94_v5  ;;  %v5190_v18 = vld [vmem:[%s8339_s1 + $0xc] sm:$0xf]  ;;  %v3565_v19 = vld [vmem:[%s8339_s1 + $0x24] sm:$0xf0]  ;;  %v48_v21 = vld [vmem:[%s8339_s1 + $0x50] sm:$0xf] }
   0x5   :  { %v95_v20 = vunpack.c.l.b16 %v47_v16  ;;  %v3560_v26 = vor.u32 %v5189_v8, %v3557_v9  ;;  %v35_v27 = vld [vmem:[%s8340_s0] sm:$0xff]  ;;  %v96_v29 = vunpack.c.h.b16 %v47_v16  ;;  %v97_v30 = vunpack.c.l.b16 %v48_v21  ;;  %v3571_v33 = vld [vmem:[%s8339_s1 + $0x10] sm:$0xf]  ;;  %v5194_v36 = vld [vmem:[%s8339_s1 + $0x28] sm:$0xf0] }
   0x6   :  { %v125_v22 = vsel %vm123_vm0, %v105_v10, 0  ;;  %v128_v23 = vsel %vm123_vm0, %v106_v11, 0  ;;  %v131_v24 = vsel %vm123_vm0, %v107_v12, 0  ;;  %v134_v25 = vsel %vm123_vm0, %v108_v13, 0  ;;  %v3730_v37 = vld [vmem:[%s8341_s3 + $0x118] sm:$0xf] }
   0x7   :  { %151 = vmatpush.bf16.msra.mxu0 %v125_v22  ;;  %164 = vmatpush.bf16.msra.mxu1 %v128_v23  ;;  %v109_v28 = vpack.c.b16 %v95_v20, %v95_v20  ;;  %v3564_v31 = vor.u32 %v5193_v15, %v3563_v14  ;;  %v3568_v32 = vor.u32 %v5190_v18, %v3565_v19  ;;  %v5233_v38 = vld [vmem:[%s8341_s3 + $0x128] sm:$0xf0]  ;;  %v5191_v41 = vld [vmem:[%s8339_s1 + $0x14] sm:$0xf]  ;;  %v3573_v42 = vld [vmem:[%s8339_s1 + $0x2c] sm:$0xf0] }
   0x8   :  { %177 = vmatpush.bf16.msra.mxu2 %v131_v24  ;;  %190 = vmatpush.bf16.msra.mxu3 %v134_v25  ;;  %v110_v34 = vpack.c.b16 %v96_v29, %v96_v29  ;;  %v111_v35 = vpack.c.b16 %v97_v30, %v97_v30  ;;  %v5701_v39 = vpack.c.bf16 %v35_v27, %v35_v27  ;;  %v3890_v44 = vld [vmem:[%s8341_s3 + $0x258] sm:$0xf]  ;;  %v5273_v45 = vld [vmem:[%s8341_s3 + $0x268] sm:$0xf0]  ;;  %v5195_v47 = vld [vmem:[%s8339_s1 + $0x30] sm:$0xf0] }
   0x9   :  { %v137_v40 = vsel %vm123_vm0, %v109_v28, 0  ;;  %v3579_v46 = vld [vmem:[%s8339_s1 + $0x18] sm:$0xf]  ;;  %v3731_v48 = vor.u32 %v5233_v38, %v3730_v37  ;;  %v3572_v50 = vor.u32 %v5194_v36, %v3571_v33  ;;  %v3576_v51 = vor.u32 %v5191_v41, %v3573_v42  ;;  %v3710_v52 = vld [vmem:[%s8341_s3 + $0xf0] sm:$0xf] }
   0xa   :  { %v140_v43 = vsel %vm123_vm0, %v110_v34, 0  ;;  %v143_v49 = vsel %vm123_vm0, %v111_v35, 0  ;;  %v5228_v53 = vld [vmem:[%s8341_s3 + $0x100] sm:$0xf0]  ;;  %v3891_v54 = vor.u32 %v5273_v45, %v3890_v44  ;;  %v4210_v55 = vld [vmem:[%s8341_s3 + $0x4d8] sm:$0xf]  ;;  %v3580_v59 = vor.u32 %v5195_v47, %v3579_v46 }
   0xb   :  { %152 = vmatpush.bf16.msra.mxu0 %v3556_v17  ;;  %165 = vmatpush.bf16.msra.mxu1 %v3560_v26  ;;  %v5353_v56 = vld [vmem:[%s8341_s3 + $0x4e8] sm:$0xf0]  ;;  %v3870_v57 = vld [vmem:[%s8341_s3 + $0x230] sm:$0xf]  ;;  %v5268_v58 = vld [vmem:[%s8341_s3 + $0x240] sm:$0xf0]  ;;  %v3711_v60 = vor.u32 %v5228_v53, %v3710_v52 }
   0xc   :  { %178 = vmatpush.bf16.msra.mxu2 %v3564_v31  ;;  %191 = vmatpush.bf16.msra.mxu3 %v3568_v32  ;;  %v4211_v61 = vor.u32 %v5353_v56, %v4210_v55  ;;  %v3690_v62 = vld [vmem:[%s8341_s3 + $0xc8] sm:$0xf]  ;;  %v5223_v63 = vld [vmem:[%s8341_s3 + $0xd8] sm:$0xf0]  ;;  %v3871_v0 = vor.u32 %v5268_v58, %v3870_v57  ;;  %v4190_v1 = vld [vmem:[%s8341_s3 + $0x4b0] sm:$0xf] }
   0xd   :  { %v5348_v2 = vld [vmem:[%s8341_s3 + $0x4c0] sm:$0xf0]  ;;  %v3850_v3 = vld [vmem:[%s8341_s3 + $0x208] sm:$0xf]  ;;  %v5263_v4 = vld [vmem:[%s8341_s3 + $0x218] sm:$0xf0]  ;;  %v3691_v5 = vor.u32 %v5223_v63, %v3690_v62 }
   0xe   :  { %3581 = vmatmul.msk.bf16.vlgmr.msra.gmra.mxu0 %vm119_vm1, %v5701_v39  ;;  %3582 = vmatmul.msk.bf16.vlgmr.msra.gmra.mxu1 %vm119_vm1, %v5701_v39  ;;  %v4191_v6 = vor.u32 %v5348_v2, %v4190_v1  ;;  %v3670_v7 = vld [vmem:[%s8341_s3 + $0xa0] sm:$0xf]  ;;  %v5218_v8 = vld [vmem:[%s8341_s3 + $0xb0] sm:$0xf0]  ;;  %v3851_v9 = vor.u32 %v5263_v4, %v3850_v3  ;;  %v4170_v10 = vld [vmem:[%s8341_s3 + $0x488] sm:$0xf] }
   0xf   :  { %203 = vmatpush.bf16.msrb.mxu0 %v137_v40  ;;  %216 = vmatpush.bf16.msrb.mxu1 %v140_v43  ;;  %v5343_v11 = vld [vmem:[%s8341_s3 + $0x498] sm:$0xf0]  ;;  %v3671_v12 = vor.u32 %v5218_v8, %v3670_v7  ;;  %v3830_v13 = vld [vmem:[%s8341_s3 + $0x1e0] sm:$0xf]  ;;  %v5258_v14 = vld [vmem:[%s8341_s3 + $0x1f0] sm:$0xf0] }
  0x10   :  { %3583 = vmatmul.msk.bf16.vlgmr.msra.gmra.mxu2 %vm119_vm1, %v5701_v39  ;;  %3584 = vmatmul.msk.bf16.vlgmr.msra.gmra.mxu3 %vm119_vm1, %v5701_v39  ;;  %v4050_v15 = vld [vmem:[%s8341_s3 + $0x398] sm:$0xf]  ;;  %v4171_v16 = vor.u32 %v5343_v11, %v4170_v10  ;;  %v5213_v18 = vld [vmem:[%s8341_s3 + $0x88] sm:$0xf0]  ;;  %v4150_v20 = vld [vmem:[%s8341_s3 + $0x460] sm:$0xf]  ;;  %v3831_v23 = vor.u32 %v5258_v14, %v3830_v13 }
  0x11   :  { %229 = vmatpush.bf16.msrb.mxu2 %v143_v49  ;;  %1866 = vmatpush.bf16.msrb.mxu3 %v3731_v48  ;;  %v3650_v17 = vld [vmem:[%s8341_s3 + $0x78] sm:$0xf]  ;;  %v5313_v19 = vld [vmem:[%s8341_s3 + $0x3a8] sm:$0xf0]  ;;  %v5338_v21 = vld [vmem:[%s8341_s3 + $0x470] sm:$0xf0] }
  0x12   :  { %v4051_v22 = vor.u32 %v5313_v19, %v4050_v15  ;;  %v4030_v24 = vld [vmem:[%s8341_s3 + $0x370] sm:$0xf]  ;;  %v5308_v25 = vld [vmem:[%s8341_s3 + $0x380] sm:$0xf0]  ;;  %v3651_v26 = vor.u32 %v5213_v18, %v3650_v17  ;;  %v3810_v27 = vld [vmem:[%s8341_s3 + $0x1b8] sm:$0xf]  ;;  %v4151_v30 = vor.u32 %v5338_v21, %v4150_v20 }
  0x13   :  { %204 = vmatpush.bf16.msrb.mxu0 %v3572_v50  ;;  %217 = vmatpush.bf16.msrb.mxu1 %v3576_v51  ;;  %v5253_v28 = vld [vmem:[%s8341_s3 + $0x1c8] sm:$0xf0]  ;;  %v4031_v29 = vor.u32 %v5308_v25, %v4030_v24  ;;  %v3630_v31 = vld [vmem:[%s8341_s3 + $0x50] sm:$0xf]  ;;  %v5208_v32 = vld [vmem:[%s8341_s3 + $0x60] sm:$0xf0] }
  0x14   :  { %v4130_v33 = vld [vmem:[%s8341_s3 + $0x438] sm:$0xf]  ;;  %v5333_v34 = vld [vmem:[%s8341_s3 + $0x448] sm:$0xf0]  ;;  %v4010_v35 = vld [vmem:[%s8341_s3 + $0x348] sm:$0xf]  ;;  %v3811_v36 = vor.u32 %v5253_v28, %v3810_v27  ;;  %v3631_v38 = vor.u32 %v5208_v32, %v3630_v31 }
  0x15   :  { %230 = vmatpush.bf16.msrb.mxu2 %v3580_v59  ;;  %1867 = vmatpush.bf16.msrb.mxu3 %v3711_v60  ;;  %v5303_v37 = vld [vmem:[%s8341_s3 + $0x358] sm:$0xf0]  ;;  %v3790_v40 = vld [vmem:[%s8341_s3 + $0x190] sm:$0xf]  ;;  %v5248_v41 = vld [vmem:[%s8341_s3 + $0x1a0] sm:$0xf0]  ;;  %v4131_v43 = vor.u32 %v5333_v34, %v4130_v33 }
  0x16   :  { %v4011_v42 = vor.u32 %v5303_v37, %v4010_v35  ;;  %v5203_v44 = vld [vmem:[%s8341_s3 + $0x38] sm:$0xf0]  ;;  %v3990_v45 = vld [vmem:[%s8341_s3 + $0x320] sm:$0xf]  ;;  %v5298_v46 = vld [vmem:[%s8341_s3 + $0x330] sm:$0xf0]  ;;  %v3791_v49 = vor.u32 %v5248_v41, %v3790_v40 }
  0x17   :  { %1879 = vmatpush.bf16.msra.mxu0 %v3891_v54  ;;  %1892 = vmatpush.bf16.msra.mxu1 %v4051_v22  ;;  %v4110_v47 = vld [vmem:[%s8341_s3 + $0x410] sm:$0xf]  ;;  %v5328_v48 = vld [vmem:[%s8341_s3 + $0x420] sm:$0xf0]  ;;  %v3770_v50 = vld [vmem:[%s8341_s3 + $0x168] sm:$0xf]  ;;  %v3991_v55 = vor.u32 %v5298_v46, %v3990_v45 }
  0x18   :  { %v5243_v52 = vld [vmem:[%s8341_s3 + $0x178] sm:$0xf0]  ;;  %v3590_v53 = vld [vmem:[%s8341_s3] sm:$0xf]  ;;  %v5198_v54 = vld [vmem:[%s8341_s3 + $0x10] sm:$0xf0]  ;;  %v4111_v56 = vor.u32 %v5328_v48, %v4110_v47 }
  0x19   :  { %1905 = vmatpush.bf16.msra.mxu2 %v4211_v61  ;;  %1868 = vmatpush.bf16.msrb.mxu3 %v3691_v5  ;;  %v4370_v57 = vld [vmem:[%s8341_s3 + $0x618] sm:$0xf]  ;;  %v5293_v59 = vld [vmem:[%s8341_s3 + $0x308] sm:$0xf0]  ;;  %v4090_v61 = vld [vmem:[%s8341_s3 + $0x3e8] sm:$0xf]  ;;  %v3771_v63 = vor.u32 %v5243_v52, %v3770_v50  ;;  %v3591_v1 = vor.u32 %v5198_v54, %v3590_v53 }
  0x1a   :  { %v3970_v58 = vld [vmem:[%s8341_s3 + $0x2f8] sm:$0xf]  ;;  %v5393_v60 = vld [vmem:[%s8341_s3 + $0x628] sm:$0xf0]  ;;  %v5323_v62 = vld [vmem:[%s8341_s3 + $0x3f8] sm:$0xf0] }
  0x1b   :  { %1880 = vmatpush.bf16.msra.mxu0 %v3871_v0  ;;  %1893 = vmatpush.bf16.msra.mxu1 %v4031_v29  ;;  %v3750_v0 = vld [vmem:[%s8341_s3 + $0x140] sm:$0xf]  ;;  %v5238_v2 = vld [vmem:[%s8341_s3 + $0x150] sm:$0xf0]  ;;  %v4530_v3 = vld [vmem:[%s8341_s3 + $0x758] sm:$0xf]  ;;  %v3971_v5 = vor.u32 %v5293_v59, %v3970_v58  ;;  %v4091_v7 = vor.u32 %v5323_v62, %v4090_v61 }
  0x1c   :  { %v5433_v4 = vld [vmem:[%s8341_s3 + $0x768] sm:$0xf0]  ;;  %v4350_v8 = vld [vmem:[%s8341_s3 + $0x5f0] sm:$0xf]  ;;  %v5288_v10 = vld [vmem:[%s8341_s3 + $0x2e0] sm:$0xf0]  ;;  %v3751_v14 = vor.u32 %v5238_v2, %v3750_v0 }
  0x1d   :  { %1906 = vmatpush.bf16.msra.mxu2 %v4191_v6  ;;  %1869 = vmatpush.bf16.msrb.mxu3 %v3671_v12  ;;  %v4371_v6 = vor.u32 %v5393_v60, %v4370_v57  ;;  %v5388_v11 = vld [vmem:[%s8341_s3 + $0x600] sm:$0xf0]  ;;  %v4070_v12 = vld [vmem:[%s8341_s3 + $0x3c0] sm:$0xf]  ;;  %v5318_v13 = vld [vmem:[%s8341_s3 + $0x3d0] sm:$0xf0]  ;;  %v4531_v17 = vor.u32 %v5433_v4, %v4530_v3 }
  0x1e   :  { %3585 = vmatmul.msk.bf16.vlgmr.msrb.gmra.mxu0 %vm119_vm1, %v5701_v39  ;;  %3586 = vmatmul.msk.bf16.vlgmr.msrb.gmra.mxu1 %vm119_vm1, %v5701_v39  ;;  %v5231_v15 = vld [vmem:[%s8341_s3 + $0x11c] sm:$0xf]  ;;  %v4351_v19 = vor.u32 %v5388_v11, %v4350_v8  ;;  %v4510_v20 = vld [vmem:[%s8341_s3 + $0x730] sm:$0xf]  ;;  %v5428_v21 = vld [vmem:[%s8341_s3 + $0x740] sm:$0xf0]  ;;  %v4071_v22 = vor.u32 %v5318_v13, %v4070_v12 }
  0x1f   :  { %1881 = vmatpush.bf16.msra.mxu0 %v3851_v9  ;;  %1894 = vmatpush.bf16.msra.mxu1 %v4011_v42  ;;  %v3950_v9 = vld [vmem:[%s8341_s3 + $0x2d0] sm:$0xf]  ;;  %v4330_v24 = vld [vmem:[%s8341_s3 + $0x5c8] sm:$0xf]  ;;  %v5383_v25 = vld [vmem:[%s8341_s3 + $0x5d8] sm:$0xf0]  ;;  %v4511_v28 = vor.u32 %v5428_v21, %v4510_v20 }
  0x20   :  { %3587 = vmatmul.msk.bf16.vlgmr.msrb.gmra.mxu2 %vm119_vm1, %v5701_v39  ;;  %v3610_v39 = vld [vmem:[%s8341_s3 + $0x28] sm:$0xf]  ;;  %v3951_v18 = vor.u32 %v5288_v10, %v3950_v9  ;;  %v4331_v29 = vor.u32 %v5383_v25, %v4330_v24  ;;  %v5423_v31 = vld [vmem:[%s8341_s3 + $0x718] sm:$0xf0]  ;;  %v4310_v33 = vld [vmem:[%s8341_s3 + $0x5a0] sm:$0xf] }
  0x21   :  { %1907 = vmatpush.bf16.msra.mxu2 %v4171_v16  ;;  %1870 = vmatpush.bf16.msrb.mxu3 %v3651_v26  ;;  %v3611_v51 = vor.u32 %v5203_v44, %v3610_v39  ;;  %v3732_v16 = vld [vmem:[%s8341_s3 + $0x12c] sm:$0xf0]  ;;  %v5226_v26 = vld [vmem:[%s8341_s3 + $0xf4] sm:$0xf]  ;;  %v3712_v27 = vld [vmem:[%s8341_s3 + $0x104] sm:$0xf0] }
  0x22   :  { %v3715_v32 = vor.u32 %v5226_v26, %v3712_v27  ;;  %v5378_v34 = vld [vmem:[%s8341_s3 + $0x5b0] sm:$0xf0]  ;;  %v5221_v35 = vld [vmem:[%s8341_s3 + $0xcc] sm:$0xf]  ;;  %v4470_v40 = vld [vmem:[%s8341_s3 + $0x6e0] sm:$0xf] }
  0x23   :  { %1882 = vmatpush.bf16.msra.mxu0 %v3831_v23  ;;  %1895 = vmatpush.bf16.msra.mxu1 %v3991_v55  ;;  %v3735_v23 = vor.u32 %v5231_v15, %v3732_v16  ;;  %v5418_v41 = vld [vmem:[%s8341_s3 + $0x6f0] sm:$0xf0]  ;;  %v4290_v42 = vld [vmem:[%s8341_s3 + $0x578] sm:$0xf]  ;;  %v5216_v44 = vld [vmem:[%s8341_s3 + $0xa4] sm:$0xf] }
  0x24   :  { %v3672_v45 = vld [vmem:[%s8341_s3 + $0xb4] sm:$0xf0]  ;;  %v4471_v46 = vor.u32 %v5418_v41, %v4470_v40  ;;  %v5368_v52 = vld [vmem:[%s8341_s3 + $0x560] sm:$0xf0]  ;;  %v4430_v55 = vld [vmem:[%s8341_s3 + $0x690] sm:$0xf] }
  0x25   :  { %1908 = vmatpush.bf16.msra.mxu2 %v4151_v30  ;;  %1871 = vmatpush.bf16.msrb.mxu3 %v3631_v38  ;;  %v4490_v30 = vld [vmem:[%s8341_s3 + $0x708] sm:$0xf]  ;;  %v4311_v38 = vor.u32 %v5378_v34, %v4310_v33  ;;  %v4450_v48 = vld [vmem:[%s8341_s3 + $0x6b8] sm:$0xf]  ;;  %v3675_v50 = vor.u32 %v5216_v44, %v3672_v45  ;;  %v5211_v58 = vld [vmem:[%s8341_s3 + $0x7c] sm:$0xf] }
  0x26   :  { %v4491_v37 = vor.u32 %v5423_v31, %v4490_v30  ;;  %v3652_v59 = vld [vmem:[%s8341_s3 + $0x8c] sm:$0xf0]  ;;  %v4250_v61 = vld [vmem:[%s8341_s3 + $0x528] sm:$0xf]  ;;  %v5363_v62 = vld [vmem:[%s8341_s3 + $0x538] sm:$0xf0] }
  0x27   :  { %1883 = vmatpush.bf16.msra.mxu0 %v3811_v36  ;;  %1896 = vmatpush.bf16.msra.mxu1 %v3971_v5  ;;  %v3692_v36 = vld [vmem:[%s8341_s3 + $0xdc] sm:$0xf0]  ;;  %v3655_v60 = vor.u32 %v5211_v58, %v3652_v59  ;;  %v4410_v0 = vld [vmem:[%s8341_s3 + $0x668] sm:$0xf]  ;;  %v5283_v4 = vld [vmem:[%s8341_s3 + $0x2b8] sm:$0xf0] }
  0x28   :  { %v3695_v39 = vor.u32 %v5221_v35, %v3692_v36  ;;  %v3930_v2 = vld [vmem:[%s8341_s3 + $0x2a8] sm:$0xf]  ;;  %v5206_v5 = vld [vmem:[%s8341_s3 + $0x54] sm:$0xf]  ;;  %v4230_v9 = vld [vmem:[%s8341_s3 + $0x500] sm:$0xf] }
  0x29   :  { %1909 = vmatpush.bf16.msra.mxu2 %v4131_v43  ;;  %1872 = vmatpush.bf16.msrb.mxu3 %v3611_v51  ;;  %v5373_v43 = vld [vmem:[%s8341_s3 + $0x588] sm:$0xf0]  ;;  %v4270_v51 = vld [vmem:[%s8341_s3 + $0x550] sm:$0xf]  ;;  %v5358_v10 = vld [vmem:[%s8341_s3 + $0x510] sm:$0xf0] }
  0x2a   :  { %v4291_v47 = vor.u32 %v5373_v43, %v4290_v42  ;;  %v4271_v54 = vor.u32 %v5368_v52, %v4270_v51  ;;  %v4390_v11 = vld [vmem:[%s8341_s3 + $0x640] sm:$0xf]  ;;  %v4231_v12 = vor.u32 %v5358_v10, %v4230_v9  ;;  %v5398_v13 = vld [vmem:[%s8341_s3 + $0x650] sm:$0xf0]  ;;  %v5201_v20 = vld [vmem:[%s8341_s3 + $0x2c] sm:$0xf] }
  0x2b   :  { %1884 = vmatpush.bf16.msra.mxu0 %v3791_v49  ;;  %1897 = vmatpush.bf16.msra.mxu1 %v3951_v18  ;;  %v5413_v49 = vld [vmem:[%s8341_s3 + $0x6c8] sm:$0xf0]  ;;  %v4391_v15 = vor.u32 %v5398_v13, %v4390_v11  ;;  %v5278_v16 = vld [vmem:[%s8341_s3 + $0x290] sm:$0xf0]  ;;  %v4570_v18 = vld [vmem:[%s8341_s3 + $0x7a8] sm:$0xf] }
  0x2c   :  { %v4451_v53 = vor.u32 %v5413_v49, %v4450_v48  ;;  %v4550_v24 = vld [vmem:[%s8341_s3 + $0x780] sm:$0xf]  ;;  %v5438_v25 = vld [vmem:[%s8341_s3 + $0x790] sm:$0xf0]  ;;  %v5196_v26 = vld [vmem:[%s8341_s3 + $0x4] sm:$0xf] }
  0x2d   :  { %1910 = vmatpush.bf16.msra.mxu2 %v4111_v56  ;;  %1873 = vmatpush.bf16.msrb.mxu3 %v3591_v1  ;;  %v5408_v56 = vld [vmem:[%s8341_s3 + $0x6a0] sm:$0xf0]  ;;  %v5403_v1 = vld [vmem:[%s8341_s3 + $0x678] sm:$0xf0]  ;;  %v3592_v27 = vld [vmem:[%s8341_s3 + $0x14] sm:$0xf0] }
  0x2e   :  { %v4431_v57 = vor.u32 %v5408_v56, %v4430_v55  ;;  %v4411_v3 = vor.u32 %v5403_v1, %v4410_v0  ;;  %v6077_v30 = vld [vmem:[%s8342_s2] sm:$0x7f]  ;;  %v5311_v35 = vld [vmem:[%s8341_s3 + $0x39c] sm:$0xf]  ;;  %v4212_v41 = vld [vmem:[%s8341_s3 + $0x4ec] sm:$0xf0] }
  0x2f   :  { %1885 = vmatpush.bf16.msra.mxu0 %v3771_v63  ;;  %v4251_v63 = vor.u32 %v5363_v62, %v4250_v61  ;;  %v51_v31 = vperm.slane %v6077_v30, 0  ;;  %v5351_v40 = vld [vmem:[%s8341_s3 + $0x4dc] sm:$0xf]  ;;  %v53_v43 = vperm.slane %v6077_v30, 2  ;;  %v54_v44 = vperm.slane %v6077_v30, 3 }
  0x30   :  { %v4032_v48 = vld [vmem:[%s8341_s3 + $0x384] sm:$0xf0]  ;;  %v5346_v51 = vld [vmem:[%s8341_s3 + $0x4b4] sm:$0xf]  ;;  %v5271_v56 = vld [vmem:[%s8341_s3 + $0x25c] sm:$0xf] }
  0x31   :  { %1918 = vmatpush.bf16.msra.mxu3 %v4371_v6  ;;  %1911 = vmatpush.bf16.msra.mxu2 %v4091_v7  ;;  %v3632_v6 = vld [vmem:[%s8341_s3 + $0x64] sm:$0xf0]  ;;  %v3931_v7 = vor.u32 %v5283_v4, %v3930_v2  ;;  %v5391_v58 = vld [vmem:[%s8341_s3 + $0x61c] sm:$0xf]  ;;  %v4372_v0 = vld [vmem:[%s8341_s3 + $0x62c] sm:$0xf0] }
  0x32   :  { %v3635_v8 = vor.u32 %v5206_v5, %v3632_v6  ;;  %v4192_v52 = vld [vmem:[%s8341_s3 + $0x4c4] sm:$0xf0]  ;;  %v5301_v1 = vld [vmem:[%s8341_s3 + $0x34c] sm:$0xf]  ;;  %v4012_v2 = vld [vmem:[%s8341_s3 + $0x35c] sm:$0xf0] }
  0x33   :  { %1886 = vmatpush.bf16.msra.mxu0 %v3751_v14  ;;  %1898 = vmatpush.bf16.msra.mxu1 %v3931_v7  ;;  %v3910_v14 = vld [vmem:[%s8341_s3 + $0x280] sm:$0xf]  ;;  %v4015_v9 = vor.u32 %v5301_v1, %v4012_v2  ;;  %v55_v10 = vperm.slane %v6077_v30, 4  ;;  %v56_v11 = vperm.slane %v6077_v30, 5  ;;  %v3872_v13 = vld [vmem:[%s8341_s3 + $0x244] sm:$0xf0] }
  0x34   :  { %v4172_v4 = vld [vmem:[%s8341_s3 + $0x49c] sm:$0xf0]  ;;  %v3812_v1 = vld [vmem:[%s8341_s3 + $0x1cc] sm:$0xf0]  ;;  %v5371_v2 = vld [vmem:[%s8341_s3 + $0x57c] sm:$0xf] }
  0x35   :  { %1919 = vmatpush.bf16.msra.mxu3 %v4351_v19  ;;  %1912 = vmatpush.bf16.msra.mxu2 %v4071_v22  ;;  %v5443_v19 = vld [vmem:[%s8341_s3 + $0x7b8] sm:$0xf0]  ;;  %v3612_v22 = vld [vmem:[%s8341_s3 + $0x3c] sm:$0xf0] }
  0x36   :  { %v4571_v21 = vor.u32 %v5443_v19, %v4570_v18  ;;  %v4352_v18 = vld [vmem:[%s8341_s3 + $0x604] sm:$0xf0]  ;;  %v5296_v19 = vld [vmem:[%s8341_s3 + $0x324] sm:$0xf] }
  0x37   :  { %1931 = vmatpush.bf16.msrb.mxu0 %v4531_v17  ;;  %v3911_v17 = vor.u32 %v5278_v16, %v3910_v14 }
  0x39   :  { %1957 = vmatpush.bf16.msrb.mxu2 %v3735_v23  ;;  %1920 = vmatpush.bf16.msra.mxu3 %v4331_v29  ;;  %v3615_v23 = vor.u32 %v5201_v20, %v3612_v22  ;;  %v3595_v29 = vor.u32 %v5196_v26, %v3592_v27  ;;  %v3992_v20 = vld [vmem:[%s8341_s3 + $0x334] sm:$0xf0]  ;;  %v5261_v27 = vld [vmem:[%s8341_s3 + $0x20c] sm:$0xf] }
  0x3a   :  { %1899 = vmatpush.bf16.msra.mxu1 %v3911_v17  ;;  %v5386_v17 = vld [vmem:[%s8341_s3 + $0x5f4] sm:$0xf]  ;;  %v4152_v22 = vld [vmem:[%s8341_s3 + $0x474] sm:$0xf0] }
  0x3b   :  { %1932 = vmatpush.bf16.msrb.mxu0 %v4511_v28  ;;  %v4551_v28 = vor.u32 %v5438_v25, %v4550_v24  ;;  %v4355_v26 = vor.u32 %v5386_v17, %v4352_v18  ;;  %v5246_v17 = vld [vmem:[%s8341_s3 + $0x194] sm:$0xf] }
  0x3d   :  { %1958 = vmatpush.bf16.msrb.mxu2 %v3715_v32  ;;  %1921 = vmatpush.bf16.msra.mxu3 %v4311_v38  ;;  %v52_v32 = vperm.slane %v6077_v30, 1  ;;  %v4052_v38 = vld [vmem:[%s8341_s3 + $0x3ac] sm:$0xf0] }
  0x3e   :  { %1950 = vmatpush.bf16.msrb.mxu1 %v4571_v21  ;;  %v4055_v45 = vor.u32 %v5311_v35, %v4052_v38  ;;  %v5336_v21 = vld [vmem:[%s8341_s3 + $0x464] sm:$0xf]  ;;  %v4332_v35 = vld [vmem:[%s8341_s3 + $0x5dc] sm:$0xf0]  ;;  %v5291_v38 = vld [vmem:[%s8341_s3 + $0x2fc] sm:$0xf] }
  0x3f   :  { %1933 = vmatpush.bf16.msrb.mxu0 %v4491_v37 }
  0x41   :  { %1959 = vmatpush.bf16.msrb.mxu2 %v3695_v39  ;;  %1922 = vmatpush.bf16.msra.mxu3 %v4291_v47  ;;  %v5306_v47 = vld [vmem:[%s8341_s3 + $0x374] sm:$0xf] }
  0x42   :  { %1951 = vmatpush.bf16.msrb.mxu1 %v4551_v28  ;;  %v4035_v55 = vor.u32 %v5306_v47, %v4032_v48  ;;  %v3852_v28 = vld [vmem:[%s8341_s3 + $0x21c] sm:$0xf0]  ;;  %v5256_v47 = vld [vmem:[%s8341_s3 + $0x1e4] sm:$0xf]  ;;  %v3832_v48 = vld [vmem:[%s8341_s3 + $0x1f4] sm:$0xf0] }
  0x43   :  { %1934 = vmatpush.bf16.msrb.mxu0 %v4471_v46  ;;  %v4215_v46 = vor.u32 %v5351_v40, %v4212_v41  ;;  %v3855_v40 = vor.u32 %v5261_v27, %v3852_v28  ;;  %v3972_v41 = vld [vmem:[%s8341_s3 + $0x30c] sm:$0xf0]  ;;  %v4072_v27 = vld [vmem:[%s8341_s3 + $0x3d4] sm:$0xf0]  ;;  %v5441_v28 = vld [vmem:[%s8341_s3 + $0x7ac] sm:$0xf] }
  0x45   :  { %1960 = vmatpush.bf16.msrb.mxu2 %v3675_v50  ;;  %1923 = vmatpush.bf16.msra.mxu3 %v4271_v54 }
  0x47   :  { %1935 = vmatpush.bf16.msrb.mxu0 %v4451_v53 }
  0x49   :  { %1961 = vmatpush.bf16.msrb.mxu2 %v3655_v60  ;;  %1924 = vmatpush.bf16.msra.mxu3 %v4251_v63  ;;  %v4195_v63 = vor.u32 %v5346_v51, %v4192_v52  ;;  %v5376_v51 = vld [vmem:[%s8341_s3 + $0x5a4] sm:$0xf]  ;;  %v4312_v52 = vld [vmem:[%s8341_s3 + $0x5b4] sm:$0xf0] }
  0x4b   :  { %1936 = vmatpush.bf16.msrb.mxu0 %v4431_v57  ;;  %v3892_v57 = vld [vmem:[%s8341_s3 + $0x26c] sm:$0xf0] }
  0x4c   :  { %v3895_v7 = vor.u32 %v5271_v56, %v3892_v57  ;;  %v5286_v56 = vld [vmem:[%s8341_s3 + $0x2d4] sm:$0xf]  ;;  %v3952_v57 = vld [vmem:[%s8341_s3 + $0x2e4] sm:$0xf0] }
  0x4d   :  { %1962 = vmatpush.bf16.msrb.mxu2 %v3635_v8  ;;  %1925 = vmatpush.bf16.msra.mxu3 %v4231_v12  ;;  %v4375_v8 = vor.u32 %v5391_v58, %v4372_v0  ;;  %v5266_v12 = vld [vmem:[%s8341_s3 + $0x234] sm:$0xf] }
  0x4e   :  { %v3875_v25 = vor.u32 %v5266_v12, %v3872_v13  ;;  %v5326_v58 = vld [vmem:[%s8341_s3 + $0x414] sm:$0xf]  ;;  %v4092_v12 = vld [vmem:[%s8341_s3 + $0x3fc] sm:$0xf0] }
  0x4f   :  { %1937 = vmatpush.bf16.msrb.mxu0 %v4411_v3  ;;  %v5341_v3 = vld [vmem:[%s8341_s3 + $0x48c] sm:$0xf] }
  0x50   :  { %v4175_v16 = vor.u32 %v5341_v3, %v4172_v4  ;;  %v4292_v3 = vld [vmem:[%s8341_s3 + $0x58c] sm:$0xf0] }
  0x51   :  { %1963 = vmatpush.bf16.msrb.mxu2 %v3615_v23 }
  0x53   :  { %1938 = vmatpush.bf16.msrb.mxu0 %v4391_v15 }
  0x55   :  { %1964 = vmatpush.bf16.msrb.mxu2 %v3595_v29 }
  0x8b   :  { %v154_v33 = vpop.f32.mrf.mxu0  ;;  %v167_v34 = vpop.f32.mrf.mxu1 }
  0x8c   :  { %v155_v36 = vadd.f32 %v154_v33, %v51_v31  ;;  %v168_v37 = vadd.f32 %v167_v34, %v52_v32  ;;  %v3995_v32 = vor.u32 %v5296_v19, %v3992_v20  ;;  %v4155_v33 = vor.u32 %v5336_v21, %v4152_v22  ;;  %v5381_v34 = vld [vmem:[%s8341_s3 + $0x5cc] sm:$0xf]  ;;  %v3792_v19 = vld [vmem:[%s8341_s3 + $0x1a4] sm:$0xf0]  ;;  %v5366_v20 = vld [vmem:[%s8341_s3 + $0x554] sm:$0xf] }
  0x8d   :  { %v4272_v21 = vld [vmem:[%s8341_s3 + $0x564] sm:$0xf0] }
  0x8e   :  { %v236_v39 = vmax.f32 %v155_v36, 0.0  ;;  %v237_v42 = vmax.f32 %v168_v37, 0.0 }
  0x90   :  { %v6101_v49 = vpack.c.bf16 %v236_v39, %v236_v39  ;;  %v6103_v50 = vpack.c.bf16 %v237_v42, %v237_v42  ;;  %v5331_v39 = vld [vmem:[%s8341_s3 + $0x43c] sm:$0xf]  ;;  %v4132_v42 = vld [vmem:[%s8341_s3 + $0x44c] sm:$0xf0] }
  0x92   :  { %1874 = vmatmul.bf16.vlgmr.msrb.gmra.mxu3 %v6101_v49  ;;  %1887 = vmatmul.bf16.vlgmr.msra.gmra.mxu0 %v6103_v50 }
  0x93   :  { %v180_v53 = vpop.f32.mrf.mxu2  ;;  %v193_v54 = vpop.f32.mrf.mxu3  ;;  %1983 = vmatpush.bf16.msrb.mxu3 %v4055_v45  ;;  %1996 = vmatpush.bf16.msra.mxu0 %v4215_v46  ;;  %v4335_v45 = vor.u32 %v5381_v34, %v4332_v35  ;;  %v57_v46 = vperm.slane %v6077_v30, 6  ;;  %v3738_v34 = vld [vmem:[%s8341_s3 + $0x120] sm:$0xf]  ;;  %v5234_v35 = vld [vmem:[%s8341_s3 + $0x130] sm:$0xf0] }
  0x94   :  { %v181_v59 = vadd.f32 %v180_v53, %v53_v43  ;;  %v194_v60 = vadd.f32 %v193_v54, %v54_v44  ;;  %v156_v61 = vpop.f32.mrf.mxu0  ;;  %v169_v62 = vpop.f32.mrf.mxu1  ;;  %v3975_v54 = vor.u32 %v5291_v38, %v3972_v41  ;;  %v5361_v38 = vld [vmem:[%s8341_s3 + $0x52c] sm:$0xf] }
  0x95   :  { %v3835_v61 = vor.u32 %v5256_v47, %v3832_v48  ;;  %v4315_v62 = vor.u32 %v5376_v51, %v4312_v52  ;;  %v5229_v51 = vld [vmem:[%s8341_s3 + $0x108] sm:$0xf0]  ;;  %v5236_v52 = vld [vmem:[%s8341_s3 + $0x144] sm:$0xf] }
  0x96   :  { %v238_v5 = vmax.f32 %v181_v59, 0.0  ;;  %v239_v6 = vmax.f32 %v194_v60, 0.0  ;;  %v4112_v59 = vld [vmem:[%s8341_s3 + $0x424] sm:$0xf0] }
  0x97   :  { %1984 = vmatpush.bf16.msrb.mxu3 %v4035_v55  ;;  %1997 = vmatpush.bf16.msra.mxu0 %v4195_v63  ;;  %v4135_v55 = vor.u32 %v5331_v39, %v4132_v42  ;;  %v5251_v63 = vld [vmem:[%s8341_s3 + $0x1bc] sm:$0xf] }
  0x98   :  { %v6145_v14 = vpack.c.bf16 %v238_v5, %v238_v5  ;;  %v6147_v15 = vpack.c.bf16 %v239_v6, %v239_v6  ;;  %v3955_v6 = vor.u32 %v5286_v56, %v3952_v57  ;;  %v3815_v13 = vor.u32 %v5251_v63, %v3812_v1  ;;  %v4232_v56 = vld [vmem:[%s8341_s3 + $0x514] sm:$0xf0]  ;;  %v4058_v57 = vld [vmem:[%s8341_s3 + $0x3a0] sm:$0xf] }
  0x99   :  { %v3898_v63 = vld [vmem:[%s8341_s3 + $0x260] sm:$0xf] }
  0x9a   :  { %1900 = vmatmul.bf16.vlgmr.msra.gmra.mxu1 %v6145_v14  ;;  %1913 = vmatmul.bf16.vlgmr.msra.gmra.mxu2 %v6147_v15 }
  0x9b   :  { %1970 = vmatpush.bf16.msra.mxu1 %v3895_v7  ;;  %2009 = vmatpush.bf16.msra.mxu2 %v4375_v8  ;;  %v182_v23 = vpop.f32.mrf.mxu2  ;;  %v195_v24 = vpop.f32.mrf.mxu3  ;;  %v4115_v7 = vor.u32 %v5326_v58, %v4112_v59  ;;  %v5281_v8 = vld [vmem:[%s8341_s3 + $0x2ac] sm:$0xf]  ;;  %v5314_v58 = vld [vmem:[%s8341_s3 + $0x3b0] sm:$0xf0]  ;;  %v5431_v59 = vld [vmem:[%s8341_s3 + $0x75c] sm:$0xf] }
  0x9c   :  { %1985 = vmatpush.bf16.msrb.mxu3 %v4015_v9  ;;  %1998 = vmatpush.bf16.msra.mxu0 %v4175_v16  ;;  %v206_v29 = vpop.f32.mrf.mxu0  ;;  %v219_v31 = vpop.f32.mrf.mxu1  ;;  %v3932_v9 = vld [vmem:[%s8341_s3 + $0x2bc] sm:$0xf0]  ;;  %v4295_v16 = vor.u32 %v5371_v2, %v4292_v3  ;;  %v5276_v24 = vld [vmem:[%s8341_s3 + $0x284] sm:$0xf]  ;;  %v3698_v3 = vld [vmem:[%s8341_s3 + $0xd0] sm:$0xf] }
  0x9d   :  { %v207_v36 = vadd.f32 %v206_v29, %v55_v10  ;;  %v220_v37 = vadd.f32 %v219_v31, %v56_v11  ;;  %v5321_v11 = vld [vmem:[%s8341_s3 + $0x3ec] sm:$0xf]  ;;  %v3935_v22 = vor.u32 %v5281_v8, %v3932_v9  ;;  %v4572_v29 = vld [vmem:[%s8341_s3 + $0x7bc] sm:$0xf0]  ;;  %v3795_v31 = vor.u32 %v5246_v17, %v3792_v19  ;;  %v3678_v17 = vld [vmem:[%s8341_s3 + $0xa8] sm:$0xf] }
  0x9e   :  { %v4095_v23 = vor.u32 %v5321_v11, %v4092_v12  ;;  %v4575_v42 = vor.u32 %v5441_v28, %v4572_v29  ;;  %v5309_v9 = vld [vmem:[%s8341_s3 + $0x388] sm:$0xf0]  ;;  %v4512_v11 = vld [vmem:[%s8341_s3 + $0x744] sm:$0xf0]  ;;  %v5219_v19 = vld [vmem:[%s8341_s3 + $0xb8] sm:$0xf0] }
  0x9f   :  { %v240_v43 = vmax.f32 %v207_v36, 0.0  ;;  %v241_v44 = vmax.f32 %v220_v37, 0.0  ;;  %1971 = vmatpush.bf16.msra.mxu1 %v3875_v25  ;;  %2010 = vmatpush.bf16.msra.mxu2 %v4355_v26  ;;  %v3912_v25 = vld [vmem:[%s8341_s3 + $0x294] sm:$0xf0]  ;;  %v5316_v26 = vld [vmem:[%s8341_s3 + $0x3c4] sm:$0xf] }
  0xa0   :  { %1986 = vmatpush.bf16.msrb.mxu3 %v3995_v32  ;;  %1999 = vmatpush.bf16.msra.mxu0 %v4155_v33  ;;  %v4275_v32 = vor.u32 %v5366_v20, %v4272_v21  ;;  %v5241_v36 = vld [vmem:[%s8341_s3 + $0x16c] sm:$0xf]  ;;  %v3772_v37 = vld [vmem:[%s8341_s3 + $0x17c] sm:$0xf0]  ;;  %v3915_v41 = vor.u32 %v5276_v24, %v3912_v25  ;;  %v4075_v39 = vor.u32 %v5316_v26, %v4072_v27  ;;  %v5304_v24 = vld [vmem:[%s8341_s3 + $0x360] sm:$0xf0] }
  0xa1   :  { %v6206_v53 = vpack.c.bf16 %v240_v43, %v240_v43  ;;  %v6208_v30 = vpack.c.bf16 %v241_v44, %v241_v44  ;;  %v3739_v43 = vor.u32 %v5234_v35, %v3738_v34  ;;  %v5436_v44 = vld [vmem:[%s8341_s3 + $0x784] sm:$0xf]  ;;  %v3775_v47 = vor.u32 %v5241_v36, %v3772_v37  ;;  %v5421_v25 = vld [vmem:[%s8341_s3 + $0x70c] sm:$0xf]  ;;  %v4492_v26 = vld [vmem:[%s8341_s3 + $0x71c] sm:$0xf0] }
  0xa2   :  { %v3679_v27 = vor.u32 %v5219_v19, %v3678_v17  ;;  %v3858_v28 = vld [vmem:[%s8341_s3 + $0x210] sm:$0xf]  ;;  %v5264_v29 = vld [vmem:[%s8341_s3 + $0x220] sm:$0xf0]  ;;  %v4495_v34 = vor.u32 %v5421_v25, %v4492_v26  ;;  %v3998_v35 = vld [vmem:[%s8341_s3 + $0x328] sm:$0xf] }
  0xa3   :  { %1972 = vmatpush.bf16.msra.mxu1 %v3855_v40  ;;  %2011 = vmatpush.bf16.msra.mxu2 %v4335_v45  ;;  %v232_v60 = vpop.f32.mrf.mxu2  ;;  %v4252_v40 = vld [vmem:[%s8341_s3 + $0x53c] sm:$0xf0]  ;;  %v4552_v45 = vld [vmem:[%s8341_s3 + $0x794] sm:$0xf0]  ;;  %v3859_v36 = vor.u32 %v5264_v29, %v3858_v28  ;;  %v5299_v37 = vld [vmem:[%s8341_s3 + $0x338] sm:$0xf0] }
  0xa4   :  { %v233_v0 = vadd.f32 %v232_v60, %v57_v46  ;;  %1926 = vmatmul.bf16.vlgmr.msra.gmra.mxu3 %v6206_v53  ;;  %1939 = vmatmul.bf16.vlgmr.msrb.gmra.mxu0 %v6208_v30  ;;  %v221_v4 = vpop.f32.mrf.mxu1  ;;  %v208_v5 = vpop.f32.mrf.mxu0  ;;  %v3718_v46 = vld [vmem:[%s8341_s3 + $0xf8] sm:$0xf]  ;;  %v4255_v48 = vor.u32 %v5361_v38, %v4252_v40  ;;  %v4532_v60 = vld [vmem:[%s8341_s3 + $0x76c] sm:$0xf0]  ;;  %v5416_v38 = vld [vmem:[%s8341_s3 + $0x6e4] sm:$0xf] }
  0xa5   :  { %1987 = vmatpush.bf16.msrb.mxu3 %v3975_v54  ;;  %2000 = vmatpush.bf16.msra.mxu0 %v4135_v55  ;;  %v3752_v54 = vld [vmem:[%s8341_s3 + $0x154] sm:$0xf0]  ;;  %v5356_v55 = vld [vmem:[%s8341_s3 + $0x504] sm:$0xf]  ;;  %v4059_v5 = vor.u32 %v5314_v58, %v4058_v57  ;;  %v5254_v57 = vld [vmem:[%s8341_s3 + $0x1d0] sm:$0xf0] }
  0xa6   :  { %v242_v10 = vmax.f32 %v233_v0, 0.0  ;;  %v5274_v0 = vld [vmem:[%s8341_s3 + $0x270] sm:$0xf0]  ;;  %v3755_v1 = vor.u32 %v5236_v52, %v3752_v54  ;;  %v4235_v2 = vor.u32 %v5356_v55, %v4232_v56  ;;  %v5224_v4 = vld [vmem:[%s8341_s3 + $0xe0] sm:$0xf0] }
  0xa7   :  { %1973 = vmatpush.bf16.msra.mxu1 %v3835_v61  ;;  %2012 = vmatpush.bf16.msra.mxu2 %v4315_v62  ;;  %v4555_v61 = vor.u32 %v5436_v44, %v4552_v45  ;;  %v3719_v62 = vor.u32 %v5229_v51, %v3718_v46  ;;  %v3899_v8 = vor.u32 %v5274_v0, %v3898_v63  ;;  %v4472_v40 = vld [vmem:[%s8341_s3 + $0x6f4] sm:$0xf0]  ;;  %v5209_v44 = vld [vmem:[%s8341_s3 + $0x68] sm:$0xf0]  ;;  %v5294_v51 = vld [vmem:[%s8341_s3 + $0x310] sm:$0xf0] }
  0xa8   :  { %v6251_v18 = vpack.c.bf16 %v242_v10, %v242_v10  ;;  %v5426_v10 = vld [vmem:[%s8341_s3 + $0x734] sm:$0xf]  ;;  %v3699_v12 = vor.u32 %v5224_v4, %v3698_v3  ;;  %v3999_v45 = vor.u32 %v5299_v37, %v3998_v35  ;;  %v4475_v46 = vor.u32 %v5416_v38, %v4472_v40  ;;  %v5411_v52 = vld [vmem:[%s8341_s3 + $0x6bc] sm:$0xf]  ;;  %v4452_v54 = vld [vmem:[%s8341_s3 + $0x6cc] sm:$0xf0] }
  0xa9   :  { %1988 = vmatpush.bf16.msrb.mxu3 %v3955_v6  ;;  %2001 = vmatpush.bf16.msra.mxu0 %v4115_v7  ;;  %v4535_v6 = vor.u32 %v5431_v59, %v4532_v60  ;;  %v4038_v7 = vld [vmem:[%s8341_s3 + $0x378] sm:$0xf]  ;;  %v4515_v21 = vor.u32 %v5426_v10, %v4512_v11  ;;  %v3818_v56 = vld [vmem:[%s8341_s3 + $0x1c0] sm:$0xf]  ;;  %v3618_v58 = vld [vmem:[%s8341_s3 + $0x30] sm:$0xf] }
  0xaa   :  { %4588 = vmatmul.msk.bf16.vlgmr.msrb.gmra.mxu1 %vm1862_vm2, %v6251_v18  ;;  %1965 = vmatmul.bf16.vlgmr.msrb.gmra.mxu2 %v6101_v49  ;;  %v4039_v20 = vor.u32 %v5309_v9, %v4038_v7  ;;  %v5204_v59 = vld [vmem:[%s8341_s3 + $0x40] sm:$0xf0]  ;;  %v3819_v63 = vor.u32 %v5254_v57, %v3818_v56  ;;  %v5289_v0 = vld [vmem:[%s8341_s3 + $0x2e8] sm:$0xf0]  ;;  %v3798_v4 = vld [vmem:[%s8341_s3 + $0x198] sm:$0xf] }
  0xab   :  { %1974 = vmatpush.bf16.msra.mxu1 %v3815_v13  ;;  %2013 = vmatpush.bf16.msra.mxu2 %v4295_v16  ;;  %v234_v33 = vpop.f32.mrf.mxu2  ;;  %v3878_v13 = vld [vmem:[%s8341_s3 + $0x238] sm:$0xf]  ;;  %v5269_v16 = vld [vmem:[%s8341_s3 + $0x248] sm:$0xf0]  ;;  %v3619_v3 = vor.u32 %v5204_v59, %v3618_v58  ;;  %v5199_v7 = vld [vmem:[%s8341_s3 + $0x18] sm:$0xf0] }
  0xac   :  { %v3938_v10 = vld [vmem:[%s8341_s3 + $0x2b0] sm:$0xf]  ;;  %v4378_v11 = vld [vmem:[%s8341_s3 + $0x620] sm:$0xf]  ;;  %v5401_v17 = vld [vmem:[%s8341_s3 + $0x66c] sm:$0xf] }
  0xad   :  { %1989 = vmatpush.bf16.msrb.mxu3 %v3935_v22  ;;  %2002 = vmatpush.bf16.msra.mxu0 %v4095_v23  ;;  %v4018_v22 = vld [vmem:[%s8341_s3 + $0x350] sm:$0xf]  ;;  %v3879_v23 = vor.u32 %v5269_v16, %v3878_v13  ;;  %v5284_v16 = vld [vmem:[%s8341_s3 + $0x2c0] sm:$0xf0]  ;;  %v4412_v19 = vld [vmem:[%s8341_s3 + $0x67c] sm:$0xf0] }
  0xae   :  { %v4019_v33 = vor.u32 %v5304_v24, %v4018_v22  ;;  %v5244_v22 = vld [vmem:[%s8341_s3 + $0x180] sm:$0xf0]  ;;  %v3918_v24 = vld [vmem:[%s8341_s3 + $0x288] sm:$0xf]  ;;  %v5279_v25 = vld [vmem:[%s8341_s3 + $0x298] sm:$0xf0]  ;;  %v3939_v26 = vor.u32 %v5284_v16, %v3938_v10 }
  0xaf   :  { %1975 = vmatpush.bf16.msra.mxu1 %v3795_v31  ;;  %2014 = vmatpush.bf16.msra.mxu2 %v4275_v32  ;;  %v3658_v31 = vld [vmem:[%s8341_s3 + $0x80] sm:$0xf]  ;;  %v5214_v32 = vld [vmem:[%s8341_s3 + $0x90] sm:$0xf0]  ;;  %v4358_v28 = vld [vmem:[%s8341_s3 + $0x5f8] sm:$0xf] }
  0xb0   :  { %v5389_v29 = vld [vmem:[%s8341_s3 + $0x608] sm:$0xf0]  ;;  %v5239_v35 = vld [vmem:[%s8341_s3 + $0x158] sm:$0xf0]  ;;  %v5444_v37 = vld [vmem:[%s8341_s3 + $0x7c0] sm:$0xf0] }
  0xb1   :  { %1990 = vmatpush.bf16.msrb.mxu3 %v3915_v41  ;;  %2003 = vmatpush.bf16.msra.mxu0 %v4075_v39  ;;  %v3659_v41 = vor.u32 %v5214_v32, %v3658_v31  ;;  %v3838_v39 = vld [vmem:[%s8341_s3 + $0x1e8] sm:$0xf]  ;;  %v5396_v31 = vld [vmem:[%s8341_s3 + $0x644] sm:$0xf]  ;;  %v4218_v38 = vld [vmem:[%s8341_s3 + $0x4e0] sm:$0xf]  ;;  %v4359_v40 = vor.u32 %v5389_v29, %v4358_v28 }
  0xb2   :  { %v4198_v56 = vld [vmem:[%s8341_s3 + $0x4b8] sm:$0xf]  ;;  %v5349_v57 = vld [vmem:[%s8341_s3 + $0x4c8] sm:$0xf0]  ;;  %v5267_v10 = vld [vmem:[%s8341_s3 + $0x23c] sm:$0xf] }
  0xb3   :  { %1976 = vmatpush.bf16.msra.mxu1 %v3775_v47  ;;  %2015 = vmatpush.bf16.msra.mxu2 %v4255_v48  ;;  %v3978_v47 = vld [vmem:[%s8341_s3 + $0x300] sm:$0xf]  ;;  %v4518_v58 = vld [vmem:[%s8341_s3 + $0x738] sm:$0xf]  ;;  %v5429_v59 = vld [vmem:[%s8341_s3 + $0x748] sm:$0xf0] }
  0xb4   :  { %1991 = vmatmul.bf16.vlgmr.msrb.gmra.mxu3 %v6145_v14  ;;  %2004 = vmatmul.bf16.vlgmr.msra.gmra.mxu0 %v6147_v15  ;;  %v3979_v60 = vor.u32 %v5294_v51, %v3978_v47  ;;  %v4338_v47 = vld [vmem:[%s8341_s3 + $0x5d0] sm:$0xf]  ;;  %v5369_v28 = vld [vmem:[%s8341_s3 + $0x568] sm:$0xf0] }
  0xb5   :  { %2041 = vmatpush.bf16.msra.mxu3 %v4575_v42  ;;  %2048 = vmatpush.bf16.msrb.mxu0 %v3739_v43  ;;  %v5259_v42 = vld [vmem:[%s8341_s3 + $0x1f8] sm:$0xf0]  ;;  %v3638_v43 = vld [vmem:[%s8341_s3 + $0x58] sm:$0xf] }
  0xb6   :  { %v3839_v48 = vor.u32 %v5259_v42, %v3838_v39  ;;  %v3639_v55 = vor.u32 %v5209_v44, %v3638_v43  ;;  %v4538_v39 = vld [vmem:[%s8341_s3 + $0x760] sm:$0xf]  ;;  %v5434_v42 = vld [vmem:[%s8341_s3 + $0x770] sm:$0xf0]  ;;  %v3919_v43 = vor.u32 %v5279_v25, %v3918_v24 }
  0xb7   :  { %1977 = vmatpush.bf16.msra.mxu1 %v3755_v1  ;;  %2016 = vmatpush.bf16.msra.mxu2 %v4235_v2  ;;  %v5406_v1 = vld [vmem:[%s8341_s3 + $0x694] sm:$0xf]  ;;  %v4432_v2 = vld [vmem:[%s8341_s3 + $0x6a4] sm:$0xf0] }
  0xb8   :  { %v4435_v9 = vor.u32 %v5406_v1, %v4432_v2  ;;  %v5379_v1 = vld [vmem:[%s8341_s3 + $0x5b8] sm:$0xf0]  ;;  %v4199_v2 = vor.u32 %v5349_v57, %v4198_v56  ;;  %v5262_v25 = vld [vmem:[%s8341_s3 + $0x214] sm:$0xf] }
  0xb9   :  { %2042 = vmatpush.bf16.msra.mxu3 %v4555_v61  ;;  %2049 = vmatpush.bf16.msrb.mxu0 %v3719_v62  ;;  %v4455_v61 = vor.u32 %v5411_v52, %v4452_v54  ;;  %v3958_v62 = vld [vmem:[%s8341_s3 + $0x2d8] sm:$0xf]  ;;  %v4539_v52 = vor.u32 %v5434_v42, %v4538_v39  ;;  %v4558_v54 = vld [vmem:[%s8341_s3 + $0x788] sm:$0xf]  ;;  %v5364_v39 = vld [vmem:[%s8341_s3 + $0x540] sm:$0xf0] }
  0xba   :  { %1978 = vmatmul.bf16.vlgmr.msra.gmra.mxu1 %v6103_v50  ;;  %2017 = vmatmul.bf16.vlgmr.msra.gmra.mxu2 %v6206_v53  ;;  %v5359_v56 = vld [vmem:[%s8341_s3 + $0x518] sm:$0xf0] }
  0xbb   :  { %2022 = vmatpush.bf16.msrb.mxu1 %v4535_v6  ;;  %2061 = vmatpush.bf16.msrb.mxu2 %v3899_v8  ;;  %v3598_v6 = vld [vmem:[%s8341_s3 + $0x8] sm:$0xf]  ;;  %v3959_v8 = vor.u32 %v5289_v0, %v3958_v62  ;;  %v3900_v62 = vld [vmem:[%s8341_s3 + $0x274] sm:$0xf0] }
  0xbc   :  { %v4318_v0 = vld [vmem:[%s8341_s3 + $0x5a8] sm:$0xf] }
  0xbd   :  { %2074 = vmatpush.bf16.msrb.mxu3 %v4059_v5  ;;  %2050 = vmatpush.bf16.msrb.mxu0 %v3699_v12  ;;  %v5249_v5 = vld [vmem:[%s8341_s3 + $0x1a8] sm:$0xf0]  ;;  %v5394_v12 = vld [vmem:[%s8341_s3 + $0x630] sm:$0xf0] }
  0xbe   :  { %v3799_v13 = vor.u32 %v5249_v5, %v3798_v4  ;;  %v4178_v4 = vld [vmem:[%s8341_s3 + $0x490] sm:$0xf] }
  0xbf   :  { %2023 = vmatpush.bf16.msrb.mxu1 %v4515_v21  ;;  %2062 = vmatpush.bf16.msrb.mxu2 %v3879_v23  ;;  %v3778_v21 = vld [vmem:[%s8341_s3 + $0x170] sm:$0xf]  ;;  %v4379_v23 = vor.u32 %v5394_v12, %v4378_v11  ;;  %v4298_v12 = vld [vmem:[%s8341_s3 + $0x580] sm:$0xf] }
  0xc0   :  { %v3779_v32 = vor.u32 %v5244_v22, %v3778_v21  ;;  %v3880_v11 = vld [vmem:[%s8341_s3 + $0x24c] sm:$0xf0]  ;;  %v5339_v21 = vld [vmem:[%s8341_s3 + $0x478] sm:$0xf0]  ;;  %v4478_v22 = vld [vmem:[%s8341_s3 + $0x6e8] sm:$0xf] }
  0xc1   :  { %2075 = vmatpush.bf16.msrb.mxu3 %v4039_v20  ;;  %2051 = vmatpush.bf16.msrb.mxu0 %v3679_v27  ;;  %v3599_v20 = vor.u32 %v5199_v7, %v3598_v6  ;;  %v4415_v27 = vor.u32 %v5401_v17, %v4412_v19  ;;  %v5344_v6 = vld [vmem:[%s8341_s3 + $0x4a0] sm:$0xf0]  ;;  %v4498_v7 = vld [vmem:[%s8341_s3 + $0x710] sm:$0xf]  ;;  %v4158_v19 = vld [vmem:[%s8341_s3 + $0x468] sm:$0xf] }
  0xc2   :  { %v4179_v16 = vor.u32 %v5344_v6, %v4178_v4  ;;  %v4159_v29 = vor.u32 %v5339_v21, %v4158_v19  ;;  %v3800_v4 = vld [vmem:[%s8341_s3 + $0x1ac] sm:$0xf0]  ;;  %v5307_v6 = vld [vmem:[%s8341_s3 + $0x37c] sm:$0xf]  ;;  %v3780_v19 = vld [vmem:[%s8341_s3 + $0x184] sm:$0xf0] }
  0xc3   :  { %2024 = vmatpush.bf16.msrb.mxu1 %v4495_v34  ;;  %2063 = vmatpush.bf16.msrb.mxu2 %v3859_v36  ;;  %v3758_v34 = vld [vmem:[%s8341_s3 + $0x148] sm:$0xf]  ;;  %v4578_v36 = vld [vmem:[%s8341_s3 + $0x7b0] sm:$0xf]  ;;  %v3740_v21 = vld [vmem:[%s8341_s3 + $0x134] sm:$0xf0] }
  0xc4   :  { %4589 = vmatmul.msk.bf16.vlgmr.msra.gmra.mxu3 %vm1862_vm2, %v6251_v18 }
  0xc5   :  { %2076 = vmatpush.bf16.msrb.mxu3 %v4019_v33  ;;  %2052 = vmatpush.bf16.msrb.mxu0 %v3659_v41  ;;  %v4392_v33 = vld [vmem:[%s8341_s3 + $0x654] sm:$0xf0]  ;;  %v5354_v41 = vld [vmem:[%s8341_s3 + $0x4f0] sm:$0xf0] }
  0xc6   :  { %v4395_v44 = vor.u32 %v5396_v31, %v4392_v33  ;;  %v4219_v51 = vor.u32 %v5354_v41, %v4218_v38  ;;  %v5257_v38 = vld [vmem:[%s8341_s3 + $0x1ec] sm:$0xf]  ;;  %v4258_v41 = vld [vmem:[%s8341_s3 + $0x530] sm:$0xf] }
  0xc7   :  { %2025 = vmatpush.bf16.msrb.mxu1 %v4475_v46  ;;  %2064 = vmatpush.bf16.msrb.mxu2 %v3839_v48  ;;  %v4579_v46 = vor.u32 %v5444_v37, %v4578_v36  ;;  %v5384_v48 = vld [vmem:[%s8341_s3 + $0x5e0] sm:$0xf0]  ;;  %v5414_v36 = vld [vmem:[%s8341_s3 + $0x6d0] sm:$0xf0] }
  0xc9   :  { %2077 = vmatpush.bf16.msrb.mxu3 %v3999_v45  ;;  %2053 = vmatpush.bf16.msrb.mxu0 %v3639_v55  ;;  %v3759_v45 = vor.u32 %v5239_v35, %v3758_v34  ;;  %v5439_v55 = vld [vmem:[%s8341_s3 + $0x798] sm:$0xf0]  ;;  %v5334_v34 = vld [vmem:[%s8341_s3 + $0x450] sm:$0xf0]  ;;  %v4458_v35 = vld [vmem:[%s8341_s3 + $0x6c0] sm:$0xf] }
  0xcb   :  { %2026 = vmatpush.bf16.msrb.mxu1 %v4455_v61  ;;  %2065 = vmatpush.bf16.msrb.mxu2 %v3819_v63  ;;  %v5272_v61 = vld [vmem:[%s8341_s3 + $0x264] sm:$0xf]  ;;  %v4559_v63 = vor.u32 %v5439_v55, %v4558_v54  ;;  %v3820_v54 = vld [vmem:[%s8341_s3 + $0x1d4] sm:$0xf0]  ;;  %v4238_v55 = vld [vmem:[%s8341_s3 + $0x508] sm:$0xf] }
  0xcc   :  { %v3903_v5 = vor.u32 %v5272_v61, %v3900_v62  ;;  %v4098_v61 = vld [vmem:[%s8341_s3 + $0x3f0] sm:$0xf] }
  0xcd   :  { %2078 = vmatpush.bf16.msrb.mxu3 %v3979_v60  ;;  %2054 = vmatpush.bf16.msrb.mxu0 %v3619_v3  ;;  %v4339_v60 = vor.u32 %v5384_v48, %v4338_v47  ;;  %v4519_v3 = vor.u32 %v5429_v59, %v4518_v58  ;;  %v4438_v47 = vld [vmem:[%s8341_s3 + $0x698] sm:$0xf]  ;;  %v5409_v48 = vld [vmem:[%s8341_s3 + $0x6a8] sm:$0xf0]  ;;  %v5312_v59 = vld [vmem:[%s8341_s3 + $0x3a4] sm:$0xf] }
  0xce   :  { %v4439_v58 = vor.u32 %v5409_v48, %v4438_v47  ;;  %v5222_v48 = vld [vmem:[%s8341_s3 + $0xd4] sm:$0xf] }
  0xcf   :  { %2027 = vmatpush.bf16.msrb.mxu1 %v4435_v9  ;;  %2066 = vmatpush.bf16.msrb.mxu2 %v3799_v13  ;;  %v4319_v9 = vor.u32 %v5379_v1, %v4318_v0  ;;  %v5374_v13 = vld [vmem:[%s8341_s3 + $0x590] sm:$0xf0]  ;;  %v4418_v0 = vld [vmem:[%s8341_s3 + $0x670] sm:$0xf]  ;;  %v5404_v1 = vld [vmem:[%s8341_s3 + $0x680] sm:$0xf0] }
  0xd0   :  { %v4299_v24 = vor.u32 %v5374_v13, %v4298_v12  ;;  %v4398_v13 = vld [vmem:[%s8341_s3 + $0x648] sm:$0xf] }
  0xd1   :  { %2079 = vmatpush.bf16.msrb.mxu3 %v3959_v8  ;;  %2055 = vmatpush.bf16.msrb.mxu0 %v3599_v20  ;;  %v5424_v8 = vld [vmem:[%s8341_s3 + $0x720] sm:$0xf0]  ;;  %v3883_v20 = vor.u32 %v5267_v10, %v3880_v11  ;;  %v4078_v10 = vld [vmem:[%s8341_s3 + $0x3c8] sm:$0xf]  ;;  %v5319_v11 = vld [vmem:[%s8341_s3 + $0x3d8] sm:$0xf0] }
  0xd2   :  { %v4499_v17 = vor.u32 %v5424_v8, %v4498_v7  ;;  %v4419_v8 = vor.u32 %v5404_v1, %v4418_v0  ;;  %v3680_v0 = vld [vmem:[%s8341_s3 + $0xbc] sm:$0xf0]  ;;  %v5337_v1 = vld [vmem:[%s8341_s3 + $0x46c] sm:$0xf] }
  0xd3   :  { %2028 = vmatpush.bf16.msrb.mxu1 %v4415_v27  ;;  %2067 = vmatpush.bf16.msrb.mxu2 %v3779_v32  ;;  %v4278_v27 = vld [vmem:[%s8341_s3 + $0x558] sm:$0xf]  ;;  %v4138_v32 = vld [vmem:[%s8341_s3 + $0x440] sm:$0xf] }
  0xd4   :  { %2056 = vmatmul.bf16.vlgmr.msrb.gmra.mxu0 %v6101_v49  ;;  %v4279_v37 = vor.u32 %v5369_v28, %v4278_v27  ;;  %v4139_v42 = vor.u32 %v5334_v34, %v4138_v32  ;;  %v5302_v27 = vld [vmem:[%s8341_s3 + $0x354] sm:$0xf]  ;;  %v5237_v32 = vld [vmem:[%s8341_s3 + $0x14c] sm:$0xf] }
  0xd5   :  { %2100 = vmatpush.bf16.msra.mxu0 %v4379_v23  ;;  %2080 = vmatpush.bf16.msrb.mxu3 %v3939_v26  ;;  %v5419_v23 = vld [vmem:[%s8341_s3 + $0x6f8] sm:$0xf0]  ;;  %v3860_v26 = vld [vmem:[%s8341_s3 + $0x224] sm:$0xf0] }
  0xd6   :  { %v4479_v31 = vor.u32 %v5419_v23, %v4478_v22  ;;  %v3863_v33 = vor.u32 %v5262_v25, %v3860_v26  ;;  %v5352_v23 = vld [vmem:[%s8341_s3 + $0x4e4] sm:$0xf]  ;;  %v4079_v25 = vor.u32 %v5319_v11, %v4078_v10 }
  0xd7   :  { %2029 = vmatpush.bf16.msrb.mxu1 %v4395_v44  ;;  %2068 = vmatpush.bf16.msrb.mxu2 %v3759_v45  ;;  %v4118_v44 = vld [vmem:[%s8341_s3 + $0x418] sm:$0xf]  ;;  %v5212_v11 = vld [vmem:[%s8341_s3 + $0x84] sm:$0xf] }
  0xd9   :  { %2101 = vmatpush.bf16.msra.mxu0 %v4359_v40  ;;  %2081 = vmatpush.bf16.msrb.mxu3 %v3919_v43  ;;  %v3840_v40 = vld [vmem:[%s8341_s3 + $0x1fc] sm:$0xf0]  ;;  %v4459_v43 = vor.u32 %v5414_v36, %v4458_v35  ;;  %v5227_v35 = vld [vmem:[%s8341_s3 + $0xfc] sm:$0xf]  ;;  %v3720_v36 = vld [vmem:[%s8341_s3 + $0x10c] sm:$0xf0] }
  0xda   :  { %2030 = vmatmul.bf16.vlgmr.msrb.gmra.mxu1 %v6208_v30  ;;  %2069 = vmatmul.bf16.vlgmr.msrb.gmra.mxu2 %v6103_v50  ;;  %v3843_v45 = vor.u32 %v5257_v38, %v3840_v40  ;;  %v4200_v38 = vld [vmem:[%s8341_s3 + $0x4cc] sm:$0xf0]  ;;  %v5432_v40 = vld [vmem:[%s8341_s3 + $0x764] sm:$0xf] }
  0xdb   :  { %2087 = vmatpush.bf16.msra.mxu1 %v4219_v51  ;;  %2113 = vmatpush.bf16.msra.mxu2 %v4539_v52  ;;  %v4259_v51 = vor.u32 %v5364_v39, %v4258_v41  ;;  %v5252_v52 = vld [vmem:[%s8341_s3 + $0x1c4] sm:$0xf]  ;;  %v4540_v41 = vld [vmem:[%s8341_s3 + $0x774] sm:$0xf0] }
  0xdc   :  { %2082 = vmatmul.bf16.vlgmr.msrb.gmra.mxu3 %v6145_v14  ;;  %v3823_v62 = vor.u32 %v5252_v52, %v3820_v54  ;;  %v4543_v47 = vor.u32 %v5432_v40, %v4540_v41  ;;  %v5342_v52 = vld [vmem:[%s8341_s3 + $0x494] sm:$0xf]  ;;  %v4180_v54 = vld [vmem:[%s8341_s3 + $0x4a4] sm:$0xf0] }
  0xdd   :  { %2132 = vmatpush.bf16.msra.mxu3 %v4579_v46  ;;  %2102 = vmatpush.bf16.msra.mxu0 %v4339_v60  ;;  %v5329_v46 = vld [vmem:[%s8341_s3 + $0x428] sm:$0xf0]  ;;  %v4060_v60 = vld [vmem:[%s8341_s3 + $0x3b4] sm:$0xf0] }
  0xde   :  { %v4119_v57 = vor.u32 %v5329_v46, %v4118_v44  ;;  %v5297_v44 = vld [vmem:[%s8341_s3 + $0x32c] sm:$0xf] }
  0xdf   :  { %2088 = vmatpush.bf16.msra.mxu1 %v4199_v2  ;;  %2114 = vmatpush.bf16.msra.mxu2 %v4519_v3  ;;  %v4239_v2 = vor.u32 %v5359_v56, %v4238_v55  ;;  %v5247_v3 = vld [vmem:[%s8341_s3 + $0x19c] sm:$0xf]  ;;  %v4520_v56 = vld [vmem:[%s8341_s3 + $0x74c] sm:$0xf0] }
  0xe0   :  { %v3803_v12 = vor.u32 %v5247_v3, %v3800_v4  ;;  %v5427_v55 = vld [vmem:[%s8341_s3 + $0x73c] sm:$0xf]  ;;  %v5422_v3 = vld [vmem:[%s8341_s3 + $0x714] sm:$0xf]  ;;  %v4500_v4 = vld [vmem:[%s8341_s3 + $0x724] sm:$0xf0] }
  0xe1   :  { %2133 = vmatpush.bf16.msra.mxu3 %v4559_v63  ;;  %2103 = vmatpush.bf16.msra.mxu0 %v4319_v9  ;;  %v5324_v63 = vld [vmem:[%s8341_s3 + $0x400] sm:$0xf0]  ;;  %v4040_v9 = vld [vmem:[%s8341_s3 + $0x38c] sm:$0xf0]  ;;  %v4503_v10 = vor.u32 %v5422_v3, %v4500_v4 }
  0xe2   :  { %v4099_v7 = vor.u32 %v5324_v63, %v4098_v61  ;;  %v4043_v22 = vor.u32 %v5307_v6, %v4040_v9  ;;  %v4183_v61 = vor.u32 %v5342_v52, %v4180_v54  ;;  %v5217_v63 = vld [vmem:[%s8341_s3 + $0xac] sm:$0xf]  ;;  %v4560_v54 = vld [vmem:[%s8341_s3 + $0x79c] sm:$0xf0] }
  0xe3   :  { %2089 = vmatpush.bf16.msra.mxu1 %v4179_v16  ;;  %2115 = vmatpush.bf16.msra.mxu2 %v4499_v17  ;;  %v5399_v16 = vld [vmem:[%s8341_s3 + $0x658] sm:$0xf0]  ;;  %v5242_v17 = vld [vmem:[%s8341_s3 + $0x174] sm:$0xf]  ;;  %v3683_v6 = vor.u32 %v5217_v63, %v3680_v0  ;;  %v5437_v52 = vld [vmem:[%s8341_s3 + $0x78c] sm:$0xf] }
  0xe4   :  { %v4399_v26 = vor.u32 %v5399_v16, %v4398_v13  ;;  %v3783_v28 = vor.u32 %v5242_v17, %v3780_v19  ;;  %v5332_v13 = vld [vmem:[%s8341_s3 + $0x444] sm:$0xf]  ;;  %v4140_v16 = vld [vmem:[%s8341_s3 + $0x454] sm:$0xf0]  ;;  %v5417_v17 = vld [vmem:[%s8341_s3 + $0x6ec] sm:$0xf]  ;;  %v4563_v3 = vor.u32 %v5437_v52, %v4560_v54 }
  0xe5   :  { %2152 = vmatpush.bf16.msrb.mxu3 %v3903_v5  ;;  %2104 = vmatpush.bf16.msra.mxu0 %v4299_v24  ;;  %v4063_v5 = vor.u32 %v5312_v59, %v4060_v60  ;;  %v4220_v24 = vld [vmem:[%s8341_s3 + $0x4f4] sm:$0xf0]  ;;  %v5292_v59 = vld [vmem:[%s8341_s3 + $0x304] sm:$0xf]  ;;  %v4480_v19 = vld [vmem:[%s8341_s3 + $0x6fc] sm:$0xf0] }
  0xe6   :  { %v4223_v34 = vor.u32 %v5352_v23, %v4220_v24  ;;  %v3980_v60 = vld [vmem:[%s8341_s3 + $0x314] sm:$0xf0]  ;;  %v3940_v23 = vld [vmem:[%s8341_s3 + $0x2c4] sm:$0xf0]  ;;  %v4143_v24 = vor.u32 %v5332_v13, %v4140_v16  ;;  %v5275_v0 = vld [vmem:[%s8341_s3 + $0x278] sm:$0xf0] }
  0xe7   :  { %2090 = vmatpush.bf16.msra.mxu1 %v4159_v29  ;;  %2116 = vmatpush.bf16.msra.mxu2 %v4479_v31  ;;  %v4020_v31 = vld [vmem:[%s8341_s3 + $0x364] sm:$0xf0]  ;;  %v3886_v13 = vld [vmem:[%s8341_s3 + $0x240] sm:$0xf]  ;;  %v5270_v16 = vld [vmem:[%s8341_s3 + $0x250] sm:$0xf0] }
  0xe8   :  { %v4023_v39 = vor.u32 %v5302_v27, %v4020_v31  ;;  %v3640_v27 = vld [vmem:[%s8341_s3 + $0x6c] sm:$0xf0]  ;;  %v5412_v31 = vld [vmem:[%s8341_s3 + $0x6c4] sm:$0xf]  ;;  %v3906_v63 = vld [vmem:[%s8341_s3 + $0x268] sm:$0xf] }
  0xe9   :  { %2153 = vmatpush.bf16.msrb.mxu3 %v3883_v20  ;;  %2105 = vmatpush.bf16.msra.mxu0 %v4279_v37  ;;  %v5232_v20 = vld [vmem:[%s8341_s3 + $0x124] sm:$0xf]  ;;  %v5347_v37 = vld [vmem:[%s8341_s3 + $0x4bc] sm:$0xf]  ;;  %v3686_v52 = vld [vmem:[%s8341_s3 + $0xb0] sm:$0xf] }
  0xea   :  { %v3743_v29 = vor.u32 %v5232_v20, %v3740_v21  ;;  %v4203_v46 = vor.u32 %v5347_v37, %v4200_v38  ;;  %v5442_v37 = vld [vmem:[%s8341_s3 + $0x7b4] sm:$0xf]  ;;  %v4580_v38 = vld [vmem:[%s8341_s3 + $0x7c4] sm:$0xf0]  ;;  %v5220_v54 = vld [vmem:[%s8341_s3 + $0xc0] sm:$0xf0] }
  0xeb   :  { %2091 = vmatpush.bf16.msra.mxu1 %v4139_v42  ;;  %2117 = vmatpush.bf16.msra.mxu2 %v4459_v43  ;;  %v3723_v43 = vor.u32 %v5227_v35, %v3720_v36  ;;  %v3920_v36 = vld [vmem:[%s8341_s3 + $0x29c] sm:$0xf0] }
  0xec   :  { %4590 = vmatmul.msk.bf16.vlgmr.msra.gmra.mxu3 %vm1862_vm2, %v6251_v18 }
  0xed   :  { %2154 = vmatpush.bf16.msrb.mxu3 %v3863_v33  ;;  %2106 = vmatpush.bf16.msra.mxu0 %v4259_v51  ;;  %v3760_v33 = vld [vmem:[%s8341_s3 + $0x15c] sm:$0xf0]  ;;  %v3700_v51 = vld [vmem:[%s8341_s3 + $0xe4] sm:$0xf0] }
  0xee   :  { %v3763_v42 = vor.u32 %v5237_v32, %v3760_v33  ;;  %v4460_v32 = vld [vmem:[%s8341_s3 + $0x6d4] sm:$0xf0] }
  0xef   :  { %2092 = vmatpush.bf16.msra.mxu1 %v4119_v57  ;;  %2118 = vmatpush.bf16.msra.mxu2 %v4439_v58  ;;  %v3703_v58 = vor.u32 %v5222_v48, %v3700_v51  ;;  %v4463_v41 = vor.u32 %v5412_v31, %v4460_v32  ;;  %v4583_v48 = vor.u32 %v5442_v37, %v4580_v38  ;;  %v5265_v31 = vld [vmem:[%s8341_s3 + $0x228] sm:$0xf0]  ;;  %v4206_v38 = vld [vmem:[%s8341_s3 + $0x4c0] sm:$0xf] }
  0xf0   :  { %v5225_v37 = vld [vmem:[%s8341_s3 + $0xe8] sm:$0xf0] }
  0xf1   :  { %2155 = vmatpush.bf16.msrb.mxu3 %v3843_v45  ;;  %2107 = vmatpush.bf16.msra.mxu0 %v4239_v2  ;;  %v4000_v45 = vld [vmem:[%s8341_s3 + $0x33c] sm:$0xf0] }
  0xf2   :  { %v4003_v57 = vor.u32 %v5297_v44, %v4000_v45  ;;  %v4160_v2 = vld [vmem:[%s8341_s3 + $0x47c] sm:$0xf0]  ;;  %v4100_v44 = vld [vmem:[%s8341_s3 + $0x404] sm:$0xf0]  ;;  %v5407_v45 = vld [vmem:[%s8341_s3 + $0x69c] sm:$0xf] }
  0xf3   :  { %2093 = vmatpush.bf16.msra.mxu1 %v4099_v7  ;;  %2119 = vmatpush.bf16.msra.mxu2 %v4419_v8  ;;  %v5287_v7 = vld [vmem:[%s8341_s3 + $0x2dc] sm:$0xf]  ;;  %v3960_v8 = vld [vmem:[%s8341_s3 + $0x2ec] sm:$0xf0]  ;;  %v4163_v9 = vor.u32 %v5337_v1, %v4160_v2  ;;  %v5392_v1 = vld [vmem:[%s8341_s3 + $0x624] sm:$0xf] }
  0xf4   :  { %2108 = vmatmul.bf16.vlgmr.msra.gmra.mxu0 %v6206_v53  ;;  %v3963_v20 = vor.u32 %v5287_v7, %v3960_v8  ;;  %v4380_v2 = vld [vmem:[%s8341_s3 + $0x634] sm:$0xf0] }
  0xf5   :  { %2156 = vmatpush.bf16.msrb.mxu3 %v3823_v62  ;;  %2165 = vmatpush.bf16.msrb.mxu0 %v4063_v5  ;;  %v4523_v62 = vor.u32 %v5427_v55, %v4520_v56  ;;  %v3983_v5 = vor.u32 %v5292_v59, %v3980_v60  ;;  %v5197_v55 = vld [vmem:[%s8341_s3 + $0xc] sm:$0xf]  ;;  %v4080_v60 = vld [vmem:[%s8341_s3 + $0x3dc] sm:$0xf0] }
  0xf6   :  { %v5317_v59 = vld [vmem:[%s8341_s3 + $0x3cc] sm:$0xf] }
  0xf7   :  { %2094 = vmatpush.bf16.msra.mxu1 %v4079_v25  ;;  %2120 = vmatpush.bf16.msra.mxu2 %v4399_v26  ;;  %v4483_v25 = vor.u32 %v5417_v17, %v4480_v19  ;;  %v5207_v26 = vld [vmem:[%s8341_s3 + $0x5c] sm:$0xf]  ;;  %v4083_v7 = vor.u32 %v5317_v59, %v4080_v60  ;;  %v3826_v60 = vld [vmem:[%s8341_s3 + $0x1c8] sm:$0xf] }
  0xf8   :  { %v3643_v35 = vor.u32 %v5207_v26, %v3640_v27  ;;  %v5387_v19 = vld [vmem:[%s8341_s3 + $0x5fc] sm:$0xf]  ;;  %v3887_v27 = vor.u32 %v5270_v16, %v3886_v13  ;;  %v4280_v16 = vld [vmem:[%s8341_s3 + $0x56c] sm:$0xf0] }
  0xf9   :  { %2157 = vmatpush.bf16.msrb.mxu3 %v3803_v12  ;;  %2166 = vmatpush.bf16.msrb.mxu0 %v4043_v22  ;;  %v3660_v12 = vld [vmem:[%s8341_s3 + $0x94] sm:$0xf0]  ;;  %v5282_v22 = vld [vmem:[%s8341_s3 + $0x2b4] sm:$0xf]  ;;  %v5367_v13 = vld [vmem:[%s8341_s3 + $0x55c] sm:$0xf] }
  0xfa   :  { %2095 = vmatmul.bf16.vlgmr.msra.gmra.mxu1 %v6147_v15  ;;  %2121 = vmatmul.bf16.vlgmr.msra.gmra.mxu2 %v6208_v30  ;;  %v3663_v21 = vor.u32 %v5212_v11, %v3660_v12  ;;  %v3943_v33 = vor.u32 %v5282_v22, %v3940_v23  ;;  %v4383_v11 = vor.u32 %v5392_v1, %v4380_v2  ;;  %v4400_v12 = vld [vmem:[%s8341_s3 + $0x65c] sm:$0xf0]  ;;  %v5230_v22 = vld [vmem:[%s8341_s3 + $0x110] sm:$0xf0]  ;;  %v4226_v23 = vld [vmem:[%s8341_s3 + $0x4e8] sm:$0xf] }
  0xfb   :  { %2139 = vmatpush.bf16.msrb.mxu1 %v3743_v29  ;;  %2178 = vmatpush.bf16.msrb.mxu2 %v4223_v34  ;;  %v4120_v29 = vld [vmem:[%s8341_s3 + $0x42c] sm:$0xf0]  ;;  %v5277_v34 = vld [vmem:[%s8341_s3 + $0x28c] sm:$0xf]  ;;  %v3666_v2 = vld [vmem:[%s8341_s3 + $0x88] sm:$0xf] }
  0xfd   :  { %2158 = vmatpush.bf16.msrb.mxu3 %v3783_v28  ;;  %2167 = vmatpush.bf16.msrb.mxu0 %v4023_v39  ;;  %v5327_v28 = vld [vmem:[%s8341_s3 + $0x41c] sm:$0xf]  ;;  %v5202_v39 = vld [vmem:[%s8341_s3 + $0x34] sm:$0xf] }
  0xfe   :  { %v4123_v40 = vor.u32 %v5327_v28, %v4120_v29  ;;  %v3866_v29 = vld [vmem:[%s8341_s3 + $0x218] sm:$0xf] }
  0xff   :  { %2140 = vmatpush.bf16.msrb.mxu1 %v3723_v43  ;;  %2179 = vmatpush.bf16.msrb.mxu2 %v4203_v46  ;;  %v5322_v43 = vld [vmem:[%s8341_s3 + $0x3f4] sm:$0xf]  ;;  %v4440_v46 = vld [vmem:[%s8341_s3 + $0x6ac] sm:$0xf0] }
 0x100   :  { %v4103_v56 = vor.u32 %v5322_v43, %v4100_v44 }
 0x101   :  { %2159 = vmatpush.bf16.msrb.mxu3 %v3763_v42  ;;  %2168 = vmatpush.bf16.msrb.mxu0 %v4003_v57  ;;  %v3620_v42 = vld [vmem:[%s8341_s3 + $0x44] sm:$0xf0]  ;;  %v4443_v57 = vor.u32 %v5407_v45, %v4440_v46  ;;  %v5260_v46 = vld [vmem:[%s8341_s3 + $0x200] sm:$0xf0] }
 0x102   :  { %v3623_v51 = vor.u32 %v5202_v39, %v3620_v42  ;;  %v3846_v42 = vld [vmem:[%s8341_s3 + $0x1f0] sm:$0xf] }
 0x103   :  { %2141 = vmatpush.bf16.msrb.mxu1 %v3703_v58  ;;  %2180 = vmatpush.bf16.msrb.mxu2 %v4183_v61  ;;  %v3600_v58 = vld [vmem:[%s8341_s3 + $0x1c] sm:$0xf0]  ;;  %v5402_v61 = vld [vmem:[%s8341_s3 + $0x674] sm:$0xf] }
 0x104   :  { %2160 = vmatmul.bf16.vlgmr.msrb.gmra.mxu3 %v6103_v50  ;;  %v3603_v4 = vor.u32 %v5197_v55, %v3600_v58  ;;  %v3847_v58 = vor.u32 %v5260_v46, %v3846_v42  ;;  %v3766_v42 = vld [vmem:[%s8341_s3 + $0x150] sm:$0xf] }
 0x105   :  { %2204 = vmatpush.bf16.msra.mxu3 %v4543_v47  ;;  %2169 = vmatpush.bf16.msrb.mxu0 %v3983_v5  ;;  %v3923_v47 = vor.u32 %v5277_v34, %v3920_v36  ;;  %v3746_v5 = vld [vmem:[%s8341_s3 + $0x128] sm:$0xf]  ;;  %v5382_v34 = vld [vmem:[%s8341_s3 + $0x5d4] sm:$0xf]  ;;  %v3706_v36 = vld [vmem:[%s8341_s3 + $0xd8] sm:$0xf] }
 0x106   :  { %v3707_v43 = vor.u32 %v5225_v37, %v3706_v36  ;;  %v5205_v36 = vld [vmem:[%s8341_s3 + $0x48] sm:$0xf0]  ;;  %v4126_v37 = vld [vmem:[%s8341_s3 + $0x420] sm:$0xf] }
 0x107   :  { %2142 = vmatpush.bf16.msrb.mxu1 %v3683_v6  ;;  %2181 = vmatpush.bf16.msrb.mxu2 %v4163_v9  ;;  %v5235_v6 = vld [vmem:[%s8341_s3 + $0x138] sm:$0xf0]  ;;  %v5397_v9 = vld [vmem:[%s8341_s3 + $0x64c] sm:$0xf] }
 0x108   :  { %v3747_v17 = vor.u32 %v5235_v6, %v3746_v5  ;;  %v4403_v26 = vor.u32 %v5397_v9, %v4400_v12  ;;  %v5340_v5 = vld [vmem:[%s8341_s3 + $0x480] sm:$0xf0]  ;;  %v3806_v9 = vld [vmem:[%s8341_s3 + $0x1a0] sm:$0xf]  ;;  %v5250_v12 = vld [vmem:[%s8341_s3 + $0x1b0] sm:$0xf0] }
 0x109   :  { %2205 = vmatpush.bf16.msra.mxu3 %v4523_v62  ;;  %2170 = vmatpush.bf16.msrb.mxu0 %v3963_v20  ;;  %v4420_v62 = vld [vmem:[%s8341_s3 + $0x684] sm:$0xf0]  ;;  %v4360_v20 = vld [vmem:[%s8341_s3 + $0x60c] sm:$0xf0] }
 0x10a   :  { %v4423_v8 = vor.u32 %v5402_v61, %v4420_v62  ;;  %v4363_v28 = vor.u32 %v5387_v19, %v4360_v20  ;;  %v3687_v61 = vor.u32 %v5220_v54, %v3686_v52  ;;  %v5255_v62 = vld [vmem:[%s8341_s3 + $0x1d8] sm:$0xf0]  ;;  %v3646_v20 = vld [vmem:[%s8341_s3 + $0x60] sm:$0xf]  ;;  %v5200_v52 = vld [vmem:[%s8341_s3 + $0x20] sm:$0xf0] }
 0x10b   :  { %2143 = vmatpush.bf16.msrb.mxu1 %v3663_v21  ;;  %2182 = vmatpush.bf16.msrb.mxu2 %v4143_v24  ;;  %v3726_v21 = vld [vmem:[%s8341_s3 + $0x100] sm:$0xf]  ;;  %v5355_v24 = vld [vmem:[%s8341_s3 + $0x4f8] sm:$0xf0] }
 0x10c   :  { %v3727_v32 = vor.u32 %v5230_v22, %v3726_v21  ;;  %v5210_v21 = vld [vmem:[%s8341_s3 + $0x70] sm:$0xf0]  ;;  %v4146_v22 = vld [vmem:[%s8341_s3 + $0x448] sm:$0xf] }
 0x10d   :  { %2206 = vmatpush.bf16.msra.mxu3 %v4503_v10  ;;  %2171 = vmatpush.bf16.msrb.mxu0 %v3943_v33  ;;  %v3907_v10 = vor.u32 %v5275_v0, %v3906_v63  ;;  %v4227_v33 = vor.u32 %v5355_v24, %v4226_v23  ;;  %v5372_v63 = vld [vmem:[%s8341_s3 + $0x584] sm:$0xf]  ;;  %v4300_v0 = vld [vmem:[%s8341_s3 + $0x594] sm:$0xf0]  ;;  %v5335_v23 = vld [vmem:[%s8341_s3 + $0x458] sm:$0xf0] }
 0x10f   :  { %2144 = vmatpush.bf16.msrb.mxu1 %v3643_v35  ;;  %2183 = vmatpush.bf16.msrb.mxu2 %v4123_v40  ;;  %v4340_v35 = vld [vmem:[%s8341_s3 + $0x5e4] sm:$0xf0]  ;;  %v5350_v40 = vld [vmem:[%s8341_s3 + $0x4d0] sm:$0xf0] }
 0x110   :  { %v4343_v39 = vor.u32 %v5382_v34, %v4340_v35  ;;  %v4207_v44 = vor.u32 %v5350_v40, %v4206_v38  ;;  %v4147_v34 = vor.u32 %v5335_v23, %v4146_v22  ;;  %v3626_v35 = vld [vmem:[%s8341_s3 + $0x38] sm:$0xf]  ;;  %v5330_v38 = vld [vmem:[%s8341_s3 + $0x430] sm:$0xf0]  ;;  %v4707_v23 = vld [vmem:[%s8344_s5 + $0xe0] sm:$0xf] }
 0x111   :  { %2207 = vmatpush.bf16.msra.mxu3 %v4483_v25  ;;  %2172 = vmatpush.bf16.msrb.mxu0 %v3923_v47  ;;  %v6972_v25 = vpop.f32.mrf.mxu0  ;;  %v5377_v47 = vld [vmem:[%s8341_s3 + $0x5ac] sm:$0xf]  ;;  %v3627_v46 = vor.u32 %v5205_v36, %v3626_v35  ;;  %v4127_v54 = vor.u32 %v5330_v38, %v4126_v37  ;;  %v5390_v22 = vld [vmem:[%s8341_s3 + $0x610] sm:$0xf0]  ;;  %v4026_v38 = vld [vmem:[%s8341_s3 + $0x358] sm:$0xf] }
 0x112   :  { %v5425_v35 = vld [vmem:[%s8341_s3 + $0x728] sm:$0xf0] }
 0x113   :  { %2145 = vmatpush.bf16.msrb.mxu1 %v3623_v51  ;;  %2184 = vmatpush.bf16.msrb.mxu2 %v4103_v56  ;;  %v4186_v56 = vld [vmem:[%s8341_s3 + $0x498] sm:$0xf] }
 0x114   :  { %2173 = vmatmul.bf16.vlgmr.msrb.gmra.mxu0 %v6145_v14 }
 0x115   :  { %2208 = vmatpush.bf16.msra.mxu3 %v4463_v41  ;;  %2223 = vmatpush.bf16.msra.mxu0 %v4583_v48  ;;  %v3867_v41 = vor.u32 %v5265_v31, %v3866_v29  ;;  %v7003_v45 = vpop.f32.mrf.mxu3  ;;  %v4320_v48 = vld [vmem:[%s8341_s3 + $0x5bc] sm:$0xf0]  ;;  %v3647_v29 = vor.u32 %v5210_v21, %v3646_v20  ;;  %v5245_v31 = vld [vmem:[%s8341_s3 + $0x188] sm:$0xf0] }
 0x116   :  { %v4323_v59 = vor.u32 %v5377_v47, %v4320_v48  ;;  %v4240_v47 = vld [vmem:[%s8341_s3 + $0x51c] sm:$0xf0]  ;;  %v3606_v48 = vld [vmem:[%s8341_s3 + $0x10] sm:$0xf] }
 0x117   :  { %2146 = vmatpush.bf16.msrb.mxu1 %v3603_v4  ;;  %2185 = vmatpush.bf16.msrb.mxu2 %v4083_v7  ;;  %v7015_v51 = vpop.f32.mrf.mxu1  ;;  %v4166_v4 = vld [vmem:[%s8341_s3 + $0x470] sm:$0xf]  ;;  %v3827_v7 = vor.u32 %v5255_v62, %v3826_v60  ;;  %v5325_v60 = vld [vmem:[%s8341_s3 + $0x408] sm:$0xf0]  ;;  %v5315_v62 = vld [vmem:[%s8341_s3 + $0x3b8] sm:$0xf0] }
 0x118   :  { %v4366_v20 = vld [vmem:[%s8341_s3 + $0x600] sm:$0xf] }
 0x119   :  { %2209 = vmatpush.bf16.msra.mxu3 %v4443_v57  ;;  %2224 = vmatpush.bf16.msra.mxu0 %v4563_v3  ;;  %v1890_v55 = vpop.f32.mrf.mxu0  ;;  %v5345_v57 = vld [vmem:[%s8341_s3 + $0x4a8] sm:$0xf0]  ;;  %v5215_v3 = vld [vmem:[%s8341_s3 + $0x98] sm:$0xf0]  ;;  %v4367_v36 = vor.u32 %v5390_v22, %v4366_v20  ;;  %v4446_v22 = vld [vmem:[%s8341_s3 + $0x6a0] sm:$0xf] }
 0x11a   :  { %2147 = vmatmul.bf16.vlgmr.msrb.gmra.mxu1 %v6101_v49  ;;  %2186 = vmatmul.bf16.vlgmr.msrb.gmra.mxu2 %v6147_v15  ;;  %v4187_v1 = vor.u32 %v5345_v57, %v4186_v56  ;;  %v4106_v57 = vld [vmem:[%s8341_s3 + $0x3f8] sm:$0xf] }
 0x11b   :  { %2191 = vmatpush.bf16.msra.mxu1 %v4383_v11  ;;  %2230 = vmatpush.bf16.msra.mxu2 %v3747_v17  ;;  %v4167_v17 = vor.u32 %v5340_v5, %v4166_v4  ;;  %v7156_v4 = vld [vmem:[%s8343_s4] sm:$0x1f]  ;;  %v3607_v5 = vor.u32 %v5200_v52, %v3606_v48 }
 0x11c   :  { %v5420_v48 = vld [vmem:[%s8341_s3 + $0x700] sm:$0xf0] }
 0x11d   :  { %2210 = vmatpush.bf16.msra.mxu3 %v4423_v8  ;;  %2243 = vmatpush.bf16.msrb.mxu0 %v3907_v10  ;;  %v7053_v6 = vpop.f32.mrf.mxu2  ;;  %v4303_v8 = vor.u32 %v5372_v63, %v4300_v0  ;;  %v3667_v10 = vor.u32 %v5215_v3, %v3666_v2  ;;  %v1877_v11 = vpop.f32.mrf.mxu3  ;;  %v4386_v2 = vld [vmem:[%s8341_s3 + $0x628] sm:$0xf]  ;;  %v5395_v3 = vld [vmem:[%s8341_s3 + $0x638] sm:$0xf0] }
 0x11e   :  { %v5320_v11 = vld [vmem:[%s8341_s3 + $0x3e0] sm:$0xf0] }
 0x11f   :  { %2192 = vmatpush.bf16.msra.mxu1 %v4363_v28  ;;  %2231 = vmatpush.bf16.msra.mxu2 %v3727_v32  ;;  %v1903_v19 = vpop.f32.mrf.mxu1  ;;  %v3786_v28 = vld [vmem:[%s8341_s3 + $0x178] sm:$0xf]  ;;  %v5362_v32 = vld [vmem:[%s8341_s3 + $0x534] sm:$0xf] }
 0x120   :  { %v5310_v19 = vld [vmem:[%s8341_s3 + $0x390] sm:$0xf0] }
 0x121   :  { %2211 = vmatpush.bf16.msra.mxu3 %v4403_v26  ;;  %2244 = vmatpush.bf16.msrb.mxu0 %v3887_v27  ;;  %v7081_v24 = vpop.f32.mrf.mxu0  ;;  %v3807_v26 = vor.u32 %v5250_v12, %v3806_v9  ;;  %v4283_v27 = vor.u32 %v5367_v13, %v4280_v16  ;;  %v4107_v9 = vor.u32 %v5325_v60, %v4106_v57  ;;  %v4526_v12 = vld [vmem:[%s8341_s3 + $0x740] sm:$0xf]  ;;  %v5430_v13 = vld [vmem:[%s8341_s3 + $0x750] sm:$0xf0]  ;;  %v4006_v57 = vld [vmem:[%s8341_s3 + $0x330] sm:$0xf] }
 0x122   :  { %v4387_v16 = vor.u32 %v5395_v3, %v4386_v2  ;;  %v5380_v60 = vld [vmem:[%s8341_s3 + $0x5c0] sm:$0xf0] }
 0x123   :  { %2193 = vmatpush.bf16.msra.mxu1 %v4343_v39  ;;  %2232 = vmatpush.bf16.msra.mxu2 %v3707_v43  ;;  %v5240_v43 = vld [vmem:[%s8341_s3 + $0x160] sm:$0xf0] }
 0x124   :  { %2212 = vmatmul.bf16.vlgmr.msra.gmra.mxu3 %v6208_v30  ;;  %4591 = vmatmul.msk.bf16.vlgmr.msra.gmra.mxu0 %vm1862_vm2, %v6251_v18  ;;  %v3767_v0 = vor.u32 %v5240_v43, %v3766_v42  ;;  %v4691_v42 = vld [vmem:[%s8344_s5 + $0xc0] sm:$0xf]  ;;  %v5472_v43 = vld [vmem:[%s8344_s5 + $0xcc] sm:$0xf0] }
 0x125   :  { %2269 = vmatpush.bf16.msrb.mxu3 %v4227_v33  ;;  %2245 = vmatpush.bf16.msrb.mxu0 %v3867_v41  ;;  %v4260_v33 = vld [vmem:[%s8341_s3 + $0x544] sm:$0xf0]  ;;  %v1916_v40 = vpop.f32.mrf.mxu2  ;;  %v3787_v41 = vor.u32 %v5245_v31, %v3786_v28  ;;  %v552_v28 = vperm.slane %v7156_v4, 0 }
 0x126   :  { %v4263_v39 = vor.u32 %v5362_v32, %v4260_v33  ;;  %v5305_v40 = vld [vmem:[%s8341_s3 + $0x368] sm:$0xf0] }
 0x127   :  { %2194 = vmatpush.bf16.msra.mxu1 %v4323_v59  ;;  %2233 = vmatpush.bf16.msra.mxu2 %v3687_v61  ;;  %v7125_v55 = vpop.f32.mrf.mxu3  ;;  %v7127_v56 = vpop.f32.mrf.mxu1  ;;  %v5435_v59 = vld [vmem:[%s8341_s3 + $0x778] sm:$0xf0]  ;;  %v4066_v61 = vld [vmem:[%s8341_s3 + $0x3a8] sm:$0xf] }
 0x129   :  { %2270 = vmatpush.bf16.msrb.mxu3 %v4207_v44  ;;  %2246 = vmatpush.bf16.msrb.mxu0 %v3847_v58  ;;  %v5357_v44 = vld [vmem:[%s8341_s3 + $0x50c] sm:$0xf]  ;;  %v4546_v58 = vld [vmem:[%s8341_s3 + $0x768] sm:$0xf]  ;;  %v1942_v63 = vpop.f32.mrf.mxu0 }
 0x12b   :  { %2195 = vmatpush.bf16.msra.mxu1 %v4303_v8  ;;  %2234 = vmatpush.bf16.msra.mxu2 %v3667_v10  ;;  %v4086_v8 = vld [vmem:[%s8341_s3 + $0x3d0] sm:$0xf]  ;;  %v4067_v10 = vor.u32 %v5315_v62, %v4066_v61  ;;  %v4675_v61 = vld [vmem:[%s8344_s5 + $0xa0] sm:$0xf] }
 0x12c   :  { %v5468_v62 = vld [vmem:[%s8344_s5 + $0xac] sm:$0xf0] }
 0x12d   :  { %2271 = vmatpush.bf16.msrb.mxu3 %v4187_v1  ;;  %2247 = vmatpush.bf16.msrb.mxu0 %v3827_v7  ;;  %v4243_v1 = vor.u32 %v5357_v44, %v4240_v47  ;;  %v4547_v7 = vor.u32 %v5435_v59, %v4546_v58  ;;  %v7179_v21 = vpop.f32.mrf.mxu2  ;;  %v4486_v47 = vld [vmem:[%s8341_s3 + $0x6f0] sm:$0xf] }
 0x12e   :  { %v4326_v58 = vld [vmem:[%s8341_s3 + $0x5b0] sm:$0xf]  ;;  %v4487_v63 = vor.u32 %v5420_v48, %v4486_v47  ;;  %v5365_v47 = vld [vmem:[%s8341_s3 + $0x548] sm:$0xf0]  ;;  %v4627_v48 = vld [vmem:[%s8344_s5 + $0x40] sm:$0xf] }
 0x12f   :  { %2196 = vmatpush.bf16.msra.mxu1 %v4283_v27  ;;  %2235 = vmatpush.bf16.msra.mxu2 %v3647_v29  ;;  %v4527_v27 = vor.u32 %v5430_v13, %v4526_v12  ;;  %v4087_v29 = vor.u32 %v5320_v11, %v4086_v8  ;;  %v1929_v31 = vpop.f32.mrf.mxu3  ;;  %v1955_v32 = vpop.f32.mrf.mxu1  ;;  %v4676_v8 = vor.u32 %v5468_v62, %v4675_v61  ;;  %v5375_v12 = vld [vmem:[%s8341_s3 + $0x598] sm:$0xf0]  ;;  %v4659_v13 = vld [vmem:[%s8344_s5 + $0x80] sm:$0xf]  ;;  %v5280_v61 = vld [vmem:[%s8341_s3 + $0x2a0] sm:$0xf0] }
 0x130   :  { %v5370_v31 = vld [vmem:[%s8341_s3 + $0x570] sm:$0xf0]  ;;  %v4643_v32 = vld [vmem:[%s8344_s5 + $0x60] sm:$0xf]  ;;  %v4246_v62 = vld [vmem:[%s8341_s3 + $0x510] sm:$0xf] }
 0x131   :  { %2272 = vmatpush.bf16.msrb.mxu3 %v4167_v17  ;;  %2248 = vmatpush.bf16.msrb.mxu0 %v3807_v26  ;;  %v4046_v17 = vld [vmem:[%s8341_s3 + $0x380] sm:$0xf]  ;;  %v5476_v26 = vld [vmem:[%s8344_s5 + $0xec] sm:$0xf0] }
 0x132   :  { %v4047_v33 = vor.u32 %v5310_v19, %v4046_v17  ;;  %v4708_v37 = vor.u32 %v5476_v26, %v4707_v23  ;;  %v5410_v23 = vld [vmem:[%s8341_s3 + $0x6b0] sm:$0xf0] }
 0x133   :  { %2197 = vmatpush.bf16.msra.mxu1 %v4263_v39  ;;  %2236 = vmatpush.bf16.msra.mxu2 %v3627_v46  ;;  %v7209_v39 = vpop.f32.mrf.mxu0  ;;  %v1876_v46 = vadd.f32 %v7003_v45, %v552_v28  ;;  %v5300_v45 = vld [vmem:[%s8341_s3 + $0x340] sm:$0xf0]  ;;  %v3966_v28 = vld [vmem:[%s8341_s3 + $0x2e0] sm:$0xf] }
 0x134   :  { %v4007_v3 = vor.u32 %v5300_v45, %v4006_v57  ;;  %v5400_v45 = vld [vmem:[%s8341_s3 + $0x660] sm:$0xf0] }
 0x135   :  { %2273 = vmatpush.bf16.msrb.mxu3 %v4147_v34  ;;  %2249 = vmatpush.bf16.msrb.mxu0 %v3787_v41  ;;  %v4506_v34 = vld [vmem:[%s8341_s3 + $0x718] sm:$0xf]  ;;  %v1968_v59 = vpop.f32.mrf.mxu2 }
 0x136   :  { %v4346_v41 = vld [vmem:[%s8341_s3 + $0x5d8] sm:$0xf]  ;;  %v4507_v44 = vor.u32 %v5425_v35, %v4506_v34  ;;  %v4447_v35 = vor.u32 %v5410_v23, %v4446_v22  ;;  %v5448_v22 = vld [vmem:[%s8344_s5 + $0xc] sm:$0xf0] }
 0x137   :  { %2198 = vmatpush.bf16.msra.mxu1 %v4243_v1  ;;  %2237 = vmatpush.bf16.msra.mxu2 %v3607_v5  ;;  %v7247_v1 = vpop.f32.mrf.mxu1  ;;  %v7249_v2 = vpop.f32.mrf.mxu3  ;;  %v4466_v5 = vld [vmem:[%s8341_s3 + $0x6c8] sm:$0xf]  ;;  %v4566_v23 = vld [vmem:[%s8341_s3 + $0x790] sm:$0xf] }
 0x139   :  { %2274 = vmatpush.bf16.msrb.mxu3 %v4127_v54  ;;  %2250 = vmatpush.bf16.msrb.mxu0 %v3767_v0  ;;  %v4692_v54 = vor.u32 %v5472_v43, %v4691_v42  ;;  %v1889_v0 = vadd.f32 %v6972_v25, %v1876_v46  ;;  %v3986_v25 = vld [vmem:[%s8341_s3 + $0x308] sm:$0xf]  ;;  %v4266_v46 = vld [vmem:[%s8341_s3 + $0x538] sm:$0xf] }
 0x13a   :  { %2199 = vmatmul.bf16.vlgmr.msra.gmra.mxu1 %v6206_v53  ;;  %2238 = vmatmul.bf16.vlgmr.msra.gmra.mxu2 %v6101_v49  ;;  %v4027_v49 = vor.u32 %v5305_v40, %v4026_v38  ;;  %v4267_v59 = vor.u32 %v5365_v47, %v4266_v46  ;;  %v4803_v46 = vld [vmem:[%s8344_s5 + $0x1a0] sm:$0xf] }
 0x13b   :  { %2256 = vmatpush.bf16.msrb.mxu1 %v4067_v10  ;;  %2282 = vmatpush.bf16.msrb.mxu2 %v4387_v16  ;;  %v4306_v10 = vld [vmem:[%s8341_s3 + $0x588] sm:$0xf]  ;;  %v2007_v11 = vpop.f32.mrf.mxu0  ;;  %v5464_v16 = vld [vmem:[%s8344_s5 + $0x8c] sm:$0xf0]  ;;  %v1902_v19 = vadd.f32 %v7015_v51, %v1889_v0  ;;  %v5290_v51 = vld [vmem:[%s8341_s3 + $0x2f0] sm:$0xf0] }
 0x13c   :  { %2251 = vmatmul.bf16.vlgmr.msrb.gmra.mxu0 %v6103_v50  ;;  %v5385_v50 = vld [vmem:[%s8341_s3 + $0x5e8] sm:$0xf0]  ;;  %v4307_v26 = vor.u32 %v5375_v12, %v4306_v10  ;;  %v3967_v40 = vor.u32 %v5290_v51, %v3966_v28  ;;  %v4835_v28 = vld [vmem:[%s8344_s5 + $0x1e0] sm:$0xf]  ;;  %v5508_v51 = vld [vmem:[%s8344_s5 + $0x1ec] sm:$0xf0] }
 0x13d   :  { %2295 = vmatpush.bf16.msra.mxu0 %v4547_v7  ;;  %2275 = vmatpush.bf16.msrb.mxu3 %v4107_v9  ;;  %v4347_v52 = vor.u32 %v5385_v50, %v4346_v41  ;;  %v5415_v7 = vld [vmem:[%s8341_s3 + $0x6d8] sm:$0xf0]  ;;  %v7300_v34 = vpop.f32.mrf.mxu2  ;;  %v4426_v41 = vld [vmem:[%s8341_s3 + $0x678] sm:$0xf]  ;;  %v5405_v50 = vld [vmem:[%s8341_s3 + $0x688] sm:$0xf0] }
 0x13e   :  { %v5295_v9 = vld [vmem:[%s8341_s3 + $0x318] sm:$0xf0]  ;;  %v4467_v17 = vor.u32 %v5415_v7, %v4466_v5  ;;  %v5452_v5 = vld [vmem:[%s8344_s5 + $0x2c] sm:$0xf0]  ;;  %v4586_v7 = vld [vmem:[%s8341_s3 + $0x7b8] sm:$0xf] }
 0x13f   :  { %2257 = vmatpush.bf16.msrb.mxu1 %v4047_v33  ;;  %2283 = vmatpush.bf16.msrb.mxu2 %v4367_v36  ;;  %v3987_v20 = vor.u32 %v5295_v9, %v3986_v25  ;;  %v5460_v33 = vld [vmem:[%s8344_s5 + $0x6c] sm:$0xf0]  ;;  %v1915_v36 = vadd.f32 %v7053_v6, %v1902_v19  ;;  %v1994_v38 = vpop.f32.mrf.mxu3  ;;  %v3946_v6 = vld [vmem:[%s8341_s3 + $0x2b8] sm:$0xf]  ;;  %v5445_v25 = vld [vmem:[%s8341_s3 + $0x7c8] sm:$0xf0] }
 0x140   :  { %v4644_v43 = vor.u32 %v5460_v33, %v4643_v32  ;;  %v5540_v9 = vld [vmem:[%s8344_s5 + $0x2ec] sm:$0xf0]  ;;  %v553_v32 = vperm.slane %v7156_v4, 1  ;;  %v4931_v38 = vld [vmem:[%s8344_s5 + $0x2a0] sm:$0xf] }
 0x141   :  { %2296 = vmatpush.bf16.msra.mxu0 %v4527_v27  ;;  %2276 = vmatpush.bf16.msrb.mxu3 %v4087_v29  ;;  %v4660_v27 = vor.u32 %v5464_v16, %v4659_v13  ;;  %v4286_v29 = vld [vmem:[%s8341_s3 + $0x560] sm:$0xf] }
 0x142   :  { %v4287_v42 = vor.u32 %v5370_v31, %v4286_v29 }
 0x143   :  { %2258 = vmatpush.bf16.msrb.mxu1 %v4027_v49  ;;  %2284 = vmatpush.bf16.msrb.mxu2 %v4347_v52  ;;  %v1928_v49 = vadd.f32 %v7125_v55, %v1915_v36  ;;  %v5456_v52 = vld [vmem:[%s8344_s5 + $0x4c] sm:$0xf0] }
 0x144   :  { %2277 = vmatmul.bf16.vlgmr.msrb.gmra.mxu3 %v6147_v15  ;;  %v4327_v15 = vor.u32 %v5380_v60, %v4326_v58  ;;  %v4406_v55 = vld [vmem:[%s8341_s3 + $0x650] sm:$0xf]  ;;  %v4628_v60 = vor.u32 %v5456_v52, %v4627_v48 }
 0x145   :  { %3257 = vmatpush.bf16.msra.mxu3 %v4708_v37  ;;  %2297 = vmatpush.bf16.msra.mxu0 %v4507_v44  ;;  %v1981_v37 = vpop.f32.mrf.mxu1  ;;  %v5285_v44 = vld [vmem:[%s8341_s3 + $0x2c8] sm:$0xf0]  ;;  %v3926_v58 = vld [vmem:[%s8341_s3 + $0x290] sm:$0xf]  ;;  %v1941_v0 = vadd.f32 %v7081_v24, %v1928_v49  ;;  %v4963_v24 = vld [vmem:[%s8344_s5 + $0x2e0] sm:$0xf] }
 0x146   :  { %v3947_v57 = vor.u32 %v5285_v44, %v3946_v6  ;;  %v3927_v10 = vor.u32 %v5280_v61, %v3926_v58  ;;  %v4964_v19 = vor.u32 %v5540_v9, %v4963_v24  ;;  %v4836_v37 = vor.u32 %v5508_v51, %v4835_v28  ;;  %v5528_v44 = vld [vmem:[%s8344_s5 + $0x28c] sm:$0xf0]  ;;  %v4867_v9 = vld [vmem:[%s8344_s5 + $0x220] sm:$0xf] }
 0x147   :  { %2259 = vmatpush.bf16.msrb.mxu1 %v4007_v3  ;;  %2285 = vmatpush.bf16.msrb.mxu2 %v4327_v15  ;;  %v4611_v3 = vld [vmem:[%s8344_s5 + $0x20] sm:$0xf]  ;;  %v2020_v15 = vpop.f32.mrf.mxu2  ;;  %v7365_v11 = vpop.f32.mrf.mxu3  ;;  %v1954_v16 = vadd.f32 %v7127_v56, %v1941_v0  ;;  %v5484_v51 = vld [vmem:[%s8344_s5 + $0x12c] sm:$0xf0] }
 0x148   :  { %v4612_v13 = vor.u32 %v5452_v5, %v4611_v3  ;;  %v4947_v56 = vld [vmem:[%s8344_s5 + $0x2c0] sm:$0xf]  ;;  %v5492_v3 = vld [vmem:[%s8344_s5 + $0x16c] sm:$0xf0] }
 0x149   :  { %3258 = vmatpush.bf16.msra.mxu3 %v4692_v54  ;;  %2298 = vmatpush.bf16.msra.mxu0 %v4487_v63  ;;  %v4427_v54 = vor.u32 %v5405_v50, %v4426_v41  ;;  %v5360_v63 = vld [vmem:[%s8341_s3 + $0x520] sm:$0xf0]  ;;  %v2321_v31 = vmax.f32 %v1954_v16, 0.0  ;;  %v4819_v41 = vld [vmem:[%s8344_s5 + $0x1c0] sm:$0xf] }
 0x14a   :  { %v4247_v12 = vor.u32 %v5360_v63, %v4246_v62  ;;  %v4883_v62 = vld [vmem:[%s8344_s5 + $0x240] sm:$0xf]  ;;  %v5520_v63 = vld [vmem:[%s8344_s5 + $0x24c] sm:$0xf0] }
 0x14b   :  { %2260 = vmatpush.bf16.msrb.mxu1 %v3987_v20  ;;  %2286 = vmatpush.bf16.msrb.mxu2 %v4307_v26  ;;  %v4595_v20 = vld [vmem:[%s8344_s5] sm:$0xf]  ;;  %v5440_v26 = vld [vmem:[%s8341_s3 + $0x7a0] sm:$0xf0]  ;;  %v7410_v50 = vpack.c.bf16 %v2321_v31, %v2321_v31  ;;  %v4884_v15 = vor.u32 %v5520_v63, %v4883_v62  ;;  %v4837_v31 = vld [vmem:[%s8344_s5 + $0x1f0] sm:$0xf0] }
 0x14c   :  { %v4596_v29 = vor.u32 %v5448_v22, %v4595_v20  ;;  %v4567_v33 = vor.u32 %v5440_v26, %v4566_v23  ;;  %v4851_v23 = vld [vmem:[%s8344_s5 + $0x200] sm:$0xf]  ;;  %v5556_v62 = vld [vmem:[%s8344_s5 + $0x36c] sm:$0xf0] }
 0x14d   :  { %3259 = vmatpush.bf16.msra.mxu3 %v4676_v8  ;;  %2299 = vmatpush.bf16.msra.mxu0 %v4467_v17  ;;  %v4407_v8 = vor.u32 %v5400_v45, %v4406_v55  ;;  %v4587_v17 = vor.u32 %v5445_v25, %v4586_v7  ;;  %v5524_v55 = vld [vmem:[%s8344_s5 + $0x26c] sm:$0xf0]  ;;  %v4787_v45 = vld [vmem:[%s8344_s5 + $0x180] sm:$0xf] }
 0x14e   :  { %v5572_v25 = vld [vmem:[%s8344_s5 + $0x3ec] sm:$0xf0]  ;;  %v4739_v26 = vld [vmem:[%s8344_s5 + $0x120] sm:$0xf] }
 0x14f   :  { %2261 = vmatpush.bf16.msrb.mxu1 %v3967_v40  ;;  %2287 = vmatpush.bf16.msrb.mxu2 %v4287_v42  ;;  %v5532_v40 = vld [vmem:[%s8344_s5 + $0x2ac] sm:$0xf0]  ;;  %v1967_v42 = vadd.f32 %v7179_v21, %v553_v32 }
 0x150   :  { %v5500_v21 = vld [vmem:[%s8344_s5 + $0x1ac] sm:$0xf0] }
 0x151   :  { %3260 = vmatpush.bf16.msra.mxu3 %v4660_v27  ;;  %2300 = vmatpush.bf16.msra.mxu0 %v4447_v35  ;;  %v5536_v27 = vld [vmem:[%s8344_s5 + $0x2cc] sm:$0xf0]  ;;  %v7395_v36 = vpop.f32.mrf.mxu0  ;;  %v1980_v47 = vadd.f32 %v7247_v1, %v1967_v42 }
 0x152   :  { %v4948_v35 = vor.u32 %v5536_v27, %v4947_v56  ;;  %v5496_v1 = vld [vmem:[%s8344_s5 + $0x18c] sm:$0xf0] }
 0x153   :  { %2262 = vmatpush.bf16.msrb.mxu1 %v3947_v57  ;;  %2288 = vmatpush.bf16.msrb.mxu2 %v4267_v59  ;;  %v4899_v57 = vld [vmem:[%s8344_s5 + $0x260] sm:$0xf]  ;;  %v1993_v58 = vadd.f32 %v7249_v2, %v1980_v47  ;;  %v4788_v61 = vor.u32 %v5496_v1, %v4787_v45  ;;  %v5480_v42 = vld [vmem:[%s8344_s5 + $0x10c] sm:$0xf0]  ;;  %v4805_v45 = vld [vmem:[%s8344_s5 + $0x1b0] sm:$0xf0] }
 0x154   :  { %v4900_v59 = vor.u32 %v5524_v55, %v4899_v57  ;;  %v4771_v2 = vld [vmem:[%s8344_s5 + $0x160] sm:$0xf]  ;;  %v5498_v55 = vld [vmem:[%s8344_s5 + $0x1a4] sm:$0xf] }
 0x155   :  { %3261 = vmatpush.bf16.msra.mxu3 %v4644_v43  ;;  %2301 = vmatpush.bf16.msra.mxu0 %v4427_v54  ;;  %v4932_v43 = vor.u32 %v5532_v40, %v4931_v38  ;;  %v4804_v54 = vor.u32 %v5500_v21, %v4803_v46  ;;  %v2006_v7 = vadd.f32 %v7209_v39, %v1993_v58  ;;  %v5516_v39 = vld [vmem:[%s8344_s5 + $0x22c] sm:$0xf0]  ;;  %v5470_v58 = vld [vmem:[%s8344_s5 + $0xc4] sm:$0xf] }
 0x156   :  { %v4772_v24 = vor.u32 %v5492_v3, %v4771_v2  ;;  %v4740_v38 = vor.u32 %v5484_v51, %v4739_v26  ;;  %v5560_v46 = vld [vmem:[%s8344_s5 + $0x38c] sm:$0xf0]  ;;  %v4808_v63 = vor.u32 %v5498_v55, %v4805_v45  ;;  %v5486_v51 = vld [vmem:[%s8344_s5 + $0x144] sm:$0xf] }
 0x157   :  { %2263 = vmatpush.bf16.msrb.mxu1 %v3927_v10  ;;  %2289 = vmatpush.bf16.msrb.mxu2 %v4247_v12  ;;  %v2031_v49 = vpop.f32.mrf.mxu1  ;;  %v4755_v12 = vld [vmem:[%s8344_s5 + $0x140] sm:$0xf]  ;;  %v2019_v16 = vadd.f32 %v7300_v34, %v2006_v7  ;;  %v5512_v34 = vld [vmem:[%s8344_s5 + $0x20c] sm:$0xf0]  ;;  %v4789_v7 = vld [vmem:[%s8344_s5 + $0x190] sm:$0xf0] }
 0x158   :  { %v4852_v32 = vor.u32 %v5512_v34, %v4851_v23  ;;  %v4995_v23 = vld [vmem:[%s8344_s5 + $0x320] sm:$0xf]  ;;  %v5548_v34 = vld [vmem:[%s8344_s5 + $0x32c] sm:$0xf0]  ;;  %v5478_v45 = vld [vmem:[%s8344_s5 + $0x104] sm:$0xf] }
 0x159   :  { %3262 = vmatpush.bf16.msra.mxu3 %v4628_v60  ;;  %2302 = vmatpush.bf16.msra.mxu0 %v4407_v8  ;;  %v2059_v52 = vpop.f32.mrf.mxu0  ;;  %v5091_v8 = vld [vmem:[%s8344_s5 + $0x3e0] sm:$0xf]  ;;  %v2032_v27 = vadd.f32 %v2031_v49, %v2019_v16 }
 0x15a   :  { %2264 = vmatmul.bf16.vlgmr.msrb.gmra.mxu1 %v6145_v14  ;;  %2290 = vmatmul.bf16.vlgmr.msrb.gmra.mxu2 %v6206_v53  ;;  %v5504_v14 = vld [vmem:[%s8344_s5 + $0x1cc] sm:$0xf0]  ;;  %v4915_v53 = vld [vmem:[%s8344_s5 + $0x280] sm:$0xf]  ;;  %v5092_v10 = vor.u32 %v5572_v25, %v5091_v8  ;;  %v4677_v8 = vld [vmem:[%s8344_s5 + $0xb0] sm:$0xf0] }
 0x15b   :  { %2314 = vmatpush.bf16.msra.mxu1 %v4587_v17  ;;  %3283 = vmatpush.bf16.msra.mxu2 %v4964_v19  ;;  %v4820_v6 = vor.u32 %v5504_v14, %v4819_v41  ;;  %v4916_v48 = vor.u32 %v5528_v44, %v4915_v53  ;;  %v4868_v17 = vor.u32 %v5516_v39, %v4867_v9  ;;  %v5075_v19 = vld [vmem:[%s8344_s5 + $0x3c0] sm:$0xf]  ;;  %v5474_v53 = vld [vmem:[%s8344_s5 + $0xe4] sm:$0xf]  ;;  %v5552_v9 = vld [vmem:[%s8344_s5 + $0x34c] sm:$0xf0] }
 0x15c   :  { %2303 = vmatmul.bf16.vlgmr.msra.gmra.mxu0 %v6208_v30  ;;  %v2046_v30 = vpop.f32.mrf.mxu3  ;;  %v4723_v41 = vld [vmem:[%s8344_s5 + $0x100] sm:$0xf] }
 0x15d   :  { %3263 = vmatpush.bf16.msra.mxu3 %v4612_v13  ;;  %v7448_v0 = vpop.f32.mrf.mxu2  ;;  %v5488_v13 = vld [vmem:[%s8344_s5 + $0x14c] sm:$0xf0]  ;;  %3296 = vmatpush.bf16.msrb.mxu0 %v5092_v10  ;;  %v2045_v30 = vadd.f32 %v7365_v11, %v2032_v27  ;;  %v4709_v11 = vld [vmem:[%s8344_s5 + $0xf0] sm:$0xf0]  ;;  %v5043_v44 = vld [vmem:[%s8344_s5 + $0x380] sm:$0xf]  ;;  %v4724_v21 = vor.u32 %v5480_v42, %v4723_v41 }
 0x15e   :  { %v4756_v22 = vor.u32 %v5488_v13, %v4755_v12  ;;  %v5044_v47 = vor.u32 %v5560_v46, %v5043_v44  ;;  %v4712_v57 = vor.u32 %v5474_v53, %v4709_v11  ;;  %v5093_v42 = vld [vmem:[%s8344_s5 + $0x3f0] sm:$0xf0]  ;;  %v5482_v53 = vld [vmem:[%s8344_s5 + $0x124] sm:$0xf] }
 0x15f   :  { %2315 = vmatpush.bf16.msra.mxu1 %v4567_v33  ;;  %3284 = vmatpush.bf16.msra.mxu2 %v4948_v35  ;;  %v2033_v5 = vpop.f32.mrf.mxu1  ;;  %v5059_v33 = vld [vmem:[%s8344_s5 + $0x3a0] sm:$0xf]  ;;  %v5564_v35 = vld [vmem:[%s8344_s5 + $0x3ac] sm:$0xf0]  ;;  %v2322_v52 = vmax.f32 %v2045_v30, 0.0 }
 0x160   :  { %v5060_v14 = vor.u32 %v5564_v35, %v5059_v33  ;;  %v4645_v33 = vld [vmem:[%s8344_s5 + $0x70] sm:$0xf0]  ;;  %v5570_v30 = vld [vmem:[%s8344_s5 + $0x3e4] sm:$0xf] }
 0x161   :  { %3264 = vmatpush.bf16.msra.mxu3 %v4596_v29  ;;  %v5506_v29 = vld [vmem:[%s8344_s5 + $0x1e4] sm:$0xf]  ;;  %v7556_v3 = vpack.c.bf16 %v2322_v52, %v2322_v52  ;;  %v4741_v11 = vld [vmem:[%s8344_s5 + $0x130] sm:$0xf0]  ;;  %v5096_v44 = vor.u32 %v5570_v30, %v5093_v42 }
 0x162   :  { %v4840_v40 = vor.u32 %v5506_v29, %v4837_v31  ;;  %v4757_v29 = vld [vmem:[%s8344_s5 + $0x150] sm:$0xf0]  ;;  %v5454_v46 = vld [vmem:[%s8344_s5 + $0x44] sm:$0xf] }
 0x163   :  { %3270 = vmatpush.bf16.msrb.mxu1 %v4836_v37  ;;  %3285 = vmatpush.bf16.msra.mxu2 %v4932_v43  ;;  %v554_v37 = vperm.slane %v7156_v4, 2  ;;  %v5502_v43 = vld [vmem:[%s8344_s5 + $0x1c4] sm:$0xf]  ;;  %v4760_v41 = vor.u32 %v5486_v51, %v4757_v29 }
 0x164   :  { %3265 = vmatmul.bf16.vlgmr.msra.gmra.mxu3 %v7410_v50  ;;  %v7440_v60 = vpop.f32.mrf.mxu3  ;;  %v5566_v52 = vld [vmem:[%s8344_s5 + $0x3c4] sm:$0xf] }
 0x165   :  { %v2072_v28 = vpop.f32.mrf.mxu2 }
 0x167   :  { %3271 = vmatpush.bf16.msrb.mxu1 %v4820_v6  ;;  %3286 = vmatpush.bf16.msra.mxu2 %v4916_v48  ;;  %v4821_v6 = vld [vmem:[%s8344_s5 + $0x1d0] sm:$0xf0]  ;;  %v2058_v48 = vadd.f32 %v7395_v36, %v554_v37  ;;  %v4979_v37 = vld [vmem:[%s8344_s5 + $0x300] sm:$0xf] }
 0x168   :  { %v4824_v49 = vor.u32 %v5502_v43, %v4821_v6  ;;  %v4693_v36 = vld [vmem:[%s8344_s5 + $0xd0] sm:$0xf0] }
 0x169   :  { %v4696_v5 = vor.u32 %v5470_v58, %v4693_v36  ;;  %v5450_v58 = vld [vmem:[%s8344_s5 + $0x24] sm:$0xf] }
 0x16a   :  { %4592 = vmatmul.msk.bf16.vlgmr.msra.gmra.mxu1 %vm1862_vm2, %v6251_v18  ;;  %v5568_v18 = vld [vmem:[%s8344_s5 + $0x3cc] sm:$0xf0] }
 0x16b   :  { %3272 = vmatpush.bf16.msrb.mxu1 %v4804_v54  ;;  %3287 = vmatpush.bf16.msra.mxu2 %v4900_v59  ;;  %v5076_v56 = vor.u32 %v5568_v18, %v5075_v19  ;;  %v2071_v59 = vadd.f32 %v7448_v0, %v2058_v48  ;;  %v5494_v0 = vld [vmem:[%s8344_s5 + $0x184] sm:$0xf]  ;;  %v4773_v19 = vld [vmem:[%s8344_s5 + $0x170] sm:$0xf0]  ;;  %v4744_v48 = vor.u32 %v5482_v53, %v4741_v11  ;;  %v5592_v53 = vld [vmem:[%s8344_s5 + $0x48c] sm:$0xf0] }
 0x16c   :  { %v2085_v20 = vpop.f32.mrf.mxu3  ;;  %v4792_v10 = vor.u32 %v5494_v0, %v4789_v7  ;;  %v5061_v0 = vld [vmem:[%s8344_s5 + $0x3b0] sm:$0xf0]  ;;  %v5546_v11 = vld [vmem:[%s8344_s5 + $0x324] sm:$0xf] }
 0x16d   :  { %3297 = vmatpush.bf16.msrb.mxu0 %v5076_v56  ;;  %v2084_v25 = vadd.f32 %v7440_v60, %v2071_v59  ;;  %v5490_v60 = vld [vmem:[%s8344_s5 + $0x164] sm:$0xf]  ;;  %v4996_v56 = vor.u32 %v5548_v34, %v4995_v23 }
 0x16e   :  { %v5462_v20 = vld [vmem:[%s8344_s5 + $0x84] sm:$0xf]  ;;  %v4776_v26 = vor.u32 %v5490_v60, %v4773_v19 }
 0x16f   :  { %3273 = vmatpush.bf16.msrb.mxu1 %v4788_v61  ;;  %3288 = vmatpush.bf16.msra.mxu2 %v4884_v15  ;;  %v5027_v61 = vld [vmem:[%s8344_s5 + $0x360] sm:$0xf]  ;;  %v5466_v15 = vld [vmem:[%s8344_s5 + $0xa4] sm:$0xf] }
 0x170   :  { %v5028_v2 = vor.u32 %v5556_v62, %v5027_v61  ;;  %v4613_v61 = vld [vmem:[%s8344_s5 + $0x30] sm:$0xf0]  ;;  %v4715_v62 = vld [vmem:[%s8344_s5 + $0xe8] sm:$0xf] }
 0x171   :  { %3298 = vmatpush.bf16.msrb.mxu0 %v5060_v14  ;;  %v2109_v1 = vpop.f32.mrf.mxu0  ;;  %v4616_v7 = vor.u32 %v5450_v58, %v4613_v61  ;;  %v5155_v58 = vld [vmem:[%s8344_s5 + $0x460] sm:$0xf] }
 0x173   :  { %3274 = vmatpush.bf16.msrb.mxu1 %v4772_v24  ;;  %3289 = vmatpush.bf16.msra.mxu2 %v4868_v17  ;;  %v5011_v24 = vld [vmem:[%s8344_s5 + $0x340] sm:$0xf]  ;;  %v4680_v17 = vor.u32 %v5466_v15, %v4677_v8  ;;  %v5446_v8 = vld [vmem:[%s8344_s5 + $0x4] sm:$0xf] }
 0x174   :  { %v7535_v54 = vpop.f32.mrf.mxu3  ;;  %v5012_v12 = vor.u32 %v5552_v9, %v5011_v24  ;;  %v4597_v24 = vld [vmem:[%s8344_s5 + $0x10] sm:$0xf0]  ;;  %v4699_v9 = vld [vmem:[%s8344_s5 + $0xc8] sm:$0xf] }
 0x175   :  { %3299 = vmatpush.bf16.msrb.mxu0 %v5044_v47 }
 0x177   :  { %3275 = vmatpush.bf16.msrb.mxu1 %v4756_v22  ;;  %3290 = vmatpush.bf16.msra.mxu2 %v4852_v32  ;;  %v2096_v39 = vpop.f32.mrf.mxu1  ;;  %v4661_v22 = vld [vmem:[%s8344_s5 + $0x90] sm:$0xf0]  ;;  %v5458_v32 = vld [vmem:[%s8344_s5 + $0x64] sm:$0xf] }
 0x178   :  { %v2097_v13 = vadd.f32 %v2096_v39, %v2084_v25  ;;  %v4664_v28 = vor.u32 %v5462_v20, %v4661_v22  ;;  %v4648_v6 = vor.u32 %v5458_v32, %v4645_v33  ;;  %v5473_v39 = vld [vmem:[%s8344_s5 + $0xd4] sm:$0xf0]  ;;  %v4683_v20 = vld [vmem:[%s8344_s5 + $0xa8] sm:$0xf]  ;;  %v5550_v32 = vld [vmem:[%s8344_s5 + $0x344] sm:$0xf] }
 0x179   :  { %3300 = vmatpush.bf16.msrb.mxu0 %v5028_v2  ;;  %v2111_v18 = vpop.f32.mrf.mxu0  ;;  %v4700_v60 = vor.u32 %v5473_v39, %v4699_v9  ;;  %v5469_v22 = vld [vmem:[%s8344_s5 + $0xb4] sm:$0xf0]  ;;  %v5013_v33 = vld [vmem:[%s8344_s5 + $0x350] sm:$0xf0]  ;;  %v5139_v39 = vld [vmem:[%s8344_s5 + $0x440] sm:$0xf] }
 0x17a   :  { %v2110_v27 = vadd.f32 %v2109_v1, %v2097_v13  ;;  %v4725_v1 = vld [vmem:[%s8344_s5 + $0x110] sm:$0xf0] }
 0x17b   :  { %3276 = vmatpush.bf16.msrb.mxu1 %v4740_v38  ;;  %3335 = vmatpush.bf16.msrb.mxu2 %v4840_v40  ;;  %v5544_v38 = vld [vmem:[%s8344_s5 + $0x30c] sm:$0xf0]  ;;  %v4728_v2 = vor.u32 %v5478_v45, %v4725_v1  ;;  %v5045_v13 = vld [vmem:[%s8344_s5 + $0x390] sm:$0xf0] }
 0x17c   :  { %v2137_v16 = vpop.f32.mrf.mxu3  ;;  %v4980_v14 = vor.u32 %v5544_v38, %v4979_v37  ;;  %v5029_v18 = vld [vmem:[%s8344_s5 + $0x370] sm:$0xf0]  ;;  %v5016_v38 = vor.u32 %v5550_v32, %v5013_v33 }
 0x17d   :  { %3301 = vmatpush.bf16.msrb.mxu0 %v5012_v12  ;;  %v2122_v31 = vpop.f32.mrf.mxu2  ;;  %v5558_v12 = vld [vmem:[%s8344_s5 + $0x384] sm:$0xf] }
 0x17e   :  { %v2123_v35 = vadd.f32 %v2122_v31, %v2110_v27  ;;  %v5554_v16 = vld [vmem:[%s8344_s5 + $0x364] sm:$0xf]  ;;  %v5048_v19 = vor.u32 %v5558_v12, %v5045_v13  ;;  %v4667_v27 = vld [vmem:[%s8344_s5 + $0x88] sm:$0xf] }
 0x17f   :  { %3277 = vmatpush.bf16.msrb.mxu1 %v4724_v21  ;;  %3336 = vmatpush.bf16.msrb.mxu2 %v4824_v49  ;;  %v2098_v40 = vpop.f32.mrf.mxu1  ;;  %v4629_v21 = vld [vmem:[%s8344_s5 + $0x50] sm:$0xf0]  ;;  %v5032_v23 = vor.u32 %v5554_v16, %v5029_v18  ;;  %v4603_v18 = vld [vmem:[%s8344_s5 + $0x8] sm:$0xf] }
 0x180   :  { %v2136_v43 = vadd.f32 %v7535_v54, %v2123_v35  ;;  %v5077_v54 = vld [vmem:[%s8344_s5 + $0x3d0] sm:$0xf0]  ;;  %v4632_v55 = vor.u32 %v5454_v46, %v4629_v21 }
 0x181   :  { %3302 = vmatpush.bf16.msrb.mxu0 %v4996_v56  ;;  %v5080_v36 = vor.u32 %v5566_v52, %v5077_v54  ;;  %v2479_v56 = vld [vmem:[%s8344_s5 + $0x4a0] sm:$0xff]  ;;  %v4997_v21 = vld [vmem:[%s8344_s5 + $0x330] sm:$0xf0]  ;;  %v4635_v52 = vld [vmem:[%s8344_s5 + $0x48] sm:$0xf] }
 0x182   :  { %3278 = vmatmul.bf16.vlgmr.msrb.gmra.mxu1 %v7556_v3  ;;  %v2323_v49 = vmax.f32 %v2136_v43, 0.0  ;;  %v2937_v51 = vunpack.c.l.b16 %v2479_v56  ;;  %v2938_v29 = vunpack.c.h.b16 %v2479_v56  ;;  %v5457_v54 = vld [vmem:[%s8344_s5 + $0x54] sm:$0xf0] }
 0x183   :  { %3322 = vmatpush.bf16.msra.mxu1 %v4712_v57  ;;  %3337 = vmatpush.bf16.msrb.mxu2 %v4808_v63  ;;  %v5477_v63 = vld [vmem:[%s8344_s5 + $0xf4] sm:$0xf0] }
 0x184   :  { %v7641_v57 = vpack.c.bf16 %v2323_v49, %v2323_v49  ;;  %v4716_v15 = vor.u32 %v5477_v63, %v4715_v62  ;;  %v3089_v31 = vpack.c.b16 %v2937_v51, %v2937_v51  ;;  %v3090_v40 = vpack.c.b16 %v2938_v29, %v2938_v29  ;;  %v5590_v49 = vld [vmem:[%s8344_s5 + $0x484] sm:$0xf] }
 0x185   :  { %3303 = vmatpush.bf16.msrb.mxu0 %v4980_v14  ;;  %v2124_v59 = vpop.f32.mrf.mxu2  ;;  %v5461_v14 = vld [vmem:[%s8344_s5 + $0x74] sm:$0xf0]  ;;  %v4636_v62 = vor.u32 %v5457_v54, %v4635_v52  ;;  %v5163_v54 = vld [vmem:[%s8344_s5 + $0x468] sm:$0xf] }
 0x186   :  { %3291 = vmatmul.bf16.vlgmr.msra.gmra.mxu2 %v7641_v57  ;;  %v3246_v30 = vsel %vm123_vm0, %v3089_v31, 0  ;;  %v3249_v42 = vsel %vm123_vm0, %v3090_v40, 0  ;;  %v5542_v59 = vld [vmem:[%s8344_s5 + $0x304] sm:$0xf]  ;;  %v5593_v40 = vld [vmem:[%s8344_s5 + $0x494] sm:$0xf0] }
 0x187   :  { %3323 = vmatpush.bf16.msra.mxu1 %v4696_v5  ;;  %3338 = vmatpush.bf16.msrb.mxu2 %v4792_v10  ;;  %v7633_v47 = vpop.f32.mrf.mxu3  ;;  %v5562_v5 = vld [vmem:[%s8344_s5 + $0x3a4] sm:$0xf]  ;;  %v5573_v52 = vld [vmem:[%s8344_s5 + $0x3f4] sm:$0xf0] }
 0x188   :  { %v5064_v25 = vor.u32 %v5562_v5, %v5061_v0  ;;  %3311 = vmatpush.bf16.msrb.mxu3 %v3246_v30  ;;  %v5586_v5 = vld [vmem:[%s8344_s5 + $0x464] sm:$0xf]  ;;  %v5157_v0 = vld [vmem:[%s8344_s5 + $0x470] sm:$0xf0] }
 0x189   :  { %3361 = vmatpush.bf16.msra.mxu0 %v5096_v44  ;;  %v5578_v31 = vld [vmem:[%s8344_s5 + $0x424] sm:$0xf] }
 0x18a   :  { %v5538_v30 = vld [vmem:[%s8344_s5 + $0x2e4] sm:$0xf] }
 0x18b   :  { %3324 = vmatpush.bf16.msra.mxu1 %v4680_v17  ;;  %3339 = vmatpush.bf16.msrb.mxu2 %v4776_v26  ;;  %v4600_v17 = vor.u32 %v5446_v8, %v4597_v24  ;;  %v4684_v26 = vor.u32 %v5469_v22, %v4683_v20  ;;  %v7780_v24 = vld [vmem:[%s8344_s5 + $0x4a8] sm:$0xff]  ;;  %v5449_v20 = vld [vmem:[%s8344_s5 + $0x14] sm:$0xf0] }
 0x18c   :  { %v2939_v12 = vunpack.c.l.b16 %v7780_v24  ;;  %v4604_v51 = vor.u32 %v5449_v20, %v4603_v18  ;;  %v5526_v20 = vld [vmem:[%s8344_s5 + $0x284] sm:$0xf] }
 0x18d   :  { %3362 = vmatpush.bf16.msra.mxu0 %v5080_v36  ;;  %v5588_v36 = vld [vmem:[%s8344_s5 + $0x46c] sm:$0xf0] }
 0x18e   :  { %v5156_v63 = vor.u32 %v5588_v36, %v5155_v58  ;;  %v4949_v58 = vld [vmem:[%s8344_s5 + $0x2d0] sm:$0xf0] }
 0x18f   :  { %3325 = vmatpush.bf16.msra.mxu1 %v4664_v28  ;;  %3340 = vmatpush.bf16.msrb.mxu2 %v4760_v41  ;;  %v2163_v10 = vpop.f32.mrf.mxu3  ;;  %v5465_v28 = vld [vmem:[%s8344_s5 + $0x94] sm:$0xf0]  ;;  %v4651_v41 = vld [vmem:[%s8344_s5 + $0x68] sm:$0xf] }
 0x190   :  { %v4668_v37 = vor.u32 %v5465_v28, %v4667_v27  ;;  %v4652_v44 = vor.u32 %v5461_v14, %v4651_v41  ;;  %v5584_v10 = vld [vmem:[%s8344_s5 + $0x44c] sm:$0xf0]  ;;  %v5123_v27 = vld [vmem:[%s8344_s5 + $0x420] sm:$0xf] }
 0x191   :  { %3363 = vmatpush.bf16.msra.mxu0 %v5064_v25  ;;  %v7698_v34 = vpop.f32.mrf.mxu0  ;;  %v5160_v25 = vor.u32 %v5586_v5, %v5157_v0  ;;  %v5580_v28 = vld [vmem:[%s8344_s5 + $0x42c] sm:$0xf0]  ;;  %v5107_v14 = vld [vmem:[%s8344_s5 + $0x400] sm:$0xf]  ;;  %v5147_v5 = vld [vmem:[%s8344_s5 + $0x448] sm:$0xf] }
 0x192   :  { %v5124_v29 = vor.u32 %v5580_v28, %v5123_v27  ;;  %v5585_v0 = vld [vmem:[%s8344_s5 + $0x454] sm:$0xf0] }
 0x193   :  { %3326 = vmatpush.bf16.msra.mxu1 %v4648_v6  ;;  %3341 = vmatpush.bf16.msrb.mxu2 %v4744_v48  ;;  %v5171_v6 = vld [vmem:[%s8344_s5 + $0x480] sm:$0xf]  ;;  %v5173_v48 = vld [vmem:[%s8344_s5 + $0x490] sm:$0xf0] }
 0x194   :  { %v5172_v46 = vor.u32 %v5592_v53, %v5171_v6  ;;  %v5176_v45 = vor.u32 %v5590_v49, %v5173_v48  ;;  %v4965_v6 = vld [vmem:[%s8344_s5 + $0x2f0] sm:$0xf0]  ;;  %v5574_v53 = vld [vmem:[%s8344_s5 + $0x404] sm:$0xf]  ;;  %v5099_v49 = vld [vmem:[%s8344_s5 + $0x3e8] sm:$0xf] }
 0x195   :  { %3364 = vmatpush.bf16.msra.mxu0 %v5048_v19  ;;  %v5141_v19 = vld [vmem:[%s8344_s5 + $0x450] sm:$0xf0] }
 0x196   :  { %3312 = vmatpush.bf16.msrb.mxu3 %v5172_v46  ;;  %v4968_v46 = vor.u32 %v5538_v30, %v4965_v6 }
 0x197   :  { %3327 = vmatpush.bf16.msra.mxu1 %v4632_v55  ;;  %3342 = vmatpush.bf16.msrb.mxu2 %v4728_v2  ;;  %v7716_v35 = vpop.f32.mrf.mxu1  ;;  %v5000_v55 = vor.u32 %v5546_v11, %v4997_v21  ;;  %v4981_v2 = vld [vmem:[%s8344_s5 + $0x310] sm:$0xf0] }
 0x198   :  { %v4984_v8 = vor.u32 %v5542_v59, %v4981_v2  ;;  %v5109_v11 = vld [vmem:[%s8344_s5 + $0x410] sm:$0xf0] }
 0x199   :  { %3365 = vmatpush.bf16.msra.mxu0 %v5032_v23  ;;  %v2176_v43 = vpop.f32.mrf.mxu0  ;;  %v555_v23 = vperm.slane %v7156_v4, 3  ;;  %v5125_v4 = vld [vmem:[%s8344_s5 + $0x430] sm:$0xf0]  ;;  %v5112_v21 = vor.u32 %v5574_v53, %v5109_v11  ;;  %v4955_v11 = vld [vmem:[%s8344_s5 + $0x2c8] sm:$0xf] }
 0x19a   :  { %3343 = vmatmul.bf16.vlgmr.msrb.gmra.mxu2 %v7556_v3  ;;  %3313 = vmatpush.bf16.msrb.mxu3 %v5156_v63  ;;  %v5128_v32 = vor.u32 %v5578_v31, %v5125_v4  ;;  %v4971_v31 = vld [vmem:[%s8344_s5 + $0x2e8] sm:$0xf]  ;;  %v5571_v4 = vld [vmem:[%s8344_s5 + $0x3ec] sm:$0xf] }
 0x19b   :  { %3328 = vmatpush.bf16.msra.mxu1 %v4616_v7  ;;  %3387 = vmatpush.bf16.msra.mxu2 %v4716_v15  ;;  %v4619_v7 = vld [vmem:[%s8344_s5 + $0x28] sm:$0xf]  ;;  %v5453_v15 = vld [vmem:[%s8344_s5 + $0x34] sm:$0xf0]  ;;  %v2149_v33 = vadd.f32 %v7716_v35, %v555_v23  ;;  %v5576_v35 = vld [vmem:[%s8344_s5 + $0x40c] sm:$0xf0] }
 0x19c   :  { %v4620_v16 = vor.u32 %v5453_v15, %v4619_v7  ;;  %v5108_v43 = vor.u32 %v5576_v35, %v5107_v14  ;;  %v5530_v7 = vld [vmem:[%s8344_s5 + $0x2a4] sm:$0xf]  ;;  %v4933_v15 = vld [vmem:[%s8344_s5 + $0x2b0] sm:$0xf0] }
 0x19d   :  { %3366 = vmatpush.bf16.msra.mxu0 %v5016_v38  ;;  %v7751_v1 = vpop.f32.mrf.mxu2  ;;  %v5179_v38 = vld [vmem:[%s8344_s5 + $0x488] sm:$0xf]  ;;  %v2162_v48 = vadd.f32 %v7633_v47, %v2149_v33  ;;  %v5534_v47 = vld [vmem:[%s8344_s5 + $0x2c4] sm:$0xf]  ;;  %v5541_v33 = vld [vmem:[%s8344_s5 + $0x2f4] sm:$0xf0] }
 0x19e   :  { %v4952_v36 = vor.u32 %v5534_v47, %v4949_v58  ;;  %v4972_v53 = vor.u32 %v5541_v33, %v4971_v31  ;;  %v5553_v47 = vld [vmem:[%s8344_s5 + $0x354] sm:$0xf0]  ;;  %v5595_v33 = vld [vmem:[%s8343_s4] sm:$0x1f] }
 0x19f   :  { %3329 = vmatpush.bf16.msra.mxu1 %v4600_v17  ;;  %3388 = vmatpush.bf16.msra.mxu2 %v4700_v60  ;;  %v2150_v61 = vpop.f32.mrf.mxu1  ;;  %v5140_v17 = vor.u32 %v5584_v10, %v5139_v39  ;;  %v5582_v60 = vld [vmem:[%s8344_s5 + $0x444] sm:$0xf]  ;;  %v2175_v63 = vadd.f32 %v7698_v34, %v2162_v48  ;;  %v5148_v34 = vor.u32 %v5585_v0, %v5147_v5  ;;  %v5565_v39 = vld [vmem:[%s8344_s5 + $0x3b4] sm:$0xf0]  ;;  %v5085_v48 = vld [vmem:[%s8344_s5 + $0x3d8] sm:$0xf0] }
 0x1a0   :  { %v5144_v22 = vor.u32 %v5582_v60, %v5141_v19  ;;  %v5083_v61 = vld [vmem:[%s8344_s5 + $0x3c8] sm:$0xf]  ;;  %v5581_v60 = vld [vmem:[%s8344_s5 + $0x434] sm:$0xf0]  ;;  %v5514_v0 = vld [vmem:[%s8344_s5 + $0x224] sm:$0xf] }
 0x1a1   :  { %3367 = vmatpush.bf16.msra.mxu0 %v5000_v55  ;;  %v7791_v13 = vpop.f32.mrf.mxu0  ;;  %3314 = vmatpush.bf16.msrb.mxu3 %v5140_v17  ;;  %v5589_v55 = vld [vmem:[%s8344_s5 + $0x474] sm:$0xf0]  ;;  %v2188_v10 = vadd.f32 %v7751_v1, %v2175_v63  ;;  %v5131_v17 = vld [vmem:[%s8344_s5 + $0x428] sm:$0xf]  ;;  %v4917_v1 = vld [vmem:[%s8344_s5 + $0x290] sm:$0xf0] }
 0x1a2   :  { %3330 = vmatmul.bf16.vlgmr.msra.gmra.mxu1 %v7410_v50  ;;  %v5164_v59 = vor.u32 %v5589_v55, %v5163_v54  ;;  %v4920_v23 = vor.u32 %v5526_v20, %v4917_v1  ;;  %v4885_v54 = vld [vmem:[%s8344_s5 + $0x250] sm:$0xf0]  ;;  %v5563_v63 = vld [vmem:[%s8344_s5 + $0x3ac] sm:$0xf]  ;;  %v5533_v5 = vld [vmem:[%s8344_s5 + $0x2b4] sm:$0xf0] }
 0x1a3   :  { %3389 = vmatpush.bf16.msra.mxu2 %v4684_v26  ;;  %3376 = vmatpush.bf16.msrb.mxu1 %v3249_v42  ;;  %v3091_v26 = vpack.c.b16 %v2939_v12, %v2939_v12  ;;  %v5510_v20 = vld [vmem:[%s8344_s5 + $0x204] sm:$0xf]  ;;  %v4853_v1 = vld [vmem:[%s8344_s5 + $0x210] sm:$0xf0]  ;;  %v5525_v31 = vld [vmem:[%s8344_s5 + $0x274] sm:$0xf0] }
 0x1a5   :  { %3368 = vmatpush.bf16.msra.mxu0 %v4984_v8  ;;  %v2189_v56 = vpop.f32.mrf.mxu2  ;;  %3315 = vmatpush.bf16.msrb.mxu3 %v5124_v29  ;;  %v4936_v8 = vor.u32 %v5530_v7, %v4933_v15  ;;  %v5577_v29 = vld [vmem:[%s8344_s5 + $0x414] sm:$0xf0]  ;;  %v4869_v7 = vld [vmem:[%s8344_s5 + $0x230] sm:$0xf0] }
 0x1a6   :  { %v5561_v56 = vld [vmem:[%s8344_s5 + $0x394] sm:$0xf0] }
 0x1a7   :  { %3390 = vmatpush.bf16.msra.mxu2 %v4668_v37  ;;  %3377 = vmatpush.bf16.msrb.mxu1 %v5176_v45  ;;  %v7782_v9 = vpop.f32.mrf.mxu3  ;;  %v3252_v37 = vsel %vm123_vm0, %v3091_v26, 0  ;;  %v5100_v45 = vor.u32 %v5573_v52, %v5099_v49  ;;  %v5051_v26 = vld [vmem:[%s8344_s5 + $0x388] sm:$0xf]  ;;  %v5518_v52 = vld [vmem:[%s8344_s5 + $0x244] sm:$0xf] }
 0x1a8   :  { %v5052_v28 = vor.u32 %v5561_v56, %v5051_v26  ;;  %v4888_v55 = vor.u32 %v5518_v52, %v4885_v54  ;;  %v4987_v56 = vld [vmem:[%s8344_s5 + $0x308] sm:$0xf] }
 0x1a9   :  { %v2228_v42 = vpop.f32.mrf.mxu0  ;;  %3316 = vmatpush.bf16.msrb.mxu3 %v5108_v43  ;;  %v5557_v43 = vld [vmem:[%s8344_s5 + $0x374] sm:$0xf0]  ;;  %v4859_v54 = vld [vmem:[%s8344_s5 + $0x208] sm:$0xf] }
 0x1aa   :  { %v5035_v42 = vld [vmem:[%s8344_s5 + $0x368] sm:$0xf] }
 0x1ab   :  { %3391 = vmatpush.bf16.msra.mxu2 %v4652_v44  ;;  %3378 = vmatpush.bf16.msrb.mxu1 %v5160_v25  ;;  %v5180_v44 = vor.u32 %v5593_v40, %v5179_v38  ;;  %v5067_v25 = vld [vmem:[%s8344_s5 + $0x3a8] sm:$0xf]  ;;  %v4901_v38 = vld [vmem:[%s8344_s5 + $0x270] sm:$0xf0] }
 0x1ad   :  { %3348 = vmatpush.bf16.msra.mxu3 %v4968_v46  ;;  %v5036_v46 = vor.u32 %v5557_v43, %v5035_v42 }
 0x1af   :  { %3392 = vmatpush.bf16.msra.mxu2 %v4636_v62  ;;  %3379 = vmatpush.bf16.msrb.mxu1 %v5144_v22  ;;  %v2215_v41 = vpop.f32.mrf.mxu3  ;;  %v5569_v62 = vld [vmem:[%s8344_s5 + $0x3d4] sm:$0xf0]  ;;  %v5132_v22 = vor.u32 %v5581_v60, %v5131_v17  ;;  %v4923_v17 = vld [vmem:[%s8344_s5 + $0x288] sm:$0xf]  ;;  %v5559_v60 = vld [vmem:[%s8344_s5 + $0x38c] sm:$0xf] }
 0x1b0   :  { %v5084_v2 = vor.u32 %v5569_v62, %v5083_v61  ;;  %v4939_v62 = vld [vmem:[%s8344_s5 + $0x2a8] sm:$0xf] }
 0x1b1   :  { %3349 = vmatpush.bf16.msra.mxu3 %v4952_v36 }
 0x1b3   :  { %3393 = vmatpush.bf16.msra.mxu2 %v4620_v16  ;;  %3380 = vmatpush.bf16.msrb.mxu1 %v5128_v32  ;;  %v5068_v16 = vor.u32 %v5565_v39, %v5067_v25  ;;  %v5549_v25 = vld [vmem:[%s8344_s5 + $0x334] sm:$0xf0] }
 0x1b5   :  { %3350 = vmatpush.bf16.msra.mxu3 %v4936_v8  ;;  %v5003_v8 = vld [vmem:[%s8344_s5 + $0x328] sm:$0xf] }
 0x1b7   :  { %3394 = vmatpush.bf16.msra.mxu2 %v4604_v51  ;;  %3381 = vmatpush.bf16.msrb.mxu1 %v5112_v21  ;;  %v2200_v19 = vpop.f32.mrf.mxu1  ;;  %v5115_v51 = vld [vmem:[%s8344_s5 + $0x408] sm:$0xf]  ;;  %v5567_v21 = vld [vmem:[%s8344_s5 + $0x3cc] sm:$0xf] }
 0x1b8   :  { %v2201_v18 = vadd.f32 %v2200_v19, %v2188_v10  ;;  %v5116_v41 = vor.u32 %v5577_v29, %v5115_v51  ;;  %v5088_v36 = vor.u32 %v5567_v21, %v5085_v48  ;;  %v5004_v10 = vor.u32 %v5549_v25, %v5003_v8  ;;  %v5053_v19 = vld [vmem:[%s8344_s5 + $0x398] sm:$0xf0]  ;;  %v4907_v29 = vld [vmem:[%s8344_s5 + $0x268] sm:$0xf] }
 0x1b9   :  { %v7890_v12 = vpop.f32.mrf.mxu0  ;;  %3351 = vmatpush.bf16.msra.mxu3 %v4920_v23  ;;  %v5056_v26 = vor.u32 %v5559_v60, %v5053_v19  ;;  %v5005_v21 = vld [vmem:[%s8344_s5 + $0x338] sm:$0xf0] }
 0x1ba   :  { %3395 = vmatmul.bf16.vlgmr.msra.gmra.mxu2 %v7410_v50  ;;  %v2214_v27 = vadd.f32 %v7782_v9, %v2201_v18  ;;  %v5101_v9 = vld [vmem:[%s8344_s5 + $0x3f8] sm:$0xf0]  ;;  %v5529_v18 = vld [vmem:[%s8344_s5 + $0x294] sm:$0xf0] }
 0x1bb   :  { %3441 = vmatpush.bf16.msrb.mxu2 %v3252_v37  ;;  %3426 = vmatpush.bf16.msra.mxu1 %v5100_v45  ;;  %v5522_v37 = vld [vmem:[%s8344_s5 + $0x264] sm:$0xf]  ;;  %v5104_v30 = vor.u32 %v5571_v4, %v5101_v9  ;;  %v5019_v45 = vld [vmem:[%s8344_s5 + $0x348] sm:$0xf]  ;;  %v5555_v4 = vld [vmem:[%s8344_s5 + $0x36c] sm:$0xf] }
 0x1bc   :  { %v2227_v32 = vadd.f32 %v7791_v13, %v2214_v27  ;;  %v4904_v14 = vor.u32 %v5522_v37, %v4901_v38  ;;  %v5545_v27 = vld [vmem:[%s8344_s5 + $0x314] sm:$0xf0]  ;;  %v5037_v9 = vld [vmem:[%s8344_s5 + $0x378] sm:$0xf0]  ;;  %v556_v37 = vperm.slane %v5595_v33, 4  ;;  %v4908_v38 = vor.u32 %v5525_v31, %v4907_v29 }
 0x1bd   :  { %v7936_v40 = vpop.f32.mrf.mxu2  ;;  %v4988_v51 = vor.u32 %v5545_v27, %v4987_v56  ;;  %v5539_v56 = vld [vmem:[%s8344_s5 + $0x2ec] sm:$0xf]  ;;  %v4973_v27 = vld [vmem:[%s8344_s5 + $0x2f8] sm:$0xf0] }
 0x1be   :  { %v2324_v35 = vmax.f32 %v2227_v32, 0.0  ;;  %3352 = vmatpush.bf16.msra.mxu3 %v4904_v14  ;;  %v5040_v32 = vor.u32 %v5555_v4, %v5037_v9  ;;  %v5521_v14 = vld [vmem:[%s8344_s5 + $0x254] sm:$0xf0]  ;;  %v2240_v43 = vadd.f32 %v7936_v40, %v556_v37  ;;  %v4976_v4 = vor.u32 %v5539_v56, %v4973_v27  ;;  %v4827_v9 = vld [vmem:[%s8344_s5 + $0x1c8] sm:$0xf] }
 0x1bf   :  { %3442 = vmatpush.bf16.msrb.mxu2 %v5180_v44  ;;  %3427 = vmatpush.bf16.msra.mxu1 %v5084_v2  ;;  %v2202_v6 = vpop.f32.mrf.mxu1  ;;  %v5537_v44 = vld [vmem:[%s8344_s5 + $0x2d4] sm:$0xf0]  ;;  %v5069_v2 = vld [vmem:[%s8344_s5 + $0x3b8] sm:$0xf0]  ;;  %v5491_v33 = vld [vmem:[%s8344_s5 + $0x16c] sm:$0xf] }
 0x1c0   :  { %v7953_v49 = vpack.c.bf16 %v2324_v35, %v2324_v35  ;;  %v4956_v61 = vor.u32 %v5537_v44, %v4955_v11  ;;  %v5072_v39 = vor.u32 %v5563_v63, %v5069_v2  ;;  %v5551_v35 = vld [vmem:[%s8344_s5 + $0x34c] sm:$0xf]  ;;  %v4875_v11 = vld [vmem:[%s8344_s5 + $0x228] sm:$0xf]  ;;  %v5517_v44 = vld [vmem:[%s8344_s5 + $0x234] sm:$0xf0]  ;;  %v2253_v52 = vadd.f32 %v7890_v12, %v2240_v43 }
 0x1c1   :  { %v2254_v13 = vpop.f32.mrf.mxu0  ;;  %v4876_v48 = vor.u32 %v5517_v44, %v4875_v11  ;;  %v5543_v12 = vld [vmem:[%s8344_s5 + $0x30c] sm:$0xf]  ;;  %v4781_v37 = vld [vmem:[%s8344_s5 + $0x178] sm:$0xf0]  ;;  %v4811_v43 = vld [vmem:[%s8344_s5 + $0x1a8] sm:$0xf] }
 0x1c2   :  { %3304 = vmatmul.bf16.vlgmr.msrb.gmra.mxu0 %v7953_v49  ;;  %3353 = vmatpush.bf16.msra.mxu3 %v4888_v55  ;;  %v5021_v13 = vld [vmem:[%s8344_s5 + $0x358] sm:$0xf0]  ;;  %v5513_v55 = vld [vmem:[%s8344_s5 + $0x214] sm:$0xf0]  ;;  %v5531_v44 = vld [vmem:[%s8344_s5 + $0x2ac] sm:$0xf] }
 0x1c3   :  { %3443 = vmatpush.bf16.msrb.mxu2 %v5164_v59  ;;  %3428 = vmatpush.bf16.msra.mxu1 %v5068_v16  ;;  %v5020_v59 = vor.u32 %v5553_v47, %v5019_v45  ;;  %v4940_v16 = vor.u32 %v5533_v5, %v4939_v62  ;;  %v5507_v45 = vld [vmem:[%s8344_s5 + $0x1ec] sm:$0xf]  ;;  %v4845_v47 = vld [vmem:[%s8344_s5 + $0x1f8] sm:$0xf0]  ;;  %v4860_v63 = vor.u32 %v5513_v55, %v4859_v54  ;;  %v4795_v54 = vld [vmem:[%s8344_s5 + $0x188] sm:$0xf] }
 0x1c4   :  { %3413 = vmatpush.bf16.msrb.mxu0 %v4972_v53  ;;  %v4765_v11 = vld [vmem:[%s8344_s5 + $0x158] sm:$0xf0]  ;;  %v5497_v55 = vld [vmem:[%s8344_s5 + $0x194] sm:$0xf0] }
 0x1c5   :  { %v2241_v15 = vpop.f32.mrf.mxu2 }
 0x1c6   :  { %v4829_v15 = vld [vmem:[%s8344_s5 + $0x1d8] sm:$0xf0] }
 0x1c7   :  { %3444 = vmatpush.bf16.msrb.mxu2 %v5148_v34  ;;  %3429 = vmatpush.bf16.msra.mxu1 %v5052_v28  ;;  %v7970_v58 = vpop.f32.mrf.mxu3  ;;  %v4872_v34 = vor.u32 %v5514_v0, %v4869_v7  ;;  %v4924_v28 = vor.u32 %v5529_v18, %v4923_v17  ;;  %v4848_v0 = vor.u32 %v5507_v45, %v4845_v47  ;;  %v5503_v7 = vld [vmem:[%s8344_s5 + $0x1cc] sm:$0xf]  ;;  %v4749_v47 = vld [vmem:[%s8344_s5 + $0x138] sm:$0xf0] }
 0x1c8   :  { %3414 = vmatpush.bf16.msrb.mxu0 %v4956_v61  ;;  %v5483_v45 = vld [vmem:[%s8344_s5 + $0x12c] sm:$0xf] }
 0x1c9   :  { %3354 = vmatpush.bf16.msra.mxu3 %v4872_v34 }
 0x1cb   :  { %3445 = vmatpush.bf16.msrb.mxu2 %v5132_v22  ;;  %3430 = vmatpush.bf16.msra.mxu1 %v5036_v46  ;;  %v4856_v22 = vor.u32 %v5510_v20, %v4853_v1  ;;  %v5547_v46 = vld [vmem:[%s8344_s5 + $0x32c] sm:$0xf]  ;;  %v4843_v20 = vld [vmem:[%s8344_s5 + $0x1e8] sm:$0xf]  ;;  %v5509_v1 = vld [vmem:[%s8344_s5 + $0x1f4] sm:$0xf0] }
 0x1cc   :  { %3415 = vmatpush.bf16.msrb.mxu0 %v4940_v16  ;;  %v5008_v40 = vor.u32 %v5547_v46, %v5005_v21  ;;  %v4813_v16 = vld [vmem:[%s8344_s5 + $0x1b8] sm:$0xf0] }
 0x1cd   :  { %3355 = vmatpush.bf16.msra.mxu3 %v4856_v22  ;;  %v5495_v22 = vld [vmem:[%s8344_s5 + $0x18c] sm:$0xf]  ;;  %v4941_v46 = vld [vmem:[%s8344_s5 + $0x2b8] sm:$0xf0] }
 0x1cf   :  { %3446 = vmatpush.bf16.msrb.mxu2 %v5116_v41  ;;  %3431 = vmatpush.bf16.msra.mxu1 %v5020_v59  ;;  %v2280_v23 = vpop.f32.mrf.mxu3  ;;  %v4891_v41 = vld [vmem:[%s8344_s5 + $0x248] sm:$0xf] }
 0x1d0   :  { %3416 = vmatpush.bf16.msrb.mxu0 %v4924_v28  ;;  %v4892_v42 = vor.u32 %v5521_v14, %v4891_v41  ;;  %v4957_v41 = vld [vmem:[%s8344_s5 + $0x2d8] sm:$0xf0]  ;;  %v8142_v14 = vld [vmem:[%s8345_s6] sm:$0xf] }
 0x1d1   :  { %v2483_v21 = vperm.slane %v8142_v14, 0 }
 0x1d2   :  { %3369 = vmatmul.bf16.vlgmr.msra.gmra.mxu0 %v7953_v49 }
 0x1d3   :  { %3491 = vmatpush.bf16.msra.mxu2 %v5104_v30  ;;  %3432 = vmatpush.bf16.msra.mxu1 %v5004_v10  ;;  %v5024_v30 = vor.u32 %v5551_v35, %v5021_v13  ;;  %v5499_v10 = vld [vmem:[%s8344_s5 + $0x1ac] sm:$0xf] }
 0x1d4   :  { %3417 = vmatpush.bf16.msrb.mxu0 %v4908_v38  ;;  %v4816_v60 = vor.u32 %v5499_v10, %v4813_v16  ;;  %v5535_v38 = vld [vmem:[%s8344_s5 + $0x2cc] sm:$0xf] }
 0x1d7   :  { %3492 = vmatpush.bf16.msra.mxu2 %v5088_v36  ;;  %3433 = vmatpush.bf16.msra.mxu1 %v4988_v51  ;;  %v2265_v53 = vpop.f32.mrf.mxu1  ;;  %v4989_v36 = vld [vmem:[%s8344_s5 + $0x318] sm:$0xf0]  ;;  %v4844_v51 = vor.u32 %v5509_v1, %v4843_v20  ;;  %v4747_v1 = vld [vmem:[%s8344_s5 + $0x128] sm:$0xf] }
 0x1d8   :  { %3418 = vmatpush.bf16.msrb.mxu0 %v4892_v42  ;;  %v2266_v59 = vadd.f32 %v2265_v53, %v2253_v52  ;;  %v4992_v61 = vor.u32 %v5543_v12, %v4989_v36  ;;  %v4960_v42 = vor.u32 %v5535_v38, %v4957_v41  ;;  %v5487_v53 = vld [vmem:[%s8344_s5 + $0x14c] sm:$0xf]  ;;  %v4944_v52 = vor.u32 %v5531_v44, %v4941_v46  ;;  %v4925_v36 = vld [vmem:[%s8344_s5 + $0x298] sm:$0xf0] }
 0x1d9   :  { %v2304_v6 = vpop.f32.mrf.mxu0  ;;  %v5527_v12 = vld [vmem:[%s8344_s5 + $0x28c] sm:$0xf]  ;;  %v4669_v44 = vld [vmem:[%s8344_s5 + $0x98] sm:$0xf0] }
 0x1da   :  { %v2279_v34 = vadd.f32 %v7970_v58, %v2266_v59  ;;  %v4796_v59 = vor.u32 %v5497_v55, %v4795_v54  ;;  %v5471_v41 = vld [vmem:[%s8344_s5 + $0xcc] sm:$0xf]  ;;  %v4637_v54 = vld [vmem:[%s8344_s5 + $0x58] sm:$0xf0]  ;;  %v2484_v55 = vperm.slane %v8142_v14, 1 }
 0x1db   :  { %3493 = vmatpush.bf16.msra.mxu2 %v5072_v39  ;;  %v4832_v39 = vor.u32 %v5503_v7, %v4829_v15  ;;  %v4733_v15 = vld [vmem:[%s8344_s5 + $0x118] sm:$0xf0] }
 0x1dc   :  { %3419 = vmatpush.bf16.msrb.mxu0 %v4876_v48  ;;  %v4768_v48 = vor.u32 %v5487_v53, %v4765_v11  ;;  %v5463_v11 = vld [vmem:[%s8344_s5 + $0x8c] sm:$0xf] }
 0x1dd   :  { %v2291_v62 = vpop.f32.mrf.mxu2  ;;  %v4672_v46 = vor.u32 %v5463_v11, %v4669_v44 }
 0x1de   :  { %v2292_v25 = vadd.f32 %v2291_v62, %v2279_v34  ;;  %v4752_v62 = vor.u32 %v5483_v45, %v4749_v47  ;;  %v5523_v34 = vld [vmem:[%s8344_s5 + $0x26c] sm:$0xf] }
 0x1df   :  { %3494 = vmatpush.bf16.msra.mxu2 %v5056_v26  ;;  %v2267_v5 = vpop.f32.mrf.mxu1  ;;  %v4797_v26 = vld [vmem:[%s8344_s5 + $0x198] sm:$0xf0]  ;;  %v5451_v47 = vld [vmem:[%s8344_s5 + $0x2c] sm:$0xf] }
 0x1e0   :  { %3420 = vmatpush.bf16.msrb.mxu0 %v4860_v63  ;;  %v2305_v58 = vadd.f32 %v2304_v6, %v2292_v25  ;;  %v4800_v31 = vor.u32 %v5495_v22, %v4797_v26  ;;  %v5501_v6 = vld [vmem:[%s8344_s5 + $0x1b4] sm:$0xf0]  ;;  %v4928_v63 = vor.u32 %v5527_v12, %v4925_v36  ;;  %v5515_v26 = vld [vmem:[%s8344_s5 + $0x22c] sm:$0xf]  ;;  %v4621_v12 = vld [vmem:[%s8344_s5 + $0x38] sm:$0xf0] }
 0x1e1   :  { %v2306_v2 = vpop.f32.mrf.mxu0  ;;  %v5493_v5 = vld [vmem:[%s8344_s5 + $0x174] sm:$0xf0] }
 0x1e2   :  { %v4779_v2 = vld [vmem:[%s8344_s5 + $0x168] sm:$0xf]  ;;  %v5485_v22 = vld [vmem:[%s8344_s5 + $0x134] sm:$0xf0] }
 0x1e3   :  { %3495 = vmatpush.bf16.msra.mxu2 %v5040_v32  ;;  %3421 = vmatmul.bf16.vlgmr.msrb.gmra.mxu0 %v7641_v57  ;;  %v5505_v32 = vld [vmem:[%s8344_s5 + $0x1d4] sm:$0xf0]  ;;  %v4748_v56 = vor.u32 %v5485_v22, %v4747_v1  ;;  %v5575_v22 = vld [vmem:[%s8344_s5 + $0x40c] sm:$0xf] }
 0x1e4   :  { %3465 = vmatpush.bf16.msra.mxu0 %v4848_v0  ;;  %v4828_v13 = vor.u32 %v5505_v32, %v4827_v9  ;;  %v5479_v0 = vld [vmem:[%s8344_s5 + $0x10c] sm:$0xf]  ;;  %v4861_v32 = vld [vmem:[%s8344_s5 + $0x218] sm:$0xf0] }
 0x1e5   :  { %v2293_v17 = vpop.f32.mrf.mxu2  ;;  %v4736_v10 = vor.u32 %v5479_v0, %v4733_v15  ;;  %v5511_v9 = vld [vmem:[%s8344_s5 + $0x20c] sm:$0xf]  ;;  %v4605_v0 = vld [vmem:[%s8344_s5 + $0x18] sm:$0xf0] }
 0x1e6   :  { %v4763_v17 = vld [vmem:[%s8344_s5 + $0x148] sm:$0xf]  ;;  %v4864_v38 = vor.u32 %v5511_v9, %v4861_v32 }
 0x1e7   :  { %3496 = vmatpush.bf16.msra.mxu2 %v5024_v30  ;;  %v8088_v8 = vpop.f32.mrf.mxu3  ;;  %v2317_v19 = vpop.f32.mrf.mxu1  ;;  %v4784_v30 = vor.u32 %v5491_v33, %v4781_v37 }
 0x1e8   :  { %3466 = vmatpush.bf16.msra.mxu0 %v4832_v39  ;;  %v2318_v18 = vadd.f32 %v2317_v19, %v2305_v58  ;;  %v4780_v39 = vor.u32 %v5493_v5, %v4779_v2  ;;  %v5489_v58 = vld [vmem:[%s8344_s5 + $0x154] sm:$0xf0]  ;;  %v4893_v19 = vld [vmem:[%s8344_s5 + $0x258] sm:$0xf0]  ;;  %v4624_v2 = vor.u32 %v5451_v47, %v4621_v12  ;;  %v5447_v5 = vld [vmem:[%s8344_s5 + $0xc] sm:$0xf] }
 0x1e9   :  { %v4608_v15 = vor.u32 %v5447_v5, %v4605_v0  ;;  %v2485_v47 = vperm.slane %v8142_v14, 2 }
 0x1ea   :  { %v2325_v28 = vmax.f32 %v2318_v18, 0.0  ;;  %v4764_v18 = vor.u32 %v5489_v58, %v4763_v17  ;;  %v5583_v58 = vld [vmem:[%s8344_s5 + $0x44c] sm:$0xf] }
 0x1eb   :  { %3497 = vmatpush.bf16.msra.mxu2 %v5008_v40  ;;  %v4812_v40 = vor.u32 %v5501_v6, %v4811_v43 }
 0x1ec   :  { %3467 = vmatpush.bf16.msra.mxu0 %v4816_v60  ;;  %v8115_v29 = vpack.c.bf16 %v2325_v28, %v2325_v28  ;;  %v5519_v60 = vld [vmem:[%s8344_s5 + $0x24c] sm:$0xf]  ;;  %v4731_v28 = vld [vmem:[%s8344_s5 + $0x108] sm:$0xf] }
 0x1ed   :  { %v4896_v20 = vor.u32 %v5519_v60, %v4893_v19  ;;  %v5149_v60 = vld [vmem:[%s8344_s5 + $0x458] sm:$0xf0] }
 0x1ee   :  { %5185 = vmatmul.msk.bf16.vlgmr.msrb.gmra.mxu3 %vm3241_vm3, %v8115_v29  ;;  %5186 = vmatmul.msk.bf16.vlgmr.msrb.gmra.mxu1 %vm3241_vm3, %v8115_v29  ;;  %v5152_v19 = vor.u32 %v5583_v58, %v5149_v60 }
 0x1ef   :  { %3498 = vmatpush.bf16.msra.mxu2 %v4992_v61  ;;  %v3268_v23 = vpop.f32.mrf.mxu3  ;;  %3400 = vmatpush.bf16.msrb.mxu3 %v4844_v51  ;;  %v2319_v35 = vpop.f32.mrf.mxu1  ;;  %v3267_v61 = vadd.f32 %v8088_v8, %v2483_v21  ;;  %v4909_v8 = vld [vmem:[%s8344_s5 + $0x278] sm:$0xf0]  ;;  %v5481_v51 = vld [vmem:[%s8344_s5 + $0x114] sm:$0xf0] }
 0x1f0   :  { %5187 = vmatmul.msk.bf16.vlgmr.msrb.gmra.mxu2 %vm3241_vm3, %v8115_v29  ;;  %3468 = vmatpush.bf16.msra.mxu0 %v4800_v31  ;;  %v4912_v16 = vor.u32 %v5523_v34, %v4909_v8  ;;  %v5475_v31 = vld [vmem:[%s8344_s5 + $0xec] sm:$0xf]  ;;  %v4732_v33 = vor.u32 %v5481_v51, %v4731_v28  ;;  %v4701_v35 = vld [vmem:[%s8344_s5 + $0xd8] sm:$0xf0] }
 0x1f1   :  { %3478 = vmatpush.bf16.msrb.mxu1 %v4976_v4  ;;  %v4717_v4 = vld [vmem:[%s8344_s5 + $0xf8] sm:$0xf0] }
 0x1f2   :  { %v4720_v37 = vor.u32 %v5475_v31, %v4717_v4  ;;  %v5181_v8 = vld [vmem:[%s8344_s5 + $0x498] sm:$0xf0] }
 0x1f3   :  { %3401 = vmatpush.bf16.msrb.mxu3 %v4828_v13  ;;  %v4704_v13 = vor.u32 %v5471_v41, %v4701_v35 }
 0x1f4   :  { %3469 = vmatpush.bf16.msra.mxu0 %v4784_v30  ;;  %v5467_v30 = vld [vmem:[%s8344_s5 + $0xac] sm:$0xf] }
 0x1f5   :  { %3479 = vmatpush.bf16.msrb.mxu1 %v4960_v42  ;;  %v4685_v42 = vld [vmem:[%s8344_s5 + $0xb8] sm:$0xf0] }
 0x1f6   :  { %v4688_v53 = vor.u32 %v5467_v30, %v4685_v42 }
 0x1f7   :  { %3402 = vmatpush.bf16.msrb.mxu3 %v4812_v40 }
 0x1f8   :  { %3470 = vmatpush.bf16.msra.mxu0 %v4768_v48 }
 0x1f9   :  { %3480 = vmatpush.bf16.msrb.mxu1 %v4944_v52  ;;  %v5455_v52 = vld [vmem:[%s8344_s5 + $0x4c] sm:$0xf] }
 0x1fa   :  { %v4640_v45 = vor.u32 %v5455_v52, %v4637_v54 }
 0x1fb   :  { %3403 = vmatpush.bf16.msrb.mxu3 %v4796_v59 }
 0x1fc   :  { %3471 = vmatpush.bf16.msra.mxu0 %v4752_v62 }
 0x1fd   :  { %3481 = vmatpush.bf16.msrb.mxu1 %v4928_v63 }
 0x1fe   :  { %3356 = vmatmul.bf16.vlgmr.msra.gmra.mxu3 %v7641_v57  ;;  %3434 = vmatmul.bf16.vlgmr.msra.gmra.mxu1 %v7953_v49 }
 0x1ff   :  { %v3279_v7 = vpop.f32.mrf.mxu1  ;;  %3404 = vmatpush.bf16.msrb.mxu3 %v4780_v39 }
 0x200   :  { %v3280_v25 = vadd.f32 %v3279_v7, %v3267_v61  ;;  %3499 = vmatmul.bf16.vlgmr.msra.gmra.mxu2 %v7953_v49  ;;  %3472 = vmatpush.bf16.msra.mxu0 %v4736_v10  ;;  %v4877_v49 = vld [vmem:[%s8344_s5 + $0x238] sm:$0xf0]  ;;  %v2940_v61 = vunpack.c.h.b16 %v7780_v24  ;;  %v5591_v24 = vld [vmem:[%s8344_s5 + $0x48c] sm:$0xf] }
 0x201   :  { %3482 = vmatpush.bf16.msrb.mxu1 %v4912_v16  ;;  %v4880_v27 = vor.u32 %v5515_v26, %v4877_v49  ;;  %v5184_v39 = vor.u32 %v5591_v24, %v5181_v8  ;;  %v5587_v10 = vld [vmem:[%s8344_s5 + $0x46c] sm:$0xf]  ;;  %v5165_v16 = vld [vmem:[%s8344_s5 + $0x478] sm:$0xf0] }
 0x202   :  { %v3092_v7 = vpack.c.b16 %v2940_v61, %v2940_v61  ;;  %v5168_v17 = vor.u32 %v5587_v10, %v5165_v16  ;;  %v2486_v10 = vperm.slane %v8142_v14, 3 }
 0x203   :  { %3473 = vmatmul.bf16.vlgmr.msra.gmra.mxu0 %v7556_v3  ;;  %3405 = vmatpush.bf16.msrb.mxu3 %v4764_v18  ;;  %v5579_v18 = vld [vmem:[%s8344_s5 + $0x42c] sm:$0xf] }
 0x204   :  { %v3255_v34 = vsel %vm123_vm0, %v3092_v7, 0 }
 0x205   :  { %3483 = vmatpush.bf16.msrb.mxu1 %v4896_v20 }
 0x207   :  { %v3281_v23 = vpop.f32.mrf.mxu1  ;;  %3406 = vmatpush.bf16.msrb.mxu3 %v4748_v56 }
 0x208   :  { %v5117_v23 = vld [vmem:[%s8344_s5 + $0x418] sm:$0xf0] }
 0x209   :  { %3484 = vmatpush.bf16.msrb.mxu1 %v4880_v27  ;;  %v3292_v43 = vpop.f32.mrf.mxu2  ;;  %v5120_v26 = vor.u32 %v5575_v22, %v5117_v23 }
 0x20a   :  { %v3293_v6 = vadd.f32 %v3292_v43, %v3280_v25 }
 0x20b   :  { %3407 = vmatpush.bf16.msrb.mxu3 %v4732_v33 }
 0x20d   :  { %3485 = vmatpush.bf16.msrb.mxu1 %v4864_v38 }
 0x20e   :  { %3408 = vmatmul.bf16.vlgmr.msrb.gmra.mxu3 %v7556_v3  ;;  %v5459_v3 = vld [vmem:[%s8344_s5 + $0x6c] sm:$0xf] }
 0x20f   :  { %3452 = vmatpush.bf16.msra.mxu3 %v4720_v37 }
 0x210   :  { %3486 = vmatmul.bf16.vlgmr.msrb.gmra.mxu1 %v7641_v57  ;;  %v4653_v57 = vld [vmem:[%s8344_s5 + $0x78] sm:$0xf0] }
 0x211   :  { %v3294_v40 = vpop.f32.mrf.mxu2  ;;  %v4656_v48 = vor.u32 %v5459_v3, %v4653_v57 }
 0x213   :  { %3453 = vmatpush.bf16.msra.mxu3 %v4704_v13 }
 0x217   :  { %3454 = vmatpush.bf16.msra.mxu3 %v4688_v53 }
 0x21b   :  { %3455 = vmatpush.bf16.msra.mxu3 %v4672_v46 }
 0x21d   :  { %v3344_v62 = vpop.f32.mrf.mxu2 }
 0x21f   :  { %v3331_v21 = vpop.f32.mrf.mxu1  ;;  %3456 = vmatpush.bf16.msra.mxu3 %v4656_v48 }
 0x220   :  { %v3332_v36 = vadd.f32 %v3331_v21, %v2484_v55 }
 0x222   :  { %v3345_v63 = vadd.f32 %v3344_v62, %v3332_v36 }
 0x223   :  { %3457 = vmatpush.bf16.msra.mxu3 %v4640_v45 }
 0x225   :  { %v3346_v25 = vpop.f32.mrf.mxu2 }
 0x226   :  { %v14_v25 = vstv %s8347_s8 }
 0x227   :  { %v3333_v59 = vpop.f32.mrf.mxu1  ;;  %3458 = vmatpush.bf16.msra.mxu3 %v4624_v2  ;;  %15 = vst [vmem:[#allocation2] sm:$0x1] %v14_v25 }
 0x22b   :  { %3459 = vmatpush.bf16.msra.mxu3 %v4608_v15 }
 0x22e   :  { %3460 = vmatmul.bf16.vlgmr.msra.gmra.mxu3 %v7410_v50  ;;  %v5133_v50 = vld [vmem:[%s8344_s5 + $0x438] sm:$0xf0] }
 0x22f   :  { %3506 = vmatpush.bf16.msrb.mxu3 %v3255_v34  ;;  %v5136_v1 = vor.u32 %v5579_v18, %v5133_v50 }
 0x233   :  { %3507 = vmatpush.bf16.msrb.mxu3 %v5184_v39 }
 0x237   :  { %3508 = vmatpush.bf16.msrb.mxu3 %v5168_v17 }
 0x23b   :  { %3509 = vmatpush.bf16.msrb.mxu3 %v5152_v19 }
 0x23d   :  { %v3396_v20 = vpop.f32.mrf.mxu2 }
 0x23e   :  { %v3397_v59 = vadd.f32 %v3396_v20, %v2485_v47 }
 0x23f   :  { %3510 = vmatpush.bf16.msrb.mxu3 %v5136_v1  ;;  %v3305_v56 = vpop.f32.mrf.mxu0 }
 0x240   :  { %v3306_v27 = vadd.f32 %v3305_v56, %v3293_v6  ;;  %v5594_v56 = vld [vmem:[#allocation2] ss:$0 sm:$0xff] }
 0x243   :  { %3511 = vmatpush.bf16.msrb.mxu3 %v5120_v26 }
 0x245   :  { %v3398_v49 = vpop.f32.mrf.mxu2 }
 0x246   :  { %5188 = vmatmul.msk.bf16.vlgmr.msrb.gmra.mxu3 %vm3241_vm3, %v8115_v29  ;;  %v3521_v29 = vld [vmem:[%s8346_s7] sm:$0xf] }
 0x247   :  { %v3307_v28 = vpop.f32.mrf.mxu0  ;;  %v3523_v3 = vperm.slane %v3521_v29, 0  ;;  %v3524_v21 = vperm.slane %v3521_v29, 1  ;;  %v3525_v7 = vperm.slane %v3521_v29, 2  ;;  %v3526_v20 = vperm.slane %v3521_v29, 3 }
 0x24f   :  { %v3370_v51 = vpop.f32.mrf.mxu0 }
 0x257   :  { %v3372_v31 = vpop.f32.mrf.mxu0 }
 0x260   :  { %v3422_v4 = vpop.f32.mrf.mxu0 }
 0x268   :  { %v3424_v9 = vpop.f32.mrf.mxu0 }
 0x26b   :  { %v3383_v32 = vpop.f32.mrf.mxu1 }
 0x271   :  { %v3318_v33 = vpop.f32.mrf.mxu3 }
 0x272   :  { %v3319_v37 = vadd.f32 %v3318_v33, %v3306_v27 }
 0x273   :  { %v3448_v38 = vpop.f32.mrf.mxu2  ;;  %v3385_v41 = vpop.f32.mrf.mxu1 }
 0x274   :  { %v3517_v46 = vmax.f32 %v3319_v37, 0.0 }
 0x276   :  { %v3531_v54 = vmul.f32 %v3523_v3, %v3517_v46 }
 0x279   :  { %v3320_v35 = vpop.f32.mrf.mxu3 }
 0x27b   :  { %v3450_v13 = vpop.f32.mrf.mxu2  ;;  %v3435_v30 = vpop.f32.mrf.mxu1 }
 0x280   :  { %v3474_v42 = vpop.f32.mrf.mxu0 }
 0x281   :  { %v3357_v43 = vpop.f32.mrf.mxu3 }
 0x282   :  { %v3358_v53 = vadd.f32 %v3357_v43, %v3345_v63 }
 0x283   :  { %v3500_v11 = vpop.f32.mrf.mxu2  ;;  %v3437_v6 = vpop.f32.mrf.mxu1 }
 0x284   :  { %v3371_v44 = vadd.f32 %v3370_v51, %v3358_v53 }
 0x286   :  { %v3384_v57 = vadd.f32 %v3383_v32, %v3371_v44 }
 0x288   :  { %v3518_v40 = vmax.f32 %v3384_v57, 0.0  ;;  %v3476_v48 = vpop.f32.mrf.mxu0 }
 0x289   :  { %v3359_v52 = vpop.f32.mrf.mxu3 }
 0x28a   :  { %v3532_v45 = vmul.f32 %v3524_v21, %v3518_v40 }
 0x28b   :  { %v3502_v55 = vpop.f32.mrf.mxu2 }
 0x28c   :  { %v3535_v36 = vadd.f32 %v3532_v45, %v3531_v54 }
 0x28d   :  { %v3487_v12 = vpop.f32.mrf.mxu1 }
 0x291   :  { %v3409_v61 = vpop.f32.mrf.mxu3 }
 0x292   :  { %v3410_v62 = vadd.f32 %v3409_v61, %v3397_v59 }
 0x294   :  { %v3423_v63 = vadd.f32 %v3422_v4, %v3410_v62 }
 0x295   :  { %v3489_v2 = vpop.f32.mrf.mxu1 }
 0x296   :  { %v3436_v5 = vadd.f32 %v3435_v30, %v3423_v63 }
 0x298   :  { %v3449_v0 = vadd.f32 %v3448_v38, %v3436_v5 }
 0x299   :  { %v3411_v15 = vpop.f32.mrf.mxu3 }
 0x29a   :  { %v3519_v34 = vmax.f32 %v3449_v0, 0.0 }
 0x29c   :  { %v3533_v24 = vmul.f32 %v3525_v7, %v3519_v34 }
 0x29e   :  { %v3536_v8 = vadd.f32 %v3535_v36, %v3533_v24 }
 0x2b1   :  { %v3461_v39 = vpop.f32.mrf.mxu3 }
 0x2b2   :  { %v3462_v16 = vadd.f32 %v3461_v39, %v2486_v10 }
 0x2b4   :  { %v3475_v58 = vadd.f32 %v3474_v42, %v3462_v16 }
 0x2b6   :  { %v3488_v60 = vadd.f32 %v3487_v12, %v3475_v58 }
 0x2b8   :  { %v3501_v19 = vadd.f32 %v3500_v11, %v3488_v60 }
 0x2b9   :  { %v3463_v17 = vpop.f32.mrf.mxu3 }
 0x2c9   :  { %v3513_v18 = vpop.f32.mrf.mxu3 }
 0x2ca   :  { %v3514_v50 = vadd.f32 %v3513_v18, %v3501_v19 }
 0x2cc   :  { %v3520_v1 = vmax.f32 %v3514_v50, 0.0 }
 0x2ce   :  { %v3534_v22 = vmul.f32 %v3526_v20, %v3520_v1 }
 0x2d0   :  { %v3538_v23 = vsel %vm3537_vm4, %v3534_v22, 0.0 }
 0x2d1   :  { %v3515_v26 = vpop.f32.mrf.mxu3  ;;  %v3539_v49 = vadd.f32 %v3538_v23, %v3536_v8 }
 0x2d3   :  { %3540 = vadd.xlane.f32.xlu0 %v3539_v49 }
 0x346   :  { %v3541_v27 = vpop.xlane.xlu0 %3540 }
 0x347   :  { %v3546_v28 = vadd.f32 %v5594_v56, %v3541_v27 }
 0x349   :  { %3548 = vst.msk [vmem:[%s8348_s9] sm:$0xff] %vm3547_vm5, %v3546_v28 }

</bundles_post_ra>
